<compile_context>
chip_gen: v5e
topology: v5e:2x2
jax: 0.10.0
libtpu: 0.0.40
codegen_flags: <defaults>
</compile_context>

<pallas_src>
import numpy as np
import jax
import jax.numpy as jnp
from jax.experimental import pallas as pl
from jax.experimental.pallas import tpu as pltpu

NB_HIDDEN = 100
SB = 8            # samples per grid block
TB = 2 * SB       # images per grid block (digit0 imgs 0..7, digit1 imgs 8..15) -> 8-aligned splits
R1 = 36 * TB      # conv1 rows per block: 6x6 pooled positions x TB images = 576
R2 = 16 * TB      # conv2 rows per block: 4x4 positions x TB images = 256


# ----------------------------- one-time parameter prep (hoisted out of the forward) --------

def prepare_params(params):
    """Transpose / permute / zero-pad the PyTorch-layout weights once, outside jit."""
    w1, b1, w2, b2, wf1, bf1, wf2, bf2, wf3, bf3, wf4, bf4 = [
        jnp.asarray(p, jnp.float32) for p in params]

    # conv1 (32,1,3,3) -> tap-major (9,32), then block-diagonal over the 4 pooling offsets
    # so the (576,36)x(36,128) matmul emits all 4 offsets' 32 channels side by side in lanes.
    w1t = jnp.transpose(w1, (2, 3, 1, 0)).reshape(9, 32)
    w1bd = jnp.zeros((36, 128), jnp.float32)
    for k in range(4):
        w1bd = w1bd.at[k * 9:(k + 1) * 9, k * 32:(k + 1) * 32].set(w1t)
    b1t = jnp.tile(b1.reshape(1, 32), (1, 4))                                # (1, 128)

    # conv2 (64,32,3,3) -> (288,64): rows ordered (di, dj, c_in) tap-major, channel-minor.
    w2k = jnp.transpose(w2, (2, 3, 1, 0)).reshape(288, 64)
    b2r = b2.reshape(1, 64)

    # fc1 (100,256): torch flattens NCHW as c*4 + s; kernel a2 lanes are s*64 + c.
    wf1p = jnp.zeros((256, 128), jnp.float32)
    wf1p = wf1p.at[:, :NB_HIDDEN].set(
        jnp.transpose(wf1.reshape(NB_HIDDEN, 64, 4), (2, 1, 0)).reshape(256, NB_HIDDEN))
    bf1p = jnp.zeros((1, 128), jnp.float32).at[0, :NB_HIDDEN].set(bf1)

    # fc2 (10,100): K padded only to 104 (multiple of 8), 128 output lanes.
    wf2p = jnp.zeros((104, 128), jnp.float32).at[:NB_HIDDEN, :10].set(jnp.transpose(wf2))
    bf2p = jnp.zeros((1, 128), jnp.float32).at[0, :10].set(bf2)

    # fc3 (100,20): split into x1 / x2 halves, K padded 10 -> 16.
    wf3a = jnp.zeros((16, 128), jnp.float32).at[:10, :NB_HIDDEN].set(jnp.transpose(wf3[:, :10]))
    wf3b = jnp.zeros((16, 128), jnp.float32).at[:10, :NB_HIDDEN].set(jnp.transpose(wf3[:, 10:]))
    bf3p = jnp.zeros((1, 128), jnp.float32).at[0, :NB_HIDDEN].set(bf3)

    # fc4 (2,100): K padded to 104.
    wf4p = jnp.zeros((104, 128), jnp.float32).at[:NB_HIDDEN, :2].set(jnp.transpose(wf4))
    bf4p = jnp.zeros((1, 128), jnp.float32).at[0, :2].set(bf4)

    return (w1bd, b1t, w2k, b2r, wf1p, bf1p, wf2p, bf2p, wf3a, wf3b, bf3p, wf4p, bf4p)


# ----------------------------- fused Pallas kernel (one grid step = 8 samples) --------------

def _fused_kernel(p1_ref, w1_ref, b1_ref, w2_ref, b2_ref,
                  wf1_ref, bf1_ref, wf2_ref, bf2_ref,
                  wf3a_ref, wf3b_ref, bf3_ref, wf4_ref, bf4_ref,
                  z1_ref, z2_ref, out_ref):
    f32 = jnp.float32

    # ---- conv1 + 2x2 maxpool + relu: ONE lane-dense matmul; the 4 pooling offsets live in
    #      lane blocks [32k, 32k+32) of the (R1, 128) result; pool = max over the 4 blocks.
    c1 = jnp.dot(p1_ref[...], w1_ref[...], preferred_element_type=f32) + b1_ref[...]
    a1 = jnp.maximum(jnp.maximum(c1[:, 0:32], c1[:, 32:64]),
                     jnp.maximum(c1[:, 64:96], c1[:, 96:128]))
    a1 = jnp.maximum(a1, 0.0)                       # (R1, 32), rows = (Y*6 + X)*TB + img

    # ---- conv2: ONE (R2, 288) x (288, 64) matmul.  The patch matrix is assembled from 36
    #      contiguous, 8-sublane-aligned row slices of the VMEM-resident a1 (4 per kernel tap).
    taps = []
    for di in range(3):
        for dj in range(3):
            rows = [a1[((y2 + di) * 6 + dj) * TB:((y2 + di) * 6 + dj) * TB + 4 * TB, :]
                    for y2 in range(4)]
            taps.append(jnp.concatenate(rows, axis=0))          # (R2, 32)
    patch = jnp.concatenate(taps, axis=1)                        # (R2, 288), cols (di,dj,c)
    c2 = jnp.dot(patch, w2_ref[...], preferred_element_type=f32) + b2_ref[...]   # (R2, 64)

    # ---- 2x2 maxpool + relu, assembled straight into fc1's (TB, 256) lane layout
    def blk(y2, x2):
        s = (y2 * 4 + x2) * TB
        return c2[s:s + TB, :]
    quarters = []
    for sy in range(2):
        for sx in range(2):
            quarters.append(jnp.maximum(
                jnp.maximum(blk(2 * sy, 2 * sx), blk(2 * sy, 2 * sx + 1)),
                jnp.maximum(blk(2 * sy + 1, 2 * sx), blk(2 * sy + 1, 2 * sx + 1))))
    a2 = jnp.maximum(jnp.concatenate(quarters, axis=1), 0.0)     # (TB, 256), lanes (s, c)

    # ---- fc1 (256 -> 100, padded to 128) + relu: single K=256 matmul
    h = jnp.maximum(jnp.dot(a2, wf1_ref[...], preferred_element_type=f32) + bf1_ref[...], 0.0)

    # ---- fc2: per-image digit logits (lanes >= 10 are exactly zero by construction)
    z = jnp.dot(h[:, :104], wf2_ref[...], preferred_element_type=f32) + bf2_ref[...]   # (TB, 128)
    z1 = z[0:SB, :]                                  # digit-0 images of this block's samples
    z2 = z[SB:TB, :]                                 # digit-1 images
    z1_ref[...] = z1
    z2_ref[...] = z2

    # ---- fc3(cat(x1, x2)) + relu, fc4 -> final 2-way logits
    g = jnp.maximum(jnp.dot(z1[:, :16], wf3a_ref[...], preferred_element_type=f32)
                    + jnp.dot(z2[:, :16], wf3b_ref[...], preferred_element_type=f32)
                    + bf3_ref[...], 0.0)
    out_ref[...] = jnp.dot(g[:, :104], wf4_ref[...], preferred_element_type=f32) + bf4_ref[...]


def _fused_call(p1, prepped, nblk):
    weight_specs = [pl.BlockSpec(p.shape, lambda b: (0, 0)) for p in prepped]
    return pl.pallas_call(
        _fused_kernel,
        grid=(nblk,),
        out_shape=(jax.ShapeDtypeStruct((nblk * SB, 128), jnp.float32),
                   jax.ShapeDtypeStruct((nblk * SB, 128), jnp.float32),
                   jax.ShapeDtypeStruct((nblk * SB, 128), jnp.float32)),
        in_specs=[pl.BlockSpec((R1, 36), lambda b: (b, 0))] + weight_specs,
        out_specs=(pl.BlockSpec((SB, 128), lambda b: (b, 0)),
                   pl.BlockSpec((SB, 128), lambda b: (b, 0)),
                   pl.BlockSpec((SB, 128), lambda b: (b, 0))),
        compiler_params=pltpu.CompilerParams(
            dimension_semantics=("parallel",),
            vmem_limit_bytes=32 * 1024 * 1024),
    )(p1, *prepped)


# ----------------------------- forward (jitted wrapper) -------------------------------------

def net_aux1_forward(x, prepped):
    """x: (B, 2, 14, 14) float32 (NCHW, like PyTorch).  Returns (x1, x2, x) like NetAux1."""
    B = x.shape[0]
    nblk = -(-B // SB)                  # cdiv
    BP = nblk * SB
    xp = x if BP == B else jnp.pad(x, ((0, BP - B), (0, 0), (0, 0), (0, 0)))

    # Per block of SB samples: images ordered [digit0 of the SB samples, digit1 of them].
    imgs = xp.reshape(nblk, SB, 2, 14, 14).transpose(0, 2, 1, 3, 4).reshape(nblk * TB, 1, 14, 14)

    # ONE fused im2col op (replaces the old ~100-op slice/stack/concat glue).
    # patches[n, di*3+dj, y, x] = imgs[n, 0, y+di, x+dj]
    patches = jax.lax.conv_general_dilated_patches(imgs, (3, 3), (1, 1), 'VALID')

    # Rows (block, Y, X, img); cols (u, v, di, dj): the 4 pooling offsets' 9-tap patches are
    # packed side by side along lanes -> one lane-dense conv1 matmul in the kernel.
    p1 = (patches.reshape(nblk, TB, 9, 6, 2, 6, 2)
                 .transpose(0, 3, 5, 1, 4, 6, 2)
                 .reshape(nblk * R1, 36))

    z1, z2, out = _fused_call(p1, prepped, nblk)
    return z1[:B, :10], z2[:B, :10], out[:B, :2]


# ----------------------------- numpy reference (exact torch semantics) ----------------------

def reference_forward_np(x, params):
    w1, b1, w2, b2, wf1, bf1, wf2, bf2, wf3, bf3, wf4, bf4 = [
        np.asarray(p, np.float64) for p in params]
    x = np.asarray(x, np.float64)

    def conv2d(inp, w, b):
        n, c, h, wd = inp.shape
        o, _, kh, kw = w.shape
        ho, wo = h - kh + 1, wd - kw + 1
        out = np.zeros((n, o, ho, wo))
        for di in range(kh):
            for dj in range(kw):
                out += np.einsum('nchw,oc->nohw', inp[:, :, di:di + ho, dj:dj + wo],
                                 w[:, :, di, dj])
        return out + b[None, :, None, None]

    def maxpool2(inp):
        n, c, h, wd = inp.shape
        return inp.reshape(n, c, h // 2, 2, wd // 2, 2).max(axis=(3, 5))

    def branch(img):
        h = np.maximum(maxpool2(conv2d(img, w1, b1)), 0.0)
        h = np.maximum(maxpool2(conv2d(h, w2, b2)), 0.0)
        h = h.reshape(h.shape[0], -1)
        h = np.maximum(h @ wf1.T + bf1, 0.0)
        return h @ wf2.T + bf2

    x1 = branch(x[:, 0:1])
    x2 = branch(x[:, 1:2])
    g = np.maximum(np.concatenate([x1, x2], axis=1) @ wf3.T + bf3, 0.0)
    return x1, x2, g @ wf4.T + bf4


# ----------------------------- main ----------------------------------------------------------

if __name__ == "__main__":
    B = 2
    key = jax.random.PRNGKey(0)
    keys = jax.random.split(key, 13)

    def uinit(k, shape, bound=0.3):
        return jax.random.uniform(k, shape, jnp.float32, -bound, bound)

    x = jax.random.normal(keys[0], (B, 2, 14, 14), dtype=jnp.float32)
    params = (
        uinit(keys[1], (32, 1, 3, 3)),         # conv1.weight
        uinit(keys[2], (32,)),                 # conv1.bias
        uinit(keys[3], (64, 32, 3, 3)),        # conv2.weight
        uinit(keys[4], (64,)),                 # conv2.bias
        uinit(keys[5], (NB_HIDDEN, 256)),      # fc1.weight
        uinit(keys[6], (NB_HIDDEN,)),          # fc1.bias
        uinit(keys[7], (10, NB_HIDDEN)),       # fc2.weight
        uinit(keys[8], (10,)),                 # fc2.bias
        uinit(keys[9], (NB_HIDDEN, 20)),       # fc3.weight
        uinit(keys[10], (NB_HIDDEN,)),         # fc3.bias
        uinit(keys[11], (2, NB_HIDDEN)),       # fc4.weight
        uinit(keys[12], (2,)),                 # fc4.bias
    )

    prepped = prepare_params(params)           # one-time weight prep, outside jit
    fwd = jax.jit(net_aux1_forward)
    x1, x2, xo = jax.block_until_ready(fwd(x, prepped))

    assert x1.shape == (B, 10) and x2.shape == (B, 10) and xo.shape == (B, 2)
    r1, r2, ro = reference_forward_np(x, params)
    np.testing.assert_allclose(np.asarray(x1, np.float64), r1, rtol=1e-3, atol=1e-3)
    np.testing.assert_allclose(np.asarray(x2, np.float64), r2, rtol=1e-3, atol=1e-3)
    np.testing.assert_allclose(np.asarray(xo, np.float64), ro, rtol=1e-3, atol=1e-3)

    print("KERNEL_OK")
</pallas_src>

<mosaic_0001>
module attributes {stable_mosaic.version = 11 : i64} {
  func.func @_fused_kernel(%arg0: i32, %arg1: memref<576x36xf32, #tpu.memory_space<vmem>>, %arg2: memref<36x128xf32, #tpu.memory_space<vmem>>, %arg3: memref<1x128xf32, #tpu.memory_space<vmem>>, %arg4: memref<288x64xf32, #tpu.memory_space<vmem>>, %arg5: memref<1x64xf32, #tpu.memory_space<vmem>>, %arg6: memref<256x128xf32, #tpu.memory_space<vmem>>, %arg7: memref<1x128xf32, #tpu.memory_space<vmem>>, %arg8: memref<104x128xf32, #tpu.memory_space<vmem>>, %arg9: memref<1x128xf32, #tpu.memory_space<vmem>>, %arg10: memref<16x128xf32, #tpu.memory_space<vmem>>, %arg11: memref<16x128xf32, #tpu.memory_space<vmem>>, %arg12: memref<1x128xf32, #tpu.memory_space<vmem>>, %arg13: memref<104x128xf32, #tpu.memory_space<vmem>>, %arg14: memref<1x128xf32, #tpu.memory_space<vmem>>, %arg15: memref<8x128xf32, #tpu.memory_space<vmem>>, %arg16: memref<8x128xf32, #tpu.memory_space<vmem>>, %arg17: memref<8x128xf32, #tpu.memory_space<vmem>>) attributes {dimension_semantics = [#tpu.dimension_semantics<parallel>], iteration_bounds = array<i64: 1>, scalar_prefetch = 0 : i64, scratch_operands = 0 : i64, tpu.core_type = #tpu.core_type<tc>, window_params = [{transform_indices = @transform_0, window_bounds = array<i64: 576, 36>}, {pipeline_mode = #tpu.pipeline_mode<synchronous>, transform_indices = @transform_1, window_bounds = array<i64: 36, 128>}, {pipeline_mode = #tpu.pipeline_mode<synchronous>, transform_indices = @transform_2, window_bounds = array<i64: 1, 128>}, {pipeline_mode = #tpu.pipeline_mode<synchronous>, transform_indices = @transform_3, window_bounds = array<i64: 288, 64>}, {pipeline_mode = #tpu.pipeline_mode<synchronous>, transform_indices = @transform_4, window_bounds = array<i64: 1, 64>}, {pipeline_mode = #tpu.pipeline_mode<synchronous>, transform_indices = @transform_5, window_bounds = array<i64: 256, 128>}, {pipeline_mode = #tpu.pipeline_mode<synchronous>, transform_indices = @transform_6, window_bounds = array<i64: 1, 128>}, {pipeline_mode = #tpu.pipeline_mode<synchronous>, transform_indices = @transform_7, window_bounds = array<i64: 104, 128>}, {pipeline_mode = #tpu.pipeline_mode<synchronous>, transform_indices = @transform_8, window_bounds = array<i64: 1, 128>}, {pipeline_mode = #tpu.pipeline_mode<synchronous>, transform_indices = @transform_9, window_bounds = array<i64: 16, 128>}, {pipeline_mode = #tpu.pipeline_mode<synchronous>, transform_indices = @transform_10, window_bounds = array<i64: 16, 128>}, {pipeline_mode = #tpu.pipeline_mode<synchronous>, transform_indices = @transform_11, window_bounds = array<i64: 1, 128>}, {pipeline_mode = #tpu.pipeline_mode<synchronous>, transform_indices = @transform_12, window_bounds = array<i64: 104, 128>}, {pipeline_mode = #tpu.pipeline_mode<synchronous>, transform_indices = @transform_13, window_bounds = array<i64: 1, 128>}, {transform_indices = @transform_14, window_bounds = array<i64: 8, 128>}, {transform_indices = @transform_15, window_bounds = array<i64: 8, 128>}, {transform_indices = @transform_16, window_bounds = array<i64: 8, 128>}]} {
    %c0 = arith.constant 0 : index
    %c0_0 = arith.constant 0 : index
    %0 = vector.load %arg1[%c0, %c0_0] : memref<576x36xf32, #tpu.memory_space<vmem>>, vector<576x36xf32>
    %c0_1 = arith.constant 0 : index
    %c0_2 = arith.constant 0 : index
    %1 = vector.load %arg2[%c0_1, %c0_2] : memref<36x128xf32, #tpu.memory_space<vmem>>, vector<36x128xf32>
    %cst = arith.constant dense<0.000000e+00> : vector<576x128xf32>
    %2 = tpu.matmul %0, %1, %cst {dimension_numbers = #tpu.dot_dimension_numbers<[1], [0], [0], [1], [0, 0, 1, 1], [], []>} : vector<576x36xf32>, vector<36x128xf32>, vector<576x128xf32> -> vector<576x128xf32>
    %c0_3 = arith.constant 0 : index
    %c0_4 = arith.constant 0 : index
    %3 = vector.load %arg3[%c0_3, %c0_4] : memref<1x128xf32, #tpu.memory_space<vmem>>, vector<1x128xf32>
    %4 = vector.broadcast %3 : vector<1x128xf32> to vector<576x128xf32>
    %5 = arith.addf %2, %4 : vector<576x128xf32>
    %6 = vector.extract_strided_slice %5 {offsets = [0, 0], sizes = [576, 32], strides = [1, 1]} : vector<576x128xf32> to vector<576x32xf32>
    %7 = vector.extract_strided_slice %5 {offsets = [0, 32], sizes = [576, 32], strides = [1, 1]} : vector<576x128xf32> to vector<576x32xf32>
    %8 = arith.maximumf %6, %7 : vector<576x32xf32>
    %9 = vector.extract_strided_slice %5 {offsets = [0, 64], sizes = [576, 32], strides = [1, 1]} : vector<576x128xf32> to vector<576x32xf32>
    %10 = vector.extract_strided_slice %5 {offsets = [0, 96], sizes = [576, 32], strides = [1, 1]} : vector<576x128xf32> to vector<576x32xf32>
    %11 = arith.maximumf %9, %10 : vector<576x32xf32>
    %12 = arith.maximumf %8, %11 : vector<576x32xf32>
    %cst_5 = arith.constant 0.000000e+00 : f32
    %13 = vector.broadcast %cst_5 : f32 to vector<576x32xf32>
    %14 = arith.maximumf %12, %13 : vector<576x32xf32>
    %15 = vector.extract_strided_slice %14 {offsets = [0, 0], sizes = [64, 32], strides = [1, 1]} : vector<576x32xf32> to vector<64x32xf32>
    %16 = vector.extract_strided_slice %14 {offsets = [96, 0], sizes = [64, 32], strides = [1, 1]} : vector<576x32xf32> to vector<64x32xf32>
    %17 = vector.extract_strided_slice %14 {offsets = [192, 0], sizes = [64, 32], strides = [1, 1]} : vector<576x32xf32> to vector<64x32xf32>
    %18 = vector.extract_strided_slice %14 {offsets = [288, 0], sizes = [64, 32], strides = [1, 1]} : vector<576x32xf32> to vector<64x32xf32>
    %19 = tpu.concatenate %15, %16, %17, %18 in 0 : vector<64x32xf32>, vector<64x32xf32>, vector<64x32xf32>, vector<64x32xf32> -> vector<256x32xf32>
    %20 = vector.extract_strided_slice %14 {offsets = [16, 0], sizes = [64, 32], strides = [1, 1]} : vector<576x32xf32> to vector<64x32xf32>
    %21 = vector.extract_strided_slice %14 {offsets = [112, 0], sizes = [64, 32], strides = [1, 1]} : vector<576x32xf32> to vector<64x32xf32>
    %22 = vector.extract_strided_slice %14 {offsets = [208, 0], sizes = [64, 32], strides = [1, 1]} : vector<576x32xf32> to vector<64x32xf32>
    %23 = vector.extract_strided_slice %14 {offsets = [304, 0], sizes = [64, 32], strides = [1, 1]} : vector<576x32xf32> to vector<64x32xf32>
    %24 = tpu.concatenate %20, %21, %22, %23 in 0 : vector<64x32xf32>, vector<64x32xf32>, vector<64x32xf32>, vector<64x32xf32> -> vector<256x32xf32>
    %25 = vector.extract_strided_slice %14 {offsets = [32, 0], sizes = [64, 32], strides = [1, 1]} : vector<576x32xf32> to vector<64x32xf32>
    %26 = vector.extract_strided_slice %14 {offsets = [128, 0], sizes = [64, 32], strides = [1, 1]} : vector<576x32xf32> to vector<64x32xf32>
    %27 = vector.extract_strided_slice %14 {offsets = [224, 0], sizes = [64, 32], strides = [1, 1]} : vector<576x32xf32> to vector<64x32xf32>
    %28 = vector.extract_strided_slice %14 {offsets = [320, 0], sizes = [64, 32], strides = [1, 1]} : vector<576x32xf32> to vector<64x32xf32>
    %29 = tpu.concatenate %25, %26, %27, %28 in 0 : vector<64x32xf32>, vector<64x32xf32>, vector<64x32xf32>, vector<64x32xf32> -> vector<256x32xf32>
    %30 = vector.extract_strided_slice %14 {offsets = [96, 0], sizes = [64, 32], strides = [1, 1]} : vector<576x32xf32> to vector<64x32xf32>
    %31 = vector.extract_strided_slice %14 {offsets = [192, 0], sizes = [64, 32], strides = [1, 1]} : vector<576x32xf32> to vector<64x32xf32>
    %32 = vector.extract_strided_slice %14 {offsets = [288, 0], sizes = [64, 32], strides = [1, 1]} : vector<576x32xf32> to vector<64x32xf32>
    %33 = vector.extract_strided_slice %14 {offsets = [384, 0], sizes = [64, 32], strides = [1, 1]} : vector<576x32xf32> to vector<64x32xf32>
    %34 = tpu.concatenate %30, %31, %32, %33 in 0 : vector<64x32xf32>, vector<64x32xf32>, vector<64x32xf32>, vector<64x32xf32> -> vector<256x32xf32>
    %35 = vector.extract_strided_slice %14 {offsets = [112, 0], sizes = [64, 32], strides = [1, 1]} : vector<576x32xf32> to vector<64x32xf32>
    %36 = vector.extract_strided_slice %14 {offsets = [208, 0], sizes = [64, 32], strides = [1, 1]} : vector<576x32xf32> to vector<64x32xf32>
    %37 = vector.extract_strided_slice %14 {offsets = [304, 0], sizes = [64, 32], strides = [1, 1]} : vector<576x32xf32> to vector<64x32xf32>
    %38 = vector.extract_strided_slice %14 {offsets = [400, 0], sizes = [64, 32], strides = [1, 1]} : vector<576x32xf32> to vector<64x32xf32>
    %39 = tpu.concatenate %35, %36, %37, %38 in 0 : vector<64x32xf32>, vector<64x32xf32>, vector<64x32xf32>, vector<64x32xf32> -> vector<256x32xf32>
    %40 = vector.extract_strided_slice %14 {offsets = [128, 0], sizes = [64, 32], strides = [1, 1]} : vector<576x32xf32> to vector<64x32xf32>
    %41 = vector.extract_strided_slice %14 {offsets = [224, 0], sizes = [64, 32], strides = [1, 1]} : vector<576x32xf32> to vector<64x32xf32>
    %42 = vector.extract_strided_slice %14 {offsets = [320, 0], sizes = [64, 32], strides = [1, 1]} : vector<576x32xf32> to vector<64x32xf32>
    %43 = vector.extract_strided_slice %14 {offsets = [416, 0], sizes = [64, 32], strides = [1, 1]} : vector<576x32xf32> to vector<64x32xf32>
    %44 = tpu.concatenate %40, %41, %42, %43 in 0 : vector<64x32xf32>, vector<64x32xf32>, vector<64x32xf32>, vector<64x32xf32> -> vector<256x32xf32>
    %45 = vector.extract_strided_slice %14 {offsets = [192, 0], sizes = [64, 32], strides = [1, 1]} : vector<576x32xf32> to vector<64x32xf32>
    %46 = vector.extract_strided_slice %14 {offsets = [288, 0], sizes = [64, 32], strides = [1, 1]} : vector<576x32xf32> to vector<64x32xf32>
    %47 = vector.extract_strided_slice %14 {offsets = [384, 0], sizes = [64, 32], strides = [1, 1]} : vector<576x32xf32> to vector<64x32xf32>
    %48 = vector.extract_strided_slice %14 {offsets = [480, 0], sizes = [64, 32], strides = [1, 1]} : vector<576x32xf32> to vector<64x32xf32>
    %49 = tpu.concatenate %45, %46, %47, %48 in 0 : vector<64x32xf32>, vector<64x32xf32>, vector<64x32xf32>, vector<64x32xf32> -> vector<256x32xf32>
    %50 = vector.extract_strided_slice %14 {offsets = [208, 0], sizes = [64, 32], strides = [1, 1]} : vector<576x32xf32> to vector<64x32xf32>
    %51 = vector.extract_strided_slice %14 {offsets = [304, 0], sizes = [64, 32], strides = [1, 1]} : vector<576x32xf32> to vector<64x32xf32>
    %52 = vector.extract_strided_slice %14 {offsets = [400, 0], sizes = [64, 32], strides = [1, 1]} : vector<576x32xf32> to vector<64x32xf32>
    %53 = vector.extract_strided_slice %14 {offsets = [496, 0], sizes = [64, 32], strides = [1, 1]} : vector<576x32xf32> to vector<64x32xf32>
    %54 = tpu.concatenate %50, %51, %52, %53 in 0 : vector<64x32xf32>, vector<64x32xf32>, vector<64x32xf32>, vector<64x32xf32> -> vector<256x32xf32>
    %55 = vector.extract_strided_slice %14 {offsets = [224, 0], sizes = [64, 32], strides = [1, 1]} : vector<576x32xf32> to vector<64x32xf32>
    %56 = vector.extract_strided_slice %14 {offsets = [320, 0], sizes = [64, 32], strides = [1, 1]} : vector<576x32xf32> to vector<64x32xf32>
    %57 = vector.extract_strided_slice %14 {offsets = [416, 0], sizes = [64, 32], strides = [1, 1]} : vector<576x32xf32> to vector<64x32xf32>
    %58 = vector.extract_strided_slice %14 {offsets = [512, 0], sizes = [64, 32], strides = [1, 1]} : vector<576x32xf32> to vector<64x32xf32>
    %59 = tpu.concatenate %55, %56, %57, %58 in 0 : vector<64x32xf32>, vector<64x32xf32>, vector<64x32xf32>, vector<64x32xf32> -> vector<256x32xf32>
    %60 = tpu.concatenate %19, %24, %29, %34, %39, %44, %49, %54, %59 in 1 : vector<256x32xf32>, vector<256x32xf32>, vector<256x32xf32>, vector<256x32xf32>, vector<256x32xf32>, vector<256x32xf32>, vector<256x32xf32>, vector<256x32xf32>, vector<256x32xf32> -> vector<256x288xf32>
    %c0_6 = arith.constant 0 : index
    %c0_7 = arith.constant 0 : index
    %61 = vector.load %arg4[%c0_6, %c0_7] : memref<288x64xf32, #tpu.memory_space<vmem>>, vector<288x64xf32>
    %cst_8 = arith.constant dense<0.000000e+00> : vector<256x64xf32>
    %62 = tpu.matmul %60, %61, %cst_8 {dimension_numbers = #tpu.dot_dimension_numbers<[1], [0], [0], [1], [0, 0, 1, 1], [], []>} : vector<256x288xf32>, vector<288x64xf32>, vector<256x64xf32> -> vector<256x64xf32>
    %c0_9 = arith.constant 0 : index
    %c0_10 = arith.constant 0 : index
    %63 = vector.load %arg5[%c0_9, %c0_10] : memref<1x64xf32, #tpu.memory_space<vmem>>, vector<1x64xf32>
    %64 = vector.broadcast %63 : vector<1x64xf32> to vector<256x64xf32>
    %65 = arith.addf %62, %64 : vector<256x64xf32>
    %66 = vector.extract_strided_slice %65 {offsets = [0, 0], sizes = [16, 64], strides = [1, 1]} : vector<256x64xf32> to vector<16x64xf32>
    %67 = vector.extract_strided_slice %65 {offsets = [16, 0], sizes = [16, 64], strides = [1, 1]} : vector<256x64xf32> to vector<16x64xf32>
    %68 = arith.maximumf %66, %67 : vector<16x64xf32>
    %69 = vector.extract_strided_slice %65 {offsets = [64, 0], sizes = [16, 64], strides = [1, 1]} : vector<256x64xf32> to vector<16x64xf32>
    %70 = vector.extract_strided_slice %65 {offsets = [80, 0], sizes = [16, 64], strides = [1, 1]} : vector<256x64xf32> to vector<16x64xf32>
    %71 = arith.maximumf %69, %70 : vector<16x64xf32>
    %72 = arith.maximumf %68, %71 : vector<16x64xf32>
    %73 = vector.extract_strided_slice %65 {offsets = [32, 0], sizes = [16, 64], strides = [1, 1]} : vector<256x64xf32> to vector<16x64xf32>
    %74 = vector.extract_strided_slice %65 {offsets = [48, 0], sizes = [16, 64], strides = [1, 1]} : vector<256x64xf32> to vector<16x64xf32>
    %75 = arith.maximumf %73, %74 : vector<16x64xf32>
    %76 = vector.extract_strided_slice %65 {offsets = [96, 0], sizes = [16, 64], strides = [1, 1]} : vector<256x64xf32> to vector<16x64xf32>
    %77 = vector.extract_strided_slice %65 {offsets = [112, 0], sizes = [16, 64], strides = [1, 1]} : vector<256x64xf32> to vector<16x64xf32>
    %78 = arith.maximumf %76, %77 : vector<16x64xf32>
    %79 = arith.maximumf %75, %78 : vector<16x64xf32>
    %80 = vector.extract_strided_slice %65 {offsets = [128, 0], sizes = [16, 64], strides = [1, 1]} : vector<256x64xf32> to vector<16x64xf32>
    %81 = vector.extract_strided_slice %65 {offsets = [144, 0], sizes = [16, 64], strides = [1, 1]} : vector<256x64xf32> to vector<16x64xf32>
    %82 = arith.maximumf %80, %81 : vector<16x64xf32>
    %83 = vector.extract_strided_slice %65 {offsets = [192, 0], sizes = [16, 64], strides = [1, 1]} : vector<256x64xf32> to vector<16x64xf32>
    %84 = vector.extract_strided_slice %65 {offsets = [208, 0], sizes = [16, 64], strides = [1, 1]} : vector<256x64xf32> to vector<16x64xf32>
    %85 = arith.maximumf %83, %84 : vector<16x64xf32>
    %86 = arith.maximumf %82, %85 : vector<16x64xf32>
    %87 = vector.extract_strided_slice %65 {offsets = [160, 0], sizes = [16, 64], strides = [1, 1]} : vector<256x64xf32> to vector<16x64xf32>
    %88 = vector.extract_strided_slice %65 {offsets = [176, 0], sizes = [16, 64], strides = [1, 1]} : vector<256x64xf32> to vector<16x64xf32>
    %89 = arith.maximumf %87, %88 : vector<16x64xf32>
    %90 = vector.extract_strided_slice %65 {offsets = [224, 0], sizes = [16, 64], strides = [1, 1]} : vector<256x64xf32> to vector<16x64xf32>
    %91 = vector.extract_strided_slice %65 {offsets = [240, 0], sizes = [16, 64], strides = [1, 1]} : vector<256x64xf32> to vector<16x64xf32>
    %92 = arith.maximumf %90, %91 : vector<16x64xf32>
    %93 = arith.maximumf %89, %92 : vector<16x64xf32>
    %94 = tpu.concatenate %72, %79, %86, %93 in 1 : vector<16x64xf32>, vector<16x64xf32>, vector<16x64xf32>, vector<16x64xf32> -> vector<16x256xf32>
    %cst_11 = arith.constant 0.000000e+00 : f32
    %95 = vector.broadcast %cst_11 : f32 to vector<16x256xf32>
    %96 = arith.maximumf %94, %95 : vector<16x256xf32>
    %c0_12 = arith.constant 0 : index
    %c0_13 = arith.constant 0 : index
    %97 = vector.load %arg6[%c0_12, %c0_13] : memref<256x128xf32, #tpu.memory_space<vmem>>, vector<256x128xf32>
    %cst_14 = arith.constant dense<0.000000e+00> : vector<16x128xf32>
    %98 = tpu.matmul %96, %97, %cst_14 {dimension_numbers = #tpu.dot_dimension_numbers<[1], [0], [0], [1], [0, 0, 1, 1], [], []>} : vector<16x256xf32>, vector<256x128xf32>, vector<16x128xf32> -> vector<16x128xf32>
    %c0_15 = arith.constant 0 : index
    %c0_16 = arith.constant 0 : index
    %99 = vector.load %arg7[%c0_15, %c0_16] : memref<1x128xf32, #tpu.memory_space<vmem>>, vector<1x128xf32>
    %100 = vector.broadcast %99 : vector<1x128xf32> to vector<16x128xf32>
    %101 = arith.addf %98, %100 : vector<16x128xf32>
    %cst_17 = arith.constant 0.000000e+00 : f32
    %102 = vector.broadcast %cst_17 : f32 to vector<16x128xf32>
    %103 = arith.maximumf %101, %102 : vector<16x128xf32>
    %104 = vector.extract_strided_slice %103 {offsets = [0, 0], sizes = [16, 104], strides = [1, 1]} : vector<16x128xf32> to vector<16x104xf32>
    %c0_18 = arith.constant 0 : index
    %c0_19 = arith.constant 0 : index
    %105 = vector.load %arg8[%c0_18, %c0_19] : memref<104x128xf32, #tpu.memory_space<vmem>>, vector<104x128xf32>
    %cst_20 = arith.constant dense<0.000000e+00> : vector<16x128xf32>
    %106 = tpu.matmul %104, %105, %cst_20 {dimension_numbers = #tpu.dot_dimension_numbers<[1], [0], [0], [1], [0, 0, 1, 1], [], []>} : vector<16x104xf32>, vector<104x128xf32>, vector<16x128xf32> -> vector<16x128xf32>
    %c0_21 = arith.constant 0 : index
    %c0_22 = arith.constant 0 : index
    %107 = vector.load %arg9[%c0_21, %c0_22] : memref<1x128xf32, #tpu.memory_space<vmem>>, vector<1x128xf32>
    %108 = vector.broadcast %107 : vector<1x128xf32> to vector<16x128xf32>
    %109 = arith.addf %106, %108 : vector<16x128xf32>
    %110 = vector.extract_strided_slice %109 {offsets = [0, 0], sizes = [8, 128], strides = [1, 1]} : vector<16x128xf32> to vector<8x128xf32>
    %111 = vector.extract_strided_slice %109 {offsets = [8, 0], sizes = [8, 128], strides = [1, 1]} : vector<16x128xf32> to vector<8x128xf32>
    %c0_23 = arith.constant 0 : index
    %c0_24 = arith.constant 0 : index
    %112 = vector.load %arg15[%c0_23, %c0_24] : memref<8x128xf32, #tpu.memory_space<vmem>>, vector<8x128xf32>
    tpu.vector_store %arg15[%c0_23, %c0_24], %110 {strides = array<i32>} : memref<8x128xf32, #tpu.memory_space<vmem>>, vector<8x128xf32>,
    %c0_25 = arith.constant 0 : index
    %c0_26 = arith.constant 0 : index
    %113 = vector.load %arg16[%c0_25, %c0_26] : memref<8x128xf32, #tpu.memory_space<vmem>>, vector<8x128xf32>
    tpu.vector_store %arg16[%c0_25, %c0_26], %111 {strides = array<i32>} : memref<8x128xf32, #tpu.memory_space<vmem>>, vector<8x128xf32>,
    %114 = vector.extract_strided_slice %110 {offsets = [0, 0], sizes = [8, 16], strides = [1, 1]} : vector<8x128xf32> to vector<8x16xf32>
    %c0_27 = arith.constant 0 : index
    %c0_28 = arith.constant 0 : index
    %115 = vector.load %arg10[%c0_27, %c0_28] : memref<16x128xf32, #tpu.memory_space<vmem>>, vector<16x128xf32>
    %cst_29 = arith.constant dense<0.000000e+00> : vector<8x128xf32>
    %116 = tpu.matmul %114, %115, %cst_29 {dimension_numbers = #tpu.dot_dimension_numbers<[1], [0], [0], [1], [0, 0, 1, 1], [], []>} : vector<8x16xf32>, vector<16x128xf32>, vector<8x128xf32> -> vector<8x128xf32>
    %117 = vector.extract_strided_slice %111 {offsets = [0, 0], sizes = [8, 16], strides = [1, 1]} : vector<8x128xf32> to vector<8x16xf32>
    %c0_30 = arith.constant 0 : index
    %c0_31 = arith.constant 0 : index
    %118 = vector.load %arg11[%c0_30, %c0_31] : memref<16x128xf32, #tpu.memory_space<vmem>>, vector<16x128xf32>
    %cst_32 = arith.constant dense<0.000000e+00> : vector<8x128xf32>
    %119 = tpu.matmul %117, %118, %cst_32 {dimension_numbers = #tpu.dot_dimension_numbers<[1], [0], [0], [1], [0, 0, 1, 1], [], []>} : vector<8x16xf32>, vector<16x128xf32>, vector<8x128xf32> -> vector<8x128xf32>
    %120 = arith.addf %116, %119 : vector<8x128xf32>
    %c0_33 = arith.constant 0 : index
    %c0_34 = arith.constant 0 : index
    %121 = vector.load %arg12[%c0_33, %c0_34] : memref<1x128xf32, #tpu.memory_space<vmem>>, vector<1x128xf32>
    %122 = vector.broadcast %121 : vector<1x128xf32> to vector<8x128xf32>
    %123 = arith.addf %120, %122 : vector<8x128xf32>
    %cst_35 = arith.constant 0.000000e+00 : f32
    %124 = vector.broadcast %cst_35 : f32 to vector<8x128xf32>
    %125 = arith.maximumf %123, %124 : vector<8x128xf32>
    %126 = vector.extract_strided_slice %125 {offsets = [0, 0], sizes = [8, 104], strides = [1, 1]} : vector<8x128xf32> to vector<8x104xf32>
    %c0_36 = arith.constant 0 : index
    %c0_37 = arith.constant 0 : index
    %127 = vector.load %arg13[%c0_36, %c0_37] : memref<104x128xf32, #tpu.memory_space<vmem>>, vector<104x128xf32>
    %cst_38 = arith.constant dense<0.000000e+00> : vector<8x128xf32>
    %128 = tpu.matmul %126, %127, %cst_38 {dimension_numbers = #tpu.dot_dimension_numbers<[1], [0], [0], [1], [0, 0, 1, 1], [], []>} : vector<8x104xf32>, vector<104x128xf32>, vector<8x128xf32> -> vector<8x128xf32>
    %c0_39 = arith.constant 0 : index
    %c0_40 = arith.constant 0 : index
    %129 = vector.load %arg14[%c0_39, %c0_40] : memref<1x128xf32, #tpu.memory_space<vmem>>, vector<1x128xf32>
    %130 = vector.broadcast %129 : vector<1x128xf32> to vector<8x128xf32>
    %131 = arith.addf %128, %130 : vector<8x128xf32>
    %c0_41 = arith.constant 0 : index
    %c0_42 = arith.constant 0 : index
    %132 = vector.load %arg17[%c0_41, %c0_42] : memref<8x128xf32, #tpu.memory_space<vmem>>, vector<8x128xf32>
    tpu.vector_store %arg17[%c0_41, %c0_42], %131 {strides = array<i32>} : memref<8x128xf32, #tpu.memory_space<vmem>>, vector<8x128xf32>,
    return
  }
  func.func @transform_0(%arg0: i32) -> (i32, i32) {
    %c0_i32 = arith.constant 0 : i32
    %c0_i32_0 = arith.constant 0 : i32
    return %arg0, %c0_i32 : i32, i32
  }
  func.func @transform_1(%arg0: i32) -> (i32, i32) {
    %c0_i32 = arith.constant 0 : i32
    %c0_i32_0 = arith.constant 0 : i32
    %c0_i32_1 = arith.constant 0 : i32
    return %c0_i32, %c0_i32_0 : i32, i32
  }
  func.func @transform_2(%arg0: i32) -> (i32, i32) {
    %c0_i32 = arith.constant 0 : i32
    %c0_i32_0 = arith.constant 0 : i32
    %c0_i32_1 = arith.constant 0 : i32
    return %c0_i32, %c0_i32_0 : i32, i32
  }
  func.func @transform_3(%arg0: i32) -> (i32, i32) {
    %c0_i32 = arith.constant 0 : i32
    %c0_i32_0 = arith.constant 0 : i32
    %c0_i32_1 = arith.constant 0 : i32
    return %c0_i32, %c0_i32_0 : i32, i32
  }
  func.func @transform_4(%arg0: i32) -> (i32, i32) {
    %c0_i32 = arith.constant 0 : i32
    %c0_i32_0 = arith.constant 0 : i32
    %c0_i32_1 = arith.constant 0 : i32
    return %c0_i32, %c0_i32_0 : i32, i32
  }
  func.func @transform_5(%arg0: i32) -> (i32, i32) {
    %c0_i32 = arith.constant 0 : i32
    %c0_i32_0 = arith.constant 0 : i32
    %c0_i32_1 = arith.constant 0 : i32
    return %c0_i32, %c0_i32_0 : i32, i32
  }
  func.func @transform_6(%arg0: i32) -> (i32, i32) {
    %c0_i32 = arith.constant 0 : i32
    %c0_i32_0 = arith.constant 0 : i32
    %c0_i32_1 = arith.constant 0 : i32
    return %c0_i32, %c0_i32_0 : i32, i32
  }
  func.func @transform_7(%arg0: i32) -> (i32, i32) {
    %c0_i32 = arith.constant 0 : i32
    %c0_i32_0 = arith.constant 0 : i32
    %c0_i32_1 = arith.constant 0 : i32
    return %c0_i32, %c0_i32_0 : i32, i32
  }
  func.func @transform_8(%arg0: i32) -> (i32, i32) {
    %c0_i32 = arith.constant 0 : i32
    %c0_i32_0 = arith.constant 0 : i32
    %c0_i32_1 = arith.constant 0 : i32
    return %c0_i32, %c0_i32_0 : i32, i32
  }
  func.func @transform_9(%arg0: i32) -> (i32, i32) {
    %c0_i32 = arith.constant 0 : i32
    %c0_i32_0 = arith.constant 0 : i32
    %c0_i32_1 = arith.constant 0 : i32
    return %c0_i32, %c0_i32_0 : i32, i32
  }
  func.func @transform_10(%arg0: i32) -> (i32, i32) {
    %c0_i32 = arith.constant 0 : i32
    %c0_i32_0 = arith.constant 0 : i32
    %c0_i32_1 = arith.constant 0 : i32
    return %c0_i32, %c0_i32_0 : i32, i32
  }
  func.func @transform_11(%arg0: i32) -> (i32, i32) {
    %c0_i32 = arith.constant 0 : i32
    %c0_i32_0 = arith.constant 0 : i32
    %c0_i32_1 = arith.constant 0 : i32
    return %c0_i32, %c0_i32_0 : i32, i32
  }
  func.func @transform_12(%arg0: i32) -> (i32, i32) {
    %c0_i32 = arith.constant 0 : i32
    %c0_i32_0 = arith.constant 0 : i32
    %c0_i32_1 = arith.constant 0 : i32
    return %c0_i32, %c0_i32_0 : i32, i32
  }
  func.func @transform_13(%arg0: i32) -> (i32, i32) {
    %c0_i32 = arith.constant 0 : i32
    %c0_i32_0 = arith.constant 0 : i32
    %c0_i32_1 = arith.constant 0 : i32
    return %c0_i32, %c0_i32_0 : i32, i32
  }
  func.func @transform_14(%arg0: i32) -> (i32, i32) {
    %c0_i32 = arith.constant 0 : i32
    %c0_i32_0 = arith.constant 0 : i32
    return %arg0, %c0_i32 : i32, i32
  }
  func.func @transform_15(%arg0: i32) -> (i32, i32) {
    %c0_i32 = arith.constant 0 : i32
    %c0_i32_0 = arith.constant 0 : i32
    return %arg0, %c0_i32 : i32, i32
  }
  func.func @transform_16(%arg0: i32) -> (i32, i32) {
    %c0_i32 = arith.constant 0 : i32
    %c0_i32_0 = arith.constant 0 : i32
    return %arg0, %c0_i32 : i32, i32
  }
}

</mosaic_0001>

<bundles_post_ra>
// kernel: net_aux1_forward.1
= control target key start
LH: loop header
LB: loop body
LE: loop exit
PB: predicated region body
PF: predicated region fallthrough
CT: control target
= control target key end

     0   :  { %vm348_vm0 = vcmask 1043456   ;;  %vm131_vm1 = vcmask 293888   ;;  %s3503_s28 = smov 96   ;;  %s3504_s20 = smov 64   ;;  %vm1889_vm2 = vcmask 261120   ;;  %vm1922_vm3 = vcmask 523264   ;;  %s6402_s1 = inlined_call_operand.vmem [shape: f32[36,128], index: 1, kind: input, shape index: {}]   ;;  %s6403_s2 = inlined_call_operand.vmem [shape: f32[1,128], index: 2, kind: input, shape index: {}]   ;;  %s6404_s0 = inlined_call_operand.vmem [shape: f32[576,36], index: 0, kind: input, shape index: {}]   ;;  %s6405_s3 = inlined_call_operand.vmem [shape: f32[288,64], index: 3, kind: input, shape index: {}]   ;;  %s6406_s4 = inlined_call_operand.vmem [shape: f32[1,64], index: 4, kind: input, shape index: {}]   ;;  %s6407_s5 = inlined_call_operand.vmem [shape: f32[256,128], index: 5, kind: input, shape index: {}]   ;;  %s6408_s6 = inlined_call_operand.vmem [shape: f32[1,128], index: 6, kind: input, shape index: {}]   ;;  %s6409_s7 = inlined_call_operand.vmem [shape: f32[104,128], index: 7, kind: input, shape index: {}]   ;;  %s6410_s8 = inlined_call_operand.vmem [shape: f32[1,128], index: 8, kind: input, shape index: {}]   ;;  %s6411_s10 = inlined_call_operand.vmem [shape: f32[16,128], index: 10, kind: input, shape index: {}]   ;;  %s6412_s9 = inlined_call_operand.vmem [shape: f32[16,128], index: 9, kind: input, shape index: {}]   ;;  %s6413_s12 = inlined_call_operand.vmem [shape: f32[104,128], index: 12, kind: input, shape index: {}]   ;;  %s6414_s14 = inlined_call_operand.vmem [shape: f32[8,128], index: 14, kind: output, shape index: {0}]   ;;  %s6415_s15 = inlined_call_operand.vmem [shape: f32[8,128], index: 15, kind: output, shape index: {1}]   ;;  %s6416_s11 = inlined_call_operand.vmem [shape: f32[1,128], index: 11, kind: input, shape index: {}]   ;;  %s6417_s13 = inlined_call_operand.vmem [shape: f32[1,128], index: 13, kind: input, shape index: {}]   ;;  %s6418_s16 = inlined_call_operand.vmem [shape: f32[8,128], index: 16, kind: output, shape index: {2}]  }
   0x1   :  { %6535 = sst [smem:[#allocation43_spill]] %s6402_s1  ;;  %v50_v5 = vld [vmem:[%s6404_s0] sm:$0xff]  ;;  %v51_v6 = vld [vmem:[%s6404_s0 + $0x8] sm:$0xff]  ;;  %v52_v7 = vld [vmem:[%s6404_s0 + $0x10] sm:$0xff]  ;;  %s3505_s22 = smov 32   ;;  %vm1955_vm4 = vcmask 785408  }
   0x2   :  { %s6536_s23 = sld [smem:[#allocation43_spill]]  ;;  %v53_v8 = vld [vmem:[%s6404_s0 + $0x18] sm:$0xff]  ;;  %v54_v9 = vld [vmem:[%s6404_s0 + $0x20] sm:$0xff]  ;;  %v55_v10 = vld [vmem:[%s6404_s0 + $0x28] sm:$0xff]  ;;  %vm2660_vm5 = vcmask 850944   ;;  %vm2696_vm6 = vcmask 130048  }
   0x3   :  { %v56_v11 = vld [vmem:[%s6404_s0 + $0x30] sm:$0xff]  ;;  %v57_v12 = vld [vmem:[%s6404_s0 + $0x38] sm:$0xff]  ;;  %v58_v13 = vld [vmem:[%s6404_s0 + $0x40] sm:$0xff] }
   0x4   :  { %v59_v14 = vld [vmem:[%s6404_s0 + $0x48] sm:$0xff]  ;;  %v60_v15 = vld [vmem:[%s6404_s0 + $0x50] sm:$0xff]  ;;  %v61_v16 = vld [vmem:[%s6404_s0 + $0x58] sm:$0xff] }
   0x5   :  { %v62_v17 = vld [vmem:[%s6404_s0 + $0x60] sm:$0xff]  ;;  %v63_v18 = vld [vmem:[%s6404_s0 + $0x68] sm:$0xff]  ;;  %v64_v19 = vld [vmem:[%s6404_s0 + $0x70] sm:$0xff] }
   0x6   :  { %v65_v20 = vld [vmem:[%s6404_s0 + $0x78] sm:$0xff]  ;;  %v66_v22 = vld [vmem:[%s6404_s0 + $0x80] sm:$0xff]  ;;  %v67_v24 = vld [vmem:[%s6404_s0 + $0x88] sm:$0xff] }
   0x7   :  { %v68_v26 = vld [vmem:[%s6404_s0 + $0x90] sm:$0xff]  ;;  %v69_v28 = vld [vmem:[%s6404_s0 + $0x98] sm:$0xff]  ;;  %v70_v30 = vld [vmem:[%s6404_s0 + $0xa0] sm:$0xff] }
   0x8   :  { %v126_v0 = vld [vmem:[%s6536_s23 + $0x20] sm:$0xf]  ;;  %v125_v1 = vld [vmem:[%s6536_s23 + $0x18] sm:$0xff]  ;;  %v124_v2 = vld [vmem:[%s6536_s23 + $0x10] sm:$0xff] }
   0x9   :  { %2802 = vmatpush.msk.msra.mxu0 %vm348_vm0, %v126_v0  ;;  %2913 = vmatpush.msk.msra.mxu2 %vm348_vm0, %v126_v0  ;;  %v123_v3 = vld [vmem:[%s6536_s23 + $0x8] sm:$0xff]  ;;  %v122_v4 = vld [vmem:[%s6536_s23] sm:$0xff]  ;;  %v72_v34 = vld [vmem:[%s6404_s0 + $0xb0] sm:$0xff] }
   0xa   :  { %2912 = vmatpush.msk.msra.mxu1 %vm348_vm0, %v126_v0  ;;  %2914 = vmatpush.msk.msra.mxu3 %vm348_vm0, %v126_v0  ;;  %v71_v32 = vld [vmem:[%s6404_s0 + $0xa8] sm:$0xff]  ;;  %v73_v36 = vld [vmem:[%s6404_s0 + $0xb8] sm:$0xff]  ;;  %v74_v38 = vld [vmem:[%s6404_s0 + $0xc0] sm:$0xff] }
   0xb   :  { %364 = vmatpush.msra.mxu0 %v125_v1  ;;  %2916 = vmatpush.msra.mxu2 %v125_v1  ;;  %v75_v40 = vld [vmem:[%s6404_s0 + $0xc8] sm:$0xff]  ;;  %v3723_v41 = vld [vmem:[%s6403_s2] ss:$0 sm:$0xff]  ;;  %v76_v43 = vld [vmem:[%s6404_s0 + $0xd0] sm:$0xff] }
   0xc   :  { %2915 = vmatpush.msra.mxu1 %v125_v1  ;;  %2917 = vmatpush.msra.mxu3 %v125_v1  ;;  %v77_v48 = vld [vmem:[%s6404_s0 + $0xd8] sm:$0xff]  ;;  %v78_v50 = vld [vmem:[%s6404_s0 + $0xe0] sm:$0xff]  ;;  %v79_v55 = vld [vmem:[%s6404_s0 + $0xe8] sm:$0xff] }
   0xd   :  { %365 = vmatpush.msra.mxu0 %v124_v2  ;;  %2919 = vmatpush.msra.mxu2 %v124_v2  ;;  %v80_v60 = vld [vmem:[%s6404_s0 + $0xf0] sm:$0xff]  ;;  %v81_v62 = vld [vmem:[%s6404_s0 + $0xf8] sm:$0xff] }
   0xe   :  { %2918 = vmatpush.msra.mxu1 %v124_v2  ;;  %2920 = vmatpush.msra.mxu3 %v124_v2 }
   0xf   :  { %366 = vmatpush.msra.mxu0 %v123_v3  ;;  %2922 = vmatpush.msra.mxu2 %v123_v3 }
  0x10   :  { %2921 = vmatpush.msra.mxu1 %v123_v3  ;;  %2923 = vmatpush.msra.mxu3 %v123_v3  ;;  %v82_v3 = vld [vmem:[%s6404_s0 + $0x100] sm:$0xff] }
  0x11   :  { %367 = vmatpush.msra.mxu0 %v122_v4  ;;  %2925 = vmatpush.msra.mxu2 %v122_v4 }
  0x12   :  { %2803 = vmatmul.msk.f32.vlgmr.msra.gmra.mxu0 %vm131_vm1, %v50_v5  ;;  %2924 = vmatpush.msra.mxu1 %v122_v4  ;;  %v83_v5 = vld [vmem:[%s6404_s0 + $0x108] sm:$0xff] }
  0x13   :  { %2926 = vmatpush.msra.mxu3 %v122_v4 }
  0x1a   :  { %2804 = vmatmul.msk.f32.gmra.mxu0 %vm131_vm1, %v51_v6 }
  0x22   :  { %2805 = vmatmul.msk.f32.gmra.mxu0 %vm131_vm1, %v52_v7  ;;  %v84_v7 = vld [vmem:[%s6404_s0 + $0x110] sm:$0xff] }
  0x2a   :  { %2806 = vmatmul.msk.f32.gmra.mxu0 %vm131_vm1, %v53_v8 }
  0x32   :  { %2807 = vmatmul.msk.f32.gmra.mxu0 %vm131_vm1, %v54_v9 }
  0x3a   :  { %2808 = vmatmul.msk.f32.gmra.mxu0 %vm131_vm1, %v55_v10 }
  0x42   :  { %2809 = vmatmul.msk.f32.gmra.mxu0 %vm131_vm1, %v56_v11 }
  0x4a   :  { %2810 = vmatmul.msk.f32.gmra.mxu0 %vm131_vm1, %v57_v12  ;;  %v85_v12 = vld [vmem:[%s6404_s0 + $0x118] sm:$0xff] }
  0x52   :  { %2811 = vmatmul.msk.f32.gmra.mxu0 %vm131_vm1, %v58_v13 }
  0x5a   :  { %2812 = vmatmul.msk.f32.gmra.mxu0 %vm131_vm1, %v59_v14 }
  0x62   :  { %2813 = vmatmul.msk.f32.gmra.mxu0 %vm131_vm1, %v60_v15 }
  0x6a   :  { %2814 = vmatmul.msk.f32.gmra.mxu0 %vm131_vm1, %v61_v16 }
  0x72   :  { %2815 = vmatmul.msk.f32.gmra.mxu0 %vm131_vm1, %v62_v17  ;;  %v86_v17 = vld [vmem:[%s6404_s0 + $0x120] sm:$0xff] }
  0x7a   :  { %2816 = vmatmul.msk.f32.gmra.mxu0 %vm131_vm1, %v63_v18 }
  0x82   :  { %2817 = vmatmul.msk.f32.gmra.mxu0 %vm131_vm1, %v64_v19 }
  0x8a   :  { %2818 = vmatmul.msk.f32.gmra.mxu0 %vm131_vm1, %v65_v20 }
  0x8f   :  { %v3670_v21 = vpop.f32.mrf.mxu0 }
  0x92   :  { %2819 = vmatmul.msk.f32.gmra.mxu0 %vm131_vm1, %v66_v22 }
  0x97   :  { %v372_v23 = vpop.f32.mrf.mxu0 }
  0x98   :  { %v3729_v44 = vadd.f32 %v3723_v41, %v372_v23  ;;  %v87_v23 = vld [vmem:[%s6404_s0 + $0x128] sm:$0xff] }
  0x9a   :  { %2820 = vmatmul.msk.f32.gmra.mxu0 %vm131_vm1, %v67_v24  ;;  %v3840_v24 = vadd.f32 %v3723_v41, %v3670_v21 }
  0x9f   :  { %v3680_v25 = vpop.f32.mrf.mxu0 }
  0xa2   :  { %2821 = vmatmul.msk.f32.gmra.mxu0 %vm131_vm1, %v68_v26 }
  0xa7   :  { %v3686_v27 = vpop.f32.mrf.mxu0 }
  0xaa   :  { %2822 = vmatmul.msk.f32.gmra.mxu0 %vm131_vm1, %v69_v28 }
  0xaf   :  { %v381_v29 = vpop.f32.mrf.mxu0 }
  0xb0   :  { %v3748_v51 = vadd.f32 %v3723_v41, %v381_v29 }
  0xb2   :  { %2823 = vmatmul.msk.f32.gmra.mxu0 %vm131_vm1, %v70_v30  ;;  %v88_v30 = vld [vmem:[%s6404_s0 + $0x130] sm:$0xff] }
  0xb7   :  { %v384_v31 = vpop.f32.mrf.mxu0 }
  0xb8   :  { %v3761_v56 = vadd.f32 %v3723_v41, %v384_v31 }
  0xba   :  { %2824 = vmatmul.msk.f32.gmra.mxu0 %vm131_vm1, %v71_v32 }
  0xbf   :  { %v387_v33 = vpop.f32.mrf.mxu0 }
  0xc0   :  { %v3799_v8 = vadd.f32 %v3723_v41, %v387_v33 }
  0xc2   :  { %2825 = vmatmul.msk.f32.gmra.mxu0 %vm131_vm1, %v72_v34  ;;  %v89_v34 = vld [vmem:[%s6404_s0 + $0x138] sm:$0xff] }
  0xc7   :  { %v390_v35 = vpop.f32.mrf.mxu0 }
  0xc8   :  { %v3778_v63 = vadd.f32 %v3723_v41, %v390_v35 }
  0xca   :  { %2826 = vmatmul.msk.f32.gmra.mxu0 %vm131_vm1, %v73_v36 }
  0xcf   :  { %v3708_v37 = vpop.f32.mrf.mxu0 }
  0xd0   :  { %v3826_v18 = vadd.f32 %v3723_v41, %v3708_v37 }
  0xd2   :  { %2827 = vmatmul.msk.f32.gmra.mxu0 %vm131_vm1, %v74_v38 }
  0xd7   :  { %v3714_v39 = vpop.f32.mrf.mxu0 }
  0xd8   :  { %v3854_v31 = vadd.f32 %v3723_v41, %v3714_v39  ;;  %v90_v39 = vld [vmem:[%s6404_s0 + $0x140] sm:$0xff] }
  0xda   :  { %2828 = vmatmul.msk.f32.gmra.mxu0 %vm131_vm1, %v75_v40 }
  0xdf   :  { %v399_v42 = vpop.f32.mrf.mxu0 }
  0xe0   :  { %v3732_v45 = vadd.f32 %v3723_v41, %v399_v42 }
  0xe2   :  { %2829 = vmatmul.msk.f32.gmra.mxu0 %vm131_vm1, %v76_v43  ;;  %v2930_v46 = vpack.i.bf16 %v3732_v45, %v3729_v44 }
  0xe4   :  { %2931 = vrot.lane.b32.xlu0 %v2930_v46, %s3503_s28 }
  0xe7   :  { %v3738_v47 = vpop.f32.mrf.mxu0 }
  0xe8   :  { %v3868_v35 = vadd.f32 %v3723_v41, %v3738_v47  ;;  %v91_v47 = vld [vmem:[%s6404_s0 + $0x148] sm:$0xff] }
  0xea   :  { %2830 = vmatmul.msk.f32.gmra.mxu0 %vm131_vm1, %v77_v48 }
  0xef   :  { %v405_v49 = vpop.f32.mrf.mxu0 }
  0xf0   :  { %v3751_v52 = vadd.f32 %v3723_v41, %v405_v49 }
  0xf2   :  { %2831 = vmatmul.msk.f32.gmra.mxu0 %vm131_vm1, %v78_v50  ;;  %v2935_v53 = vpack.i.bf16 %v3751_v52, %v3748_v51 }
  0xf4   :  { %2936 = vrot.lane.b32.xlu1 %v2935_v53, %s3503_s28 }
  0xf7   :  { %v408_v54 = vpop.f32.mrf.mxu0 }
  0xf8   :  { %v3764_v57 = vadd.f32 %v3723_v41, %v408_v54  ;;  %v92_v54 = vld [vmem:[%s6404_s0 + $0x150] sm:$0xff] }
  0xfa   :  { %2832 = vmatmul.msk.f32.gmra.mxu0 %vm131_vm1, %v79_v55  ;;  %v2940_v58 = vpack.i.bf16 %v3764_v57, %v3761_v56  ;;  %v3908_v55 = vadd.f32 %v3723_v41, %v3680_v25  ;;  %v93_v25 = vld [vmem:[%s6404_s0 + $0x158] sm:$0xff] }
  0xfc   :  { %2941 = vrot.lane.b32.xlu2 %v2940_v58, %s3503_s28 }
  0xff   :  { %v411_v59 = vpop.f32.mrf.mxu0 }
 0x100   :  { %v3812_v13 = vadd.f32 %v3723_v41, %v411_v59 }
 0x102   :  { %2833 = vmatmul.msk.f32.gmra.mxu0 %vm131_vm1, %v80_v60 }
 0x107   :  { %v414_v61 = vpop.f32.mrf.mxu0 }
 0x108   :  { %v3781_v0 = vadd.f32 %v3723_v41, %v414_v61 }
 0x10a   :  { %v2945_v1 = vpack.i.bf16 %v3781_v0, %v3778_v63  ;;  %2834 = vmatmul.msk.f32.gmra.mxu0 %vm131_vm1, %v81_v62 }
 0x10c   :  { %2946 = vrot.lane.b32.xlu1 %v2945_v1, %s3503_s28 }
 0x10f   :  { %v417_v2 = vpop.f32.mrf.mxu0 }
 0x110   :  { %v3881_v40 = vadd.f32 %v3723_v41, %v417_v2 }
 0x112   :  { %2835 = vmatmul.msk.f32.gmra.mxu0 %vm131_vm1, %v82_v3  ;;  %v3922_v3 = vadd.f32 %v3723_v41, %v3686_v27 }
 0x117   :  { %v420_v4 = vpop.f32.mrf.mxu0 }
 0x118   :  { %v3894_v48 = vadd.f32 %v3723_v41, %v420_v4 }
 0x11a   :  { %2836 = vmatmul.msk.f32.gmra.mxu0 %vm131_vm1, %v83_v5 }
 0x11f   :  { %v423_v6 = vpop.f32.mrf.mxu0 }
 0x120   :  { %v3802_v9 = vadd.f32 %v3723_v41, %v423_v6 }
 0x122   :  { %v2950_v10 = vpack.i.bf16 %v3799_v8, %v3802_v9  ;;  %2837 = vmatmul.msk.f32.gmra.mxu0 %vm131_vm1, %v84_v7 }
 0x124   :  { %2951 = vrot.lane.b32.xlu0 %v2950_v10, %s3503_s28 }
 0x127   :  { %v426_v11 = vpop.f32.mrf.mxu0 }
 0x128   :  { %v3815_v14 = vadd.f32 %v3723_v41, %v426_v11 }
 0x12a   :  { %v2955_v15 = vpack.i.bf16 %v3815_v14, %v3812_v13  ;;  %2838 = vmatmul.msk.f32.gmra.mxu0 %vm131_vm1, %v85_v12 }
 0x12c   :  { %2956 = vrot.lane.b32.xlu2 %v2955_v15, %s3503_s28  ;;  %v94_v15 = vld [vmem:[%s6404_s0 + $0x160] sm:$0xff] }
 0x12f   :  { %v429_v16 = vpop.f32.mrf.mxu0 }
 0x130   :  { %v3829_v19 = vadd.f32 %v3723_v41, %v429_v16  ;;  %v101_v16 = vld [vmem:[%s6404_s0 + $0x198] sm:$0xff] }
 0x131   :  { %2854 = vmatmul.msk.f32.vlgmr.msra.gmra.mxu2 %vm131_vm1, %v101_v16  ;;  %v95_v16 = vld [vmem:[%s6404_s0 + $0x168] sm:$0xff] }
 0x132   :  { %v2960_v20 = vpack.i.bf16 %v3826_v18, %v3829_v19  ;;  %2839 = vmatmul.msk.f32.gmra.mxu0 %vm131_vm1, %v86_v17 }
 0x134   :  { %2961 = vrot.lane.b32.xlu2 %v2960_v20, %s3503_s28 }
 0x137   :  { %v432_v22 = vpop.f32.mrf.mxu0 }
 0x138   :  { %v3843_v26 = vadd.f32 %v3723_v41, %v432_v22 }
 0x13a   :  { %v2965_v28 = vpack.i.bf16 %v3840_v24, %v3843_v26  ;;  %2840 = vmatmul.msk.f32.gmra.mxu0 %vm131_vm1, %v87_v23 }
 0x13c   :  { %2966 = vrot.lane.b32.xlu1 %v2965_v28, %s3503_s28 }
 0x13f   :  { %v435_v29 = vpop.f32.mrf.mxu0 }
 0x140   :  { %v3857_v21 = vadd.f32 %v3723_v41, %v435_v29 }
 0x142   :  { %v2970_v32 = vpack.i.bf16 %v3857_v21, %v3854_v31  ;;  %2841 = vmatmul.msk.f32.gmra.mxu0 %vm131_vm1, %v88_v30 }
 0x144   :  { %2971 = vrot.lane.b32.xlu2 %v2970_v32, %s3503_s28 }
 0x147   :  { %v438_v33 = vpop.f32.mrf.mxu0 }
 0x148   :  { %v3871_v36 = vadd.f32 %v3723_v41, %v438_v33 }
 0x14a   :  { %v2975_v37 = vpack.i.bf16 %v3868_v35, %v3871_v36  ;;  %2842 = vmatmul.msk.f32.gmra.mxu0 %vm131_vm1, %v89_v34 }
 0x14c   :  { %2976 = vrot.lane.b32.xlu0 %v2975_v37, %s3503_s28 }
 0x14f   :  { %v441_v38 = vpop.f32.mrf.mxu0 }
 0x150   :  { %v3884_v42 = vadd.f32 %v3723_v41, %v441_v38 }
 0x152   :  { %v2980_v43 = vpack.i.bf16 %v3884_v42, %v3881_v40  ;;  %2843 = vmatmul.msk.f32.gmra.mxu0 %vm131_vm1, %v90_v39 }
 0x154   :  { %2981 = vrot.lane.b32.xlu0 %v2980_v43, %s3503_s28 }
 0x156   :  { %v2942_v61 = vpop.permute.xlu2 %2941 }
 0x157   :  { %v444_v46 = vpop.f32.mrf.mxu0  ;;  %v2944_v7 = vunpack.i.h.bf16 %v2942_v61  ;;  %v2943_v10 = vunpack.i.l.bf16 %v2942_v61  ;;  %v97_v61 = vld [vmem:[%s6404_s0 + $0x178] sm:$0xff] }
 0x158   :  { %v3897_v49 = vadd.f32 %v3723_v41, %v444_v46 }
 0x15a   :  { %v2985_v50 = vpack.i.bf16 %v3897_v49, %v3894_v48  ;;  %2844 = vmatmul.msk.f32.gmra.mxu0 %vm131_vm1, %v91_v47 }
 0x15c   :  { %2986 = vrot.lane.b32.xlu1 %v2985_v50, %s3503_s28 }
 0x15f   :  { %v447_v53 = vpop.f32.mrf.mxu0 }
 0x160   :  { %v3911_v58 = vadd.f32 %v3723_v41, %v447_v53 }
 0x162   :  { %v2990_v59 = vpack.i.bf16 %v3908_v55, %v3911_v58  ;;  %2845 = vmatmul.msk.f32.gmra.mxu0 %vm131_vm1, %v92_v54 }
 0x164   :  { %2991 = vrot.lane.b32.xlu0 %v2990_v59, %s3503_s28 }
 0x166   :  { %v2937_v60 = vpop.permute.xlu1 %2936 }
 0x167   :  { %v2939_v62 = vunpack.i.h.bf16 %v2937_v60  ;;  %v2938_v1 = vunpack.i.l.bf16 %v2937_v60  ;;  %v450_v2 = vpop.f32.mrf.mxu0 }
 0x168   :  { %v3925_v4 = vadd.f32 %v3723_v41, %v450_v2 }
 0x169   :  { %v3928_v5 = vmax.f32 %v3751_v52, %v2939_v62  ;;  %v3931_v6 = vmax.f32 %v3748_v51, %v2938_v1  ;;  %v3941_v52 = vmax.f32 %v3764_v57, %v2944_v7  ;;  %v3944_v51 = vmax.f32 %v3761_v56, %v2943_v10 }
 0x16a   :  { %v3000_v11 = vpack.i.bf16 %v3922_v3, %v3925_v4  ;;  %2846 = vmatmul.msk.f32.gmra.mxu0 %vm131_vm1, %v93_v25 }
 0x16b   :  { %6537 = vst [vmem:[#allocation2_spill] sm:$0xff] %v3928_v5  ;;  %v2995_v27 = vpack.i.bf16 %v3928_v5, %v3931_v6  ;;  %v3005_v56 = vpack.i.bf16 %v3941_v52, %v3944_v51 }
 0x16c   :  { %3001 = vrot.lane.b32.xlu2 %v3000_v11, %s3503_s28 }
 0x16d   :  { %2996 = vrot.lane.b32.xlu0 %v2995_v27, %s3504_s20 }
 0x16f   :  { %v453_v12 = vpop.f32.mrf.mxu0 }
 0x170   :  { %v3953_v17 = vadd.f32 %v3723_v41, %v453_v12  ;;  %v98_v12 = vld [vmem:[%s6404_s0 + $0x180] sm:$0xff] }
 0x172   :  { %2847 = vmatmul.msk.f32.gmra.mxu0 %vm131_vm1, %v94_v15  ;;  %713 = vrot.lane.b32.xlu1 %v3953_v17, %s3503_s28 }
 0x174   :  { %3006 = vrot.lane.b32.xlu2 %v3005_v56, %s3504_s20 }
 0x177   :  { %v456_v57 = vpop.f32.mrf.mxu0 }
 0x178   :  { %v3963_v20 = vadd.f32 %v3723_v41, %v456_v57 }
 0x17a   :  { %715 = vrot.lane.b32.xlu0 %v3963_v20, %s3503_s28  ;;  %2848 = vmatmul.msk.f32.gmra.mxu0 %vm131_vm1, %v95_v16 }
 0x17e   :  { %v2947_v22 = vpop.permute.xlu1 %2946 }
 0x17f   :  { %v2949_v23 = vunpack.i.h.bf16 %v2947_v22  ;;  %v2948_v28 = vunpack.i.l.bf16 %v2947_v22  ;;  %v459_v29 = vpop.f32.mrf.mxu0 }
 0x180   :  { %v3968_v30 = vadd.f32 %v3723_v41, %v459_v29 }
 0x181   :  { %v3971_v32 = vmax.f32 %v3781_v0, %v2949_v23  ;;  %v3974_v33 = vmax.f32 %v3778_v63, %v2948_v28  ;;  %v96_v63 = vld [vmem:[%s6404_s0 + $0x170] sm:$0xff]  ;;  %v3989_v0 = vpop.permute.xlu0 %2931 }
 0x182   :  { %717 = vrot.lane.b32.xlu0 %v3968_v30, %s3503_s28  ;;  %2849 = vmatmul.msk.f32.vlgmr.msra.gmra.mxu1 %vm131_vm1, %v96_v63  ;;  %v100_v23 = vld [vmem:[%s6404_s0 + $0x190] sm:$0xff] }
 0x183   :  { %v3010_v34 = vpack.i.bf16 %v3971_v32, %v3974_v33 }
 0x185   :  { %3011 = vrot.lane.b32.xlu1 %v3010_v34, %s3504_s20 }
 0x186   :  { %v2957_v37 = vpop.permute.xlu2 %2956 }
 0x187   :  { %v462_v38 = vpop.f32.mrf.mxu0  ;;  %v2959_v10 = vunpack.i.h.bf16 %v2957_v37  ;;  %v2958_v11 = vunpack.i.l.bf16 %v2957_v37 }
 0x188   :  { %v3982_v39 = vadd.f32 %v3723_v41, %v462_v38 }
 0x18a   :  { %719 = vrot.lane.b32.xlu0 %v3982_v39, %s3503_s28  ;;  %2850 = vmatmul.msk.f32.gmra.mxu1 %vm131_vm1, %v97_v61 }
 0x18e   :  { %v2962_v43 = vpop.permute.xlu2 %2961 }
 0x18f   :  { %v2964_v46 = vunpack.i.h.bf16 %v2962_v43  ;;  %v2963_v47 = vunpack.i.l.bf16 %v2962_v43  ;;  %v465_v50 = vpop.f32.mrf.mxu0 }
 0x190   :  { %v3993_v53 = vadd.f32 %v3723_v41, %v465_v50 }
 0x191   :  { %v3996_v54 = vmax.f32 %v3826_v18, %v2964_v46  ;;  %v3999_v59 = vmax.f32 %v3829_v19, %v2963_v47 }
 0x192   :  { %721 = vrot.lane.b32.xlu2 %v3993_v53, %s3503_s28  ;;  %2851 = vmatmul.msk.f32.gmra.mxu1 %vm131_vm1, %v98_v12 }
 0x193   :  { %v3025_v60 = vpack.i.bf16 %v3996_v54, %v3999_v59 }
 0x195   :  { %3026 = vrot.lane.b32.xlu0 %v3025_v60, %s3504_s20 }
 0x196   :  { %v2952_v62 = vpop.permute.xlu0 %2951 }
 0x197   :  { %v2954_v18 = vunpack.i.h.bf16 %v2952_v62  ;;  %v2953_v1 = vunpack.i.l.bf16 %v2952_v62  ;;  %v468_v2 = vpop.f32.mrf.mxu0 }
 0x198   :  { %v4011_v19 = vadd.f32 %v3723_v41, %v468_v2 }
 0x199   :  { %v4014_v25 = vmax.f32 %v3799_v8, %v2954_v18  ;;  %v4017_v7 = vmax.f32 %v3802_v9, %v2953_v1  ;;  %v4029_v8 = vmax.f32 %v3815_v14, %v2959_v10  ;;  %v4032_v9 = vmax.f32 %v3812_v13, %v2958_v11  ;;  %v99_v13 = vld [vmem:[%s6404_s0 + $0x188] sm:$0xff] }
 0x19a   :  { %723 = vrot.lane.b32.xlu2 %v4011_v19, %s3503_s28  ;;  %2852 = vmatmul.msk.f32.gmra.mxu1 %vm131_vm1, %v99_v13 }
 0x19b   :  { %v3015_v27 = vpack.i.bf16 %v4014_v25, %v4017_v7  ;;  %v3020_v14 = vpack.i.bf16 %v4029_v8, %v4032_v9 }
 0x19d   :  { %3016 = vrot.lane.b32.xlu1 %v3015_v27, %s3504_s20 }
 0x19f   :  { %v471_v15 = vpop.f32.mrf.mxu0 }
 0x1a0   :  { %v4038_v56 = vadd.f32 %v3723_v41, %v471_v15 }
 0x1a2   :  { %725 = vrot.lane.b32.xlu2 %v4038_v56, %s3503_s28  ;;  %2853 = vmatmul.msk.f32.gmra.mxu1 %vm131_vm1, %v100_v23 }
 0x1a5   :  { %3021 = vrot.lane.b32.xlu1 %v3020_v14, %s3504_s20 }
 0x1a7   :  { %v474_v57 = vpop.f32.mrf.mxu0 }
 0x1a8   :  { %v4051_v22 = vadd.f32 %v3723_v41, %v474_v57 }
 0x1ad   :  { %727 = vrot.lane.b32.xlu1 %v4051_v22, %s3503_s28 }
 0x1ae   :  { %v2967_v28 = vpop.permute.xlu1 %2966 }
 0x1af   :  { %v2969_v29 = vunpack.i.h.bf16 %v2967_v28  ;;  %v2968_v34 = vunpack.i.l.bf16 %v2967_v28  ;;  %v477_v37 = vpop.f32.mrf.mxu0 }
 0x1b1   :  { %v4060_v38 = vmax.f32 %v3840_v24, %v2969_v29  ;;  %v4063_v63 = vmax.f32 %v3843_v26, %v2968_v34  ;;  %v4076_v26 = vpop.permute.xlu2 %2971 }
 0x1b3   :  { %6538 = vst [vmem:[#allocation3_spill] sm:$0xff] %v4060_v38  ;;  %v3035_v43 = vpack.i.bf16 %v4060_v38, %v4063_v63 }
 0x1b5   :  { %3036 = vrot.lane.b32.xlu2 %v3035_v43, %s3504_s20 }
 0x1b7   :  { %v4068_v46 = vpop.f32.mrf.mxu0 }
 0x1be   :  { %v4070_v50 = vpop.permute.xlu0 %2976 }
 0x1bf   :  { %v483_v47 = vpop.f32.mrf.mxu0 }
 0x1c6   :  { %v2982_v61 = vpop.permute.xlu0 %2981  ;;  %v3002_v14 = vpop.permute.xlu2 %3001 }
 0x1c7   :  { %v4072_v60 = vpop.f32.mrf.mxu0  ;;  %v3004_v57 = vunpack.i.h.bf16 %v3002_v14 }
 0x1c9   :  { %v4099_v28 = vmax.f32 %v3922_v3, %v3004_v57 }
 0x1ce   :  { %v2987_v62 = vpop.permute.xlu1 %2986 }
 0x1cf   :  { %v2989_v18 = vunpack.i.h.bf16 %v2987_v62  ;;  %v2988_v24 = vunpack.i.l.bf16 %v2987_v62  ;;  %v4074_v1 = vpop.f32.mrf.mxu0 }
 0x1d1   :  { %v4079_v2 = vmax.f32 %v3897_v49, %v2989_v18  ;;  %v4082_v10 = vmax.f32 %v3894_v48, %v2988_v24  ;;  %v3003_v48 = vunpack.i.l.bf16 %v3002_v14 }
 0x1d3   :  { %v3065_v11 = vpack.i.bf16 %v4079_v2, %v4082_v10  ;;  %v4102_v29 = vmax.f32 %v3925_v4, %v3003_v48  ;;  %v2978_v4 = vunpack.i.l.bf16 %v4070_v50 }
 0x1d5   :  { %3066 = vrot.lane.b32.xlu1 %v3065_v11, %s3504_s20  ;;  %v3075_v18 = vpack.i.bf16 %v4099_v28, %v4102_v29 }
 0x1d6   :  { %v2992_v27 = vpop.permute.xlu0 %2991 }
 0x1d7   :  { %v2994_v12 = vunpack.i.h.bf16 %v2992_v27  ;;  %v2993_v15 = vunpack.i.l.bf16 %v2992_v27  ;;  %v4087_v16 = vpop.f32.mrf.mxu0 }
 0x1d9   :  { %v4090_v13 = vmax.f32 %v3908_v55, %v2994_v12  ;;  %v4093_v49 = vmax.f32 %v3911_v58, %v2993_v15  ;;  %v2974_v55 = vunpack.i.h.bf16 %v4076_v26  ;;  %v2934_v12 = vunpack.i.h.bf16 %v3989_v0 }
 0x1db   :  { %6539 = vst [vmem:[#allocation4_spill] sm:$0xff] %v4093_v49  ;;  %v3070_v23 = vpack.i.bf16 %v4090_v13, %v4093_v49  ;;  %v4112_v24 = vmax.f32 %v3857_v21, %v2974_v55  ;;  %v4126_v21 = vmax.f32 %v3732_v45, %v2934_v12  ;;  %v4138_v55 = vadd.f32 %v3723_v41, %v483_v47 }
 0x1dd   :  { %3071 = vrot.lane.b32.xlu1 %v3070_v23, %s3504_s20  ;;  %6543 = vst [vmem:[#allocation8_spill] sm:$0xff] %v4126_v21  ;;  %v4135_v23 = vadd.f32 %v3723_v41, %v477_v37 }
 0x1df   :  { %v495_v34 = vpop.f32.mrf.mxu0  ;;  %v4104_v43 = vpop.permute.xlu0 %2996 }
 0x1e0   :  { %6540 = vst [vmem:[#allocation5_spill] sm:$0xff] %v4104_v43  ;;  %v2998_v58 = vunpack.i.l.bf16 %v4104_v43 }
 0x1e2   :  { %v1237_v62 = vmax.f32 %v3931_v6, %v2998_v58  ;;  %v4123_v6 = vmax.f32 %v3871_v36, %v2978_v4  ;;  %v102_v36 = vld [vmem:[%s6404_s0 + $0x1a0] sm:$0xff]  ;;  %v3050_v58 = vpack.i.bf16 %v4138_v55, %v4135_v23 }
 0x1e3   :  { %2855 = vmatmul.msk.f32.gmra.mxu2 %vm131_vm1, %v102_v36 }
 0x1e4   :  { %v4114_v3 = vmax.f32 %v1237_v62, 0.0  ;;  %6542 = vst [vmem:[#allocation7_spill] sm:$0xff] %v4123_v6  ;;  %v3045_v14 = vpack.i.bf16 %v4123_v6, %v4126_v21  ;;  %v2984_v62 = vunpack.i.h.bf16 %v2982_v61 }
 0x1e5   :  { %3076 = vrot.lane.b32.xlu1 %v3075_v18, %s3504_s20  ;;  %v2983_v18 = vunpack.i.l.bf16 %v2982_v61 }
 0x1e6   :  { %6541 = vst [vmem:[#allocation6_spill] sm:$0xff] %v4114_v3  ;;  %v3040_v11 = vpack.i.bf16 %v4114_v3, %v4112_v24  ;;  %v4153_v47 = vmax.f32 %v3884_v42, %v2984_v62  ;;  %v4168_v42 = vadd.f32 %v3723_v41, %v4068_v46  ;;  %v2979_v46 = vunpack.i.h.bf16 %v4070_v50 }
 0x1e7   :  { %v498_v27 = vpop.f32.mrf.mxu0  ;;  %v4156_v4 = vmax.f32 %v3881_v40, %v2983_v18  ;;  %v4172_v40 = vadd.f32 %v3723_v41, %v4072_v60 }
 0x1e8   :  { %3041 = vrot.lane.b32.xlu2 %v3040_v11, %s3504_s20  ;;  %v4195_v62 = vadd.f32 %v3723_v41, %v498_v27 }
 0x1e9   :  { %v3055_v12 = vpack.i.bf16 %v4153_v47, %v4156_v4 }
 0x1ec   :  { %v716_v15 = vpop.permute.xlu0 %715 }
 0x1ef   :  { %v501_v57 = vpop.f32.mrf.mxu0 }
 0x1f0   :  { %v4131_v48 = vadd.f32 %v3723_v41, %v501_v57  ;;  %3046 = vrot.lane.b32.xlu2 %v3045_v14, %s3504_s20  ;;  %v714_v14 = vpop.permute.xlu1 %713 }
 0x1f2   :  { %745 = vrot.lane.b32.xlu1 %v4131_v48, %s3503_s28 }
 0x1f4   :  { %v718_v45 = vpop.permute.xlu0 %717 }
 0x1f5   :  { %v4149_v37 = vmax.f32 %v3968_v30, %v718_v45  ;;  %v3060_v30 = vpack.i.bf16 %v4172_v40, %v4168_v42 }
 0x1f8   :  { %3051 = vrot.lane.b32.xlu2 %v3050_v58, %s3503_s28  ;;  %v4178_v57 = vpop.permute.xlu1 %3011  ;;  %v4192_v58 = vmax.f32 %v3868_v35, %v2979_v46  ;;  %v103_v35 = vld [vmem:[%s6404_s0 + $0x1a8] sm:$0xff]  ;;  %v4232_v46 = vmax.f32 %v3953_v17, %v714_v14  ;;  %v4248_v17 = vmax.f32 %v3963_v20, %v716_v15  ;;  %v504_v14 = vpop.f32.mrf.mxu0  ;;  %v113_v15 = vld [vmem:[%s6404_s0 + $0x1f8] sm:$0xff] }
 0x1f9   :  { %2856 = vmatmul.msk.f32.gmra.mxu2 %vm131_vm1, %v103_v35  ;;  %v107_v20 = vld [vmem:[%s6404_s0 + $0x1c8] sm:$0xff] }
 0x1fa   :  { %1077 = vrot.lane.b32.xlu1 %v4149_v37, %s3504_s20  ;;  %6544 = vst [vmem:[#allocation9_spill] sm:$0xff] %v4192_v58 }
 0x1fc   :  { %v720_v11 = vpop.permute.xlu0 %719 }
 0x1fd   :  { %v4163_v61 = vmax.f32 %v3982_v39, %v720_v11  ;;  %v4182_v39 = vadd.f32 %v3723_v41, %v495_v34  ;;  %v4199_v34 = vpop.permute.xlu2 %3006  ;;  %v104_v11 = vld [vmem:[%s6404_s0 + $0x1b0] sm:$0xff] }
 0x200   :  { %3056 = vrot.lane.b32.xlu2 %v3055_v12, %s3504_s20  ;;  %v4223_v12 = vadd.f32 %v3723_v41, %v4087_v16 }
 0x201   :  { %2857 = vmatmul.msk.f32.gmra.mxu2 %vm131_vm1, %v104_v11  ;;  %v4256_v11 = vpop.f32.mrf.mxu1 }
 0x202   :  { %1079 = vrot.lane.b32.xlu1 %v4163_v61, %s3504_s20 }
 0x205   :  { %v4214_v27 = vpop.permute.xlu2 %721 }
 0x208   :  { %3061 = vrot.lane.b32.xlu2 %v3060_v30, %s3503_s28 }
 0x209   :  { %v4278_v5 = vpop.f32.mrf.mxu1 }
 0x20d   :  { %v724_v30 = vpop.permute.xlu2 %723 }
 0x20f   :  { %v4184_v45 = vpop.permute.xlu1 %3016 }
 0x210   :  { %v3019_v60 = vunpack.i.h.bf16 %v4184_v45  ;;  %741 = vrot.lane.b32.xlu2 %v4182_v39, %s3503_s28 }
 0x212   :  { %v1239_v36 = vmax.f32 %v4014_v25, %v3019_v60  ;;  %v4212_v25 = vadd.f32 %v3723_v41, %v4074_v1  ;;  %v105_v1 = vld [vmem:[%s6404_s0 + $0x1b8] sm:$0xff] }
 0x213   :  { %2858 = vmatmul.msk.f32.gmra.mxu2 %vm131_vm1, %v105_v1  ;;  %v4259_v1 = vadd.f32 %v3723_v41, %v504_v14 }
 0x214   :  { %v4197_v18 = vmax.f32 %v1239_v36, 0.0  ;;  %6546 = vst [vmem:[#allocation11_spill] sm:$0xff] %v4212_v25  ;;  %v106_v36 = vld [vmem:[%s6404_s0 + $0x1c0] sm:$0xff] }
 0x215   :  { %v4237_v16 = vpop.permute.xlu2 %725 }
 0x216   :  { %6545 = vst [vmem:[#allocation10_spill] sm:$0xff] %v4197_v18  ;;  %v3030_v50 = vpack.i.bf16 %v4197_v18, %v4192_v58 }
 0x217   :  { %v4239_v60 = vpop.permute.xlu1 %3021 }
 0x218   :  { %3031 = vrot.lane.b32.xlu0 %v3030_v50, %s3504_s20  ;;  %743 = vrot.lane.b32.xlu2 %v4195_v62, %s3503_s28  ;;  %v112_v50 = vld [vmem:[%s6404_s0 + $0x1f0] sm:$0xff] }
 0x219   :  { %2865 = vmatmul.msk.f32.vlgmr.msra.gmra.mxu3 %vm131_vm1, %v112_v50  ;;  %v4273_v50 = vpop.permute.xlu0 %3026 }
 0x21a   :  { %v3028_v38 = vunpack.i.l.bf16 %v4273_v50 }
 0x21b   :  { %2859 = vmatmul.msk.f32.gmra.mxu2 %vm131_vm1, %v106_v36 }
 0x21c   :  { %v1253_v43 = vmax.f32 %v3999_v59, %v3028_v38  ;;  %v115_v59 = vld [vmem:[%s6404_s0 + $0x208] sm:$0xff] }
 0x21d   :  { %v4254_v35 = vpop.permute.xlu2 %3036 }
 0x21e   :  { %v4298_v21 = vmax.f32 %v1253_v43, 0.0 }
 0x21f   :  { %v4268_v36 = vpop.permute.xlu1 %727 }
 0x220   :  { %737 = vrot.lane.b32.xlu0 %v4212_v25, %s3503_s28  ;;  %v114_v25 = vld [vmem:[%s6404_s0 + $0x200] sm:$0xff]  ;;  %6549 = vst [vmem:[#allocation14_spill] sm:$0xff] %v4298_v21 }
 0x221   :  { %2866 = vmatmul.msk.f32.gmra.mxu3 %vm131_vm1, %v113_v15  ;;  %v4287_v15 = vmax.f32 %v4011_v19, %v724_v30  ;;  %v109_v19 = vld [vmem:[%s6404_s0 + $0x1d8] sm:$0xff]  ;;  %v4303_v30 = vpop.f32.mrf.mxu1 }
 0x222   :  { %6550 = vst [vmem:[#allocation15_spill] sm:$0xff] %v4303_v30 }
 0x223   :  { %2860 = vmatmul.msk.f32.gmra.mxu2 %vm131_vm1, %v107_v20  ;;  %v108_v20 = vld [vmem:[%s6404_s0 + $0x1d0] sm:$0xff]  ;;  %6547 = vst [vmem:[#allocation12_spill] sm:$0xff] %v4287_v15 }
 0x228   :  { %739 = vrot.lane.b32.xlu0 %v4223_v12, %s3503_s28 }
 0x229   :  { %2867 = vmatmul.msk.f32.gmra.mxu3 %vm131_vm1, %v114_v25 }
 0x22b   :  { %2861 = vmatmul.msk.f32.gmra.mxu2 %vm131_vm1, %v108_v20  ;;  %v3110_v20 = vpack.i.bf16 %v4197_v18, %v4298_v21  ;;  %v110_v18 = vld [vmem:[%s6404_s0 + $0x1e0] sm:$0xff] }
 0x230   :  { %1073 = vrot.lane.b32.xlu0 %v4232_v46, %s3504_s20 }
 0x231   :  { %2868 = vmatmul.msk.f32.gmra.mxu3 %vm131_vm1, %v115_v59 }
 0x233   :  { %2862 = vmatmul.msk.f32.gmra.mxu2 %vm131_vm1, %v109_v19 }
 0x238   :  { %1075 = vrot.lane.b32.xlu0 %v4248_v17, %s3504_s20 }
 0x23b   :  { %2863 = vmatmul.msk.f32.gmra.mxu2 %vm131_vm1, %v110_v18 }
 0x240   :  { %747 = vrot.lane.b32.xlu0 %v4259_v1, %s3503_s28 }
 0x242   :  { %v4275_v14 = vpop.permute.xlu2 %3041 }
 0x247   :  { %v4290_v49 = vpop.permute.xlu1 %3066 }
 0x248   :  { %1083 = vrot.lane.b32.xlu0 %v4287_v15, %s3504_s20  ;;  %v3068_v30 = vunpack.i.l.bf16 %v4290_v49 }
 0x24a   :  { %v4296_v58 = vpop.permute.xlu2 %3046 }
 0x24b   :  { %6548 = vst [vmem:[#allocation13_spill] sm:$0xff] %v4296_v58 }
 0x24f   :  { %v4311_v38 = vpop.permute.xlu1 %3071 }
 0x250   :  { %6551 = vst [vmem:[#allocation16_spill] sm:$0xff] %v4311_v38  ;;  %3111 = vrot.lane.b32.xlu0 %v3110_v20, %s3505_s22  ;;  %v116_v20 = vld [vmem:[%s6404_s0 + $0x210] sm:$0xff]  ;;  %v3074_v59 = vunpack.i.h.bf16 %v4311_v38  ;;  %v2973_v38 = vunpack.i.l.bf16 %v4076_v26 }
 0x251   :  { %2869 = vmatmul.msk.f32.gmra.mxu3 %vm131_vm1, %v116_v20 }
 0x252   :  { %v3052_v43 = vpop.permute.xlu2 %3051  ;;  %v4345_v58 = vmax.f32 %v4090_v13, %v3074_v59  ;;  %v4359_v13 = vmax.f32 %v3854_v31, %v2973_v38  ;;  %v3024_v31 = vunpack.i.h.bf16 %v4239_v60  ;;  %v3008_v38 = vunpack.i.l.bf16 %v4199_v34 }
 0x253   :  { %v3054_v25 = vunpack.i.h.bf16 %v3052_v43  ;;  %v3053_v15 = vunpack.i.l.bf16 %v3052_v43 }
 0x255   :  { %v4317_v21 = vmax.f32 %v4138_v55, %v3054_v25  ;;  %v4320_v19 = vmax.f32 %v4135_v23, %v3053_v15  ;;  %v4335_v23 = vpop.f32.mrf.mxu1  ;;  %v1250_v15 = vmax.f32 %v4082_v10, %v3068_v30  ;;  %v117_v10 = vld [vmem:[%s6404_s0 + $0x218] sm:$0xff] }
 0x256   :  { %6554 = vst [vmem:[#allocation19_spill] sm:$0xff] %v4335_v23 }
 0x257   :  { %6552 = vst [vmem:[#allocation17_spill] sm:$0xff] %v4317_v21  ;;  %v4330_v43 = vpop.permute.xlu1 %3076  ;;  %v3125_v55 = vpack.i.bf16 %v4317_v21, %v4320_v19  ;;  %v4347_v20 = vmax.f32 %v1250_v15, 0.0  ;;  %v3018_v15 = vunpack.i.l.bf16 %v4184_v45 }
 0x258   :  { %6553 = vst [vmem:[#allocation18_spill] sm:$0xff] %v4320_v19  ;;  %v3079_v25 = vunpack.i.h.bf16 %v4330_v43 }
 0x259   :  { %3126 = vrot.lane.b32.xlu0 %v3125_v55, %s3504_s20  ;;  %v6439_v55 = vmax.f32 %v4345_v58, 0.0  ;;  %2870 = vmatmul.msk.f32.gmra.mxu3 %vm131_vm1, %v117_v10  ;;  %v4386_v10 = vmax.f32 %v3993_v53, %v4214_v27  ;;  %v1251_v45 = vmax.f32 %v4017_v7, %v3018_v15  ;;  %v111_v7 = vld [vmem:[%s6404_s0 + $0x1e8] sm:$0xff]  ;;  %v522_v15 = vpop.f32.mrf.mxu2 }
 0x25a   :  { %v4341_v18 = vmax.f32 %v4099_v28, %v3079_v25  ;;  %v3057_v6 = vpop.permute.xlu2 %3056  ;;  %2864 = vmatmul.msk.f32.gmra.mxu2 %vm131_vm1, %v111_v7  ;;  %v3038_v7 = vunpack.i.l.bf16 %v4254_v35 }
 0x25b   :  { %v3059_v19 = vunpack.i.h.bf16 %v3057_v6  ;;  %v3058_v21 = vunpack.i.l.bf16 %v3057_v6 }
 0x25c   :  { %v6438_v23 = vmax.f32 %v4341_v18, 0.0 }
 0x25d   :  { %v1257_v30 = vmax.f32 %v4153_v47, %v3059_v19  ;;  %v1249_v28 = vmax.f32 %v4156_v4, %v3058_v21  ;;  %v519_v4 = vpop.f32.mrf.mxu1  ;;  %v118_v19 = vld [vmem:[%s6404_s0 + $0x220] sm:$0xff] }
 0x25e   :  { %v3085_v26 = vpack.i.bf16 %v6438_v23, %v4347_v20  ;;  %v4382_v25 = vadd.f32 %v3723_v41, %v519_v4 }
 0x25f   :  { %v4361_v6 = vmax.f32 %v1257_v30, 0.0  ;;  %v4363_v59 = vmax.f32 %v1249_v28, 0.0  ;;  %v1252_v30 = vmax.f32 %v4029_v8, %v3024_v31  ;;  %v4391_v28 = vadd.f32 %v3723_v41, %v4256_v11  ;;  %v119_v31 = vld [vmem:[%s6404_s0 + $0x228] sm:$0xff] }
 0x260   :  { %3086 = vrot.lane.b32.xlu1 %v3085_v26, %s3505_s22  ;;  %6556 = vst [vmem:[#allocation21_spill] sm:$0xff] %v4382_v25  ;;  %v1238_v26 = vmax.f32 %v3944_v51, %v3008_v38  ;;  %v3043_v8 = vunpack.i.l.bf16 %v4275_v14  ;;  %v3029_v51 = vunpack.i.h.bf16 %v4273_v50  ;;  %v4412_v11 = vmax.f32 %v1251_v45, 0.0 }
 0x261   :  { %6555 = vst [vmem:[#allocation20_spill] sm:$0xff] %v4361_v6  ;;  %v3080_v21 = vpack.i.bf16 %v6439_v55, %v4363_v59  ;;  %v3130_v47 = vpack.i.bf16 %v4359_v13, %v4361_v6  ;;  %2871 = vmatmul.msk.f32.gmra.mxu3 %vm131_vm1, %v118_v19  ;;  %v4400_v53 = vmax.f32 %v1252_v30, 0.0  ;;  %v4426_v38 = vadd.f32 %v3723_v41, %v4278_v5 }
 0x262   :  { %v4406_v27 = vmax.f32 %v1238_v26, 0.0  ;;  %6557 = vst [vmem:[#allocation22_spill] sm:$0xff] %v4412_v11  ;;  %v4420_v4 = vmax.f32 %v4112_v24, %v3043_v8  ;;  %v3095_v24 = vpack.i.bf16 %v4114_v3, %v4412_v11  ;;  %v2933_v26 = vunpack.i.l.bf16 %v3989_v0 }
 0x263   :  { %3081 = vrot.lane.b32.xlu2 %v3080_v21, %s3505_s22  ;;  %3131 = vrot.lane.b32.xlu0 %v3130_v47, %s3504_s20  ;;  %v3090_v21 = vpack.i.bf16 %v4347_v20, %v4382_v25  ;;  %v3069_v47 = vunpack.i.h.bf16 %v4290_v49  ;;  %6559 = vst [vmem:[#allocation24_spill] sm:$0xff] %v4426_v38  ;;  %v4430_v49 = vmax.f32 %v3996_v54, %v3029_v51  ;;  %v120_v54 = vld [vmem:[%s6404_s0 + $0x230] sm:$0xff] }
 0x264   :  { %6558 = vst [vmem:[#allocation23_spill] sm:$0xff] %v4420_v4  ;;  %v3105_v50 = vpack.i.bf16 %v4406_v27, %v4400_v53  ;;  %v6437_v30 = vmax.f32 %v4420_v4, 0.0 }
 0x265   :  { %v1258_v19 = vmax.f32 %v4079_v2, %v3069_v47  ;;  %v6440_v5 = vmax.f32 %v4430_v49, 0.0  ;;  %v4446_v2 = vadd.f32 %v3723_v41, %v522_v15  ;;  %v2101_v47 = vld [vmem:[%s6405_s3 + $0x118] sm:$0xff] }
 0x266   :  { %2410 = vmatpush.msrb.mxu3 %v2101_v47 }
 0x267   :  { %6560 = vst [vmem:[#allocation25_spill] sm:$0xff] %v4446_v2  ;;  %v4448_v45 = vmax.f32 %v1258_v19, 0.0  ;;  %v3120_v0 = vpack.i.bf16 %v6440_v5, %v6437_v30  ;;  %v3100_v8 = vpack.i.bf16 %v4412_v11, %v4446_v2  ;;  %v4479_v19 = vmax.f32 %v4038_v56, %v4237_v16 }
 0x268   :  { %1081 = vrot.lane.b32.xlu1 %v4386_v10, %s3504_s20  ;;  %v4502_v16 = vmax.f32 %v4051_v22, %v4268_v36 }
 0x269   :  { %2872 = vmatmul.msk.f32.gmra.mxu3 %vm131_vm1, %v119_v31  ;;  %6561 = vst [vmem:[#allocation26_spill] sm:$0xff] %v4448_v45  ;;  %v2100_v31 = vld [vmem:[%s6405_s3 + $0x110] sm:$0xff] }
 0x26a   :  { %2411 = vmatpush.msrb.mxu3 %v2100_v31  ;;  %v3009_v31 = vunpack.i.h.bf16 %v4199_v34 }
 0x26b   :  { %3091 = vrot.lane.b32.xlu2 %v3090_v21, %s3503_s28  ;;  %749 = vrot.lane.b32.xlu0 %v4391_v28, %s3503_s28  ;;  %v4455_v21 = vmax.f32 %v3729_v44, %v2933_v26  ;;  %v121_v44 = vld [vmem:[%s6404_s0 + $0x238] sm:$0xff]  ;;  %v2099_v26 = vld [vmem:[%s6405_s3 + $0x108] sm:$0xff] }
 0x26c   :  { %2412 = vmatpush.msrb.mxu3 %v2099_v26  ;;  %v4520_v26 = vmax.f32 %v3941_v52, %v3009_v31 }
 0x26d   :  { %v3145_v51 = vpack.i.bf16 %v4448_v45, %v4455_v21 }
 0x26e   :  { %6563 = vst [vmem:[#allocation28_spill] sm:$0xff] %v4520_v26 }
 0x270   :  { %3106 = vrot.lane.b32.xlu1 %v3105_v50, %s3505_s22  ;;  %v3013_v50 = vunpack.i.l.bf16 %v4178_v57 }
 0x271   :  { %2873 = vmatmul.msk.f32.gmra.mxu3 %vm131_vm1, %v120_v54 }
 0x272   :  { %v1240_v15 = vmax.f32 %v3974_v33, %v3013_v50 }
 0x273   :  { %3096 = vrot.lane.b32.xlu2 %v3095_v24, %s3505_s22  ;;  %751 = vrot.lane.b32.xlu0 %v4426_v38, %s3503_s28  ;;  %v1254_v24 = vmax.f32 %v4063_v63, %v3038_v7  ;;  %v3062_v7 = vpop.permute.xlu2 %3061 }
 0x274   :  { %v4493_v56 = vmax.f32 %v1240_v15, 0.0  ;;  %v3064_v50 = vunpack.i.h.bf16 %v3062_v7 }
 0x275   :  { %v4488_v54 = vmax.f32 %v1254_v24, 0.0  ;;  %v3063_v24 = vunpack.i.l.bf16 %v3062_v7 }
 0x277   :  { %6562 = vst [vmem:[#allocation27_spill] sm:$0xff] %v4488_v54  ;;  %v3115_v33 = vpack.i.bf16 %v4493_v56, %v4488_v54 }
 0x278   :  { %3121 = vrot.lane.b32.xlu1 %v3120_v0, %s3505_s22  ;;  %v2098_v0 = vld [vmem:[%s6405_s3 + $0x100] sm:$0xff] }
 0x279   :  { %2874 = vmatmul.msk.f32.gmra.mxu3 %vm131_vm1, %v121_v44  ;;  %v3078_v44 = vunpack.i.l.bf16 %v4330_v43  ;;  %v4523_v43 = vmax.f32 %v4172_v40, %v3064_v50 }
 0x27a   :  { %2413 = vmatpush.msrb.mxu3 %v2098_v0  ;;  %v746_v0 = vpop.permute.xlu1 %745 }
 0x27b   :  { %3101 = vrot.lane.b32.xlu2 %v3100_v8, %s3503_s28  ;;  %3146 = vrot.lane.b32.xlu0 %v3145_v51, %s3504_s20  ;;  %v525_v51 = vpop.f32.mrf.mxu2  ;;  %v1260_v22 = vmax.f32 %v4102_v29, %v3078_v44 }
 0x27c   :  { %v4510_v47 = vadd.f32 %v3723_v41, %v525_v51  ;;  %v4526_v41 = vmax.f32 %v4168_v42, %v3063_v24  ;;  %v742_v51 = vpop.permute.xlu2 %741 }
 0x27d   :  { %v4530_v34 = vmax.f32 %v1260_v22, 0.0 }
 0x27e   :  { %6564 = vst [vmem:[#allocation29_spill] sm:$0xff] %v4526_v41  ;;  %v3140_v29 = vpack.i.bf16 %v4523_v43, %v4526_v41 }
 0x27f   :  { %v3165_v7 = vpack.i.bf16 %v4493_v56, %v4530_v34 }
 0x282   :  { %v1078_v50 = vpop.permute.xlu1 %1077 }
 0x283   :  { %1085 = vrot.lane.b32.xlu2 %v4479_v19, %s3504_s20  ;;  %v4552_v24 = vpop.f32.mrf.mxu2 }
 0x284   :  { %v744_v22 = vpop.permute.xlu2 %743 }
 0x28a   :  { %v4497_v63 = vpop.permute.xlu0 %3031 }
 0x28b   :  { %3116 = vrot.lane.b32.xlu2 %v3115_v33, %s3505_s22 }
 0x292   :  { %v4504_v8 = vpop.permute.xlu0 %737 }
 0x293   :  { %1087 = vrot.lane.b32.xlu2 %v4502_v16, %s3504_s20 }
 0x29a   :  { %v740_v15 = vpop.permute.xlu0 %739 }
 0x29b   :  { %v4515_v36 = vmax.f32 %v4223_v12, %v740_v15  ;;  %761 = vrot.lane.b32.xlu2 %v4510_v47, %s3503_s28  ;;  %v6436_v12 = vmax.f32 %v4520_v26, 0.0 }
 0x29d   :  { %1099 = vrot.lane.b32.xlu0 %v4515_v36, %s3504_s20  ;;  %v3160_v42 = vpack.i.bf16 %v6436_v12, %v4530_v34  ;;  %v6569_v12 = vld [vmem:[#allocation13_spill] sm:$0xff] }
 0x29e   :  { %v3049_v30 = vunpack.i.h.bf16 %v6569_v12  ;;  %v3048_v54 = vunpack.i.l.bf16 %v6569_v12 }
 0x2a2   :  { %v1074_v33 = vpop.permute.xlu0 %1073 }
 0x2a3   :  { %v1261_v52 = vmax.f32 %v4232_v46, %v1074_v33  ;;  %3141 = vrot.lane.b32.xlu2 %v3140_v29, %s3504_s20  ;;  %v4548_v46 = vmax.f32 %v4182_v39, %v742_v51  ;;  %v3014_v29 = vunpack.i.h.bf16 %v4178_v57  ;;  %v4562_v39 = vmax.f32 %v4131_v48, %v746_v0  ;;  %v1080_v48 = vpop.permute.xlu1 %1079  ;;  %v4576_v0 = vpop.f32.mrf.mxu2 }
 0x2a4   :  { %v3023_v57 = vunpack.i.l.bf16 %v4239_v60 }
 0x2a5   :  { %v4540_v40 = vmax.f32 %v1261_v52, 0.0  ;;  %3161 = vrot.lane.b32.xlu0 %v3160_v42, %s3503_s28  ;;  %v4566_v52 = vmax.f32 %v4195_v62, %v744_v22  ;;  %v1248_v42 = vmax.f32 %v3971_v32, %v3014_v29  ;;  %v1264_v62 = vmax.f32 %v4163_v61, %v1080_v48 }
 0x2a6   :  { %v4584_v32 = vmax.f32 %v4032_v9, %v3023_v57 }
 0x2a7   :  { %6565 = vst [vmem:[#allocation30_spill] sm:$0xff] %v4540_v40  ;;  %2875 = vmatmul.msk.f32.vlgmr.msrb.gmra.mxu3 %vm1889_vm2, %v4540_v40 }
 0x2a8   :  { %v6441_v61 = vmax.f32 %v4584_v32, 0.0 }
 0x2aa   :  { %v1076_v44 = vpop.permute.xlu0 %1075 }
 0x2ab   :  { %v1262_v31 = vmax.f32 %v4248_v17, %v1076_v44  ;;  %3166 = vrot.lane.b32.xlu2 %v3165_v7, %s3504_s20  ;;  %v1263_v17 = vmax.f32 %v4149_v37, %v1078_v50  ;;  %v1320_v37 = vmax.f32 %v1248_v42, 0.0  ;;  %v534_v9 = vpop.f32.mrf.mxu2 }
 0x2ad   :  { %v4554_v15 = vmax.f32 %v1262_v31, 0.0  ;;  %1101 = vrot.lane.b32.xlu0 %v4548_v46, %s3504_s20  ;;  %v4571_v51 = vmax.f32 %v1263_v17, 0.0  ;;  %v4590_v31 = vmax.f32 %v1264_v62, 0.0 }
 0x2af   :  { %6566 = vst [vmem:[#allocation31_spill] sm:$0xff] %v4554_v15  ;;  %2876 = vmatmul.msk.f32.gmra.mxu3 %vm1889_vm2, %v4554_v15  ;;  %v3200_v7 = vpack.i.bf16 %v4363_v59, %v4571_v51  ;;  %v4588_v60 = vpack.i.bf16 %v1320_v37, %v4554_v15 }
 0x2b0   :  { %6567 = vst [vmem:[#allocation32_spill] sm:$0xff] %v4571_v51 }
 0x2b1   :  { %6568 = vst [vmem:[#allocation33_spill] sm:$0xff] %v4590_v31 }
 0x2b2   :  { %v748_v33 = vpop.permute.xlu0 %747 }
 0x2b3   :  { %1105 = vrot.lane.b32.xlu2 %v4562_v39, %s3504_s20  ;;  %v4606_v17 = vmax.f32 %v4259_v1, %v748_v33  ;;  %v4614_v48 = vpop.f32.mrf.mxu2 }
 0x2b5   :  { %1103 = vrot.lane.b32.xlu0 %v4566_v52, %s3504_s20 }
 0x2b7   :  { %2877 = vmatmul.msk.f32.gmra.mxu3 %vm1889_vm2, %v4571_v51 }
 0x2ba   :  { %v1084_v44 = vpop.permute.xlu0 %1083 }
 0x2bb   :  { %3201 = vrot.lane.b32.xlu2 %v3200_v7, %s3503_s28  ;;  %v540_v33 = vpop.f32.mrf.mxu2 }
 0x2bd   :  { %v4592_v50 = vpop.permute.xlu2 %3081  ;;  %3186 = vrot.lane.b32.xlu0 %v4588_v60, %s3503_s28 }
 0x2be   :  { %v3083_v22 = vunpack.i.l.bf16 %v4592_v50 }
 0x2bf   :  { %2878 = vmatmul.msk.f32.gmra.mxu3 %vm1889_vm2, %v4590_v31 }
 0x2c0   :  { %v4603_v29 = vsel %vm1889_vm2, %v6441_v61, %v3083_v22  ;;  %v6571_v61 = vld [vmem:[#allocation7_spill] sm:$0xff] }
 0x2c1   :  { %v4632_v26 = vmax.f32 %v6571_v61, %v3049_v30  ;;  %v6573_v61 = vld [vmem:[#allocation8_spill] sm:$0xff] }
 0x2c2   :  { %v4608_v42 = vpop.permute.xlu0 %3111  ;;  %v1243_v11 = vmax.f32 %v6573_v61, %v3048_v54  ;;  %v6576_v54 = vld [vmem:[#allocation9_spill] sm:$0xff] }
 0x2c3   :  { %1107 = vrot.lane.b32.xlu2 %v4606_v17, %s3504_s20  ;;  %v6454_v25 = vmax.f32 %v4632_v26, 0.0 }
 0x2c5   :  { %v4612_v57 = vpop.permute.xlu2 %3091 }
 0x2cb   :  { %v4616_v62 = vpop.permute.xlu0 %3126 }
 0x2cd   :  { %v4618_v7 = vpop.permute.xlu2 %3096 }
 0x2d2   :  { %v4621_v22 = vpop.permute.xlu1 %3086 }
 0x2d3   :  { %v3088_v1 = vunpack.i.l.bf16 %v4621_v22 }
 0x2d5   :  { %v4624_v23 = vpop.permute.xlu2 %3101  ;;  %v4626_v55 = vpop.permute.xlu0 %3131  ;;  %v4629_v5 = vsel %vm1889_vm2, %v1320_v37, %v3088_v1 }
 0x2d6   :  { %6570 = vst [vmem:[#allocation13_spill] sm:$0xff] %v4624_v23  ;;  %v3134_v4 = vunpack.i.h.bf16 %v4626_v55 }
 0x2d8   :  { %v1242_v41 = vmax.f32 %v4359_v13, %v3134_v4  ;;  %v4649_v13 = vpop.f32.mrf.mxu2  ;;  %v6575_v4 = vld [vmem:[#allocation12_spill] sm:$0xff] }
 0x2d9   :  { %6574 = vst [vmem:[#allocation8_spill] sm:$0xff] %v4649_v13 }
 0x2da   :  { %v1314_v38 = vmax.f32 %v1242_v41, 0.0  ;;  %v1082_v2 = vpop.permute.xlu1 %1081 }
 0x2db   :  { %v1265_v23 = vmax.f32 %v4386_v10, %v1082_v2  ;;  %v3033_v10 = vunpack.i.l.bf16 %v4497_v63  ;;  %v1266_v2 = vmax.f32 %v6575_v4, %v1084_v44 }
 0x2dc   :  { %v3190_v3 = vpack.i.bf16 %v1314_v38, %v4554_v15  ;;  %v3135_v37 = vpack.i.bf16 %v1314_v38, %v6454_v25  ;;  %v6585_v25 = vld [vmem:[#allocation11_spill] sm:$0xff] }
 0x2dd   :  { %v4642_v1 = vmax.f32 %v1265_v23, 0.0  ;;  %v1086_v30 = vpop.permute.xlu2 %1085  ;;  %v4656_v23 = vld [vmem:[%s6403_s2] ss:$0 sm:$0xff]  ;;  %v1244_v41 = vmax.f32 %v6576_v54, %v3033_v10  ;;  %v4716_v15 = vmax.f32 %v6585_v25, %v4504_v8  ;;  %v3129_v8 = vunpack.i.h.bf16 %v4616_v62 }
 0x2de   :  { %3191 = vrot.lane.b32.xlu0 %v3190_v3, %s3504_s20  ;;  %3136 = vrot.lane.b32.xlu1 %v3135_v37, %s3505_s22  ;;  %v4660_v38 = vadd.f32 %v4656_v23, %v4552_v24  ;;  %v1315_v3 = vmax.f32 %v1243_v11, 0.0  ;;  %v4664_v37 = vmax.f32 %v1266_v2, 0.0  ;;  %v1267_v24 = vmax.f32 %v4479_v19, %v1086_v30 }
 0x2df   :  { %6572 = vst [vmem:[#allocation7_spill] sm:$0xff] %v4642_v1  ;;  %2879 = vmatmul.msk.f32.gmra.mxu3 %vm1889_vm2, %v4642_v1  ;;  %v1316_v44 = vmax.f32 %v1244_v41, 0.0  ;;  %v4678_v10 = vadd.f32 %v4656_v23, %v4576_v0  ;;  %v4690_v30 = vadd.f32 %v4656_v23, %v534_v9  ;;  %v4693_v0 = vadd.f32 %v4656_v23, %v540_v33  ;;  %v555_v41 = vpop.f32.mrf.mxu3  ;;  %v6582_v9 = vld [vmem:[#allocation16_spill] sm:$0xff] }
 0x2e0   :  { %v3205_v12 = vpack.i.bf16 %v1315_v3, %v4571_v51  ;;  %6577 = vst [vmem:[#allocation12_spill] sm:$0xff] %v4664_v37  ;;  %v4674_v11 = vpop.f32.mrf.mxu2  ;;  %v4681_v2 = vmax.f32 %v1267_v24, 0.0  ;;  %v3073_v33 = vunpack.i.l.bf16 %v6582_v9  ;;  %v6583_v24 = vld [vmem:[#allocation5_spill] sm:$0xff]  ;;  %v750_v9 = vpop.permute.xlu0 %749 }
 0x2e1   :  { %6578 = vst [vmem:[#allocation9_spill] sm:$0xff] %v4674_v11  ;;  %v3220_v4 = vpack.i.bf16 %v1316_v44, %v4590_v31  ;;  %v4698_v44 = vadd.f32 %v4656_v23, %v555_v41  ;;  %v6586_v11 = vld [vmem:[#allocation2_spill] sm:$0xff] }
 0x2e3   :  { %6580 = vst [vmem:[#allocation35_spill] sm:$0xff] %v4698_v44 }
 0x2e5   :  { %v4666_v61 = vpop.permute.xlu2 %3116 }
 0x2e6   :  { %3206 = vrot.lane.b32.xlu0 %v3205_v12, %s3504_s20  ;;  %763 = vrot.lane.b32.xlu1 %v4660_v38, %s3503_s28 }
 0x2e7   :  { %2880 = vmatmul.msk.f32.gmra.mxu3 %vm1889_vm2, %v4664_v37 }
 0x2e8   :  { %v549_v54 = vpop.f32.mrf.mxu2 }
 0x2ed   :  { %v1088_v3 = vpop.permute.xlu2 %1087 }
 0x2ee   :  { %3221 = vrot.lane.b32.xlu0 %v3220_v4, %s3504_s20  ;;  %765 = vrot.lane.b32.xlu1 %v4678_v10, %s3503_s28  ;;  %v1268_v19 = vmax.f32 %v4502_v16, %v1088_v3  ;;  %v4705_v16 = vadd.f32 %v4656_v23, %v549_v54  ;;  %v2999_v4 = vunpack.i.h.bf16 %v6583_v24  ;;  %v4727_v24 = vmax.f32 %v4391_v28, %v750_v9  ;;  %v4746_v9 = vpop.permute.xlu0 %751 }
 0x2ef   :  { %2881 = vmatmul.msk.f32.gmra.mxu3 %vm1889_vm2, %v4681_v2  ;;  %v3255_v28 = vpack.i.bf16 %v4664_v37, %v4642_v1 }
 0x2f0   :  { %v4695_v12 = vmax.f32 %v1268_v19, 0.0  ;;  %6581 = vst [vmem:[#allocation36_spill] sm:$0xff] %v4705_v16  ;;  %v3240_v3 = vpack.i.bf16 %v4698_v44, %v4705_v16  ;;  %v6584_v19 = vld [vmem:[#allocation4_spill] sm:$0xff]  ;;  %v4719_v13 = vmax.f32 %v6586_v11, %v2999_v4  ;;  %v6589_v11 = vld [vmem:[#allocation17_spill] sm:$0xff] }
 0x2f1   :  { %v1259_v41 = vmax.f32 %v6584_v19, %v3073_v33  ;;  %v1271_v4 = vmax.f32 %v6589_v11, %v3129_v8 }
 0x2f2   :  { %6579 = vst [vmem:[#allocation34_spill] sm:$0xff] %v4695_v12  ;;  %v6456_v33 = vmax.f32 %v4719_v13, 0.0 }
 0x2f3   :  { %6587 = vst [vmem:[#allocation16_spill] sm:$0xff] %v4719_v13  ;;  %v4724_v54 = vmax.f32 %v1259_v41, 0.0  ;;  %v6592_v13 = vmax.f32 %v4584_v32, 0.0 }
 0x2f5   :  { %6588 = vst [vmem:[#allocation5_spill] sm:$0xff] %v4724_v54  ;;  %v4730_v19 = vpop.permute.xlu2 %761  ;;  %v3150_v25 = vpack.i.bf16 %v6456_v33, %v4724_v54  ;;  %v4750_v33 = vmax.f32 %v1271_v4, 0.0  ;;  %v3170_v44 = vpack.i.bf16 %v6592_v13, %v4540_v40  ;;  %v6594_v4 = vmax.f32 %v4430_v49, 0.0  ;;  %v6595_v49 = vld [vmem:[#allocation15_spill] sm:$0xff] }
 0x2f6   :  { %771 = vrot.lane.b32.xlu0 %v4693_v0, %s3503_s28  ;;  %767 = vrot.lane.b32.xlu1 %v4690_v30, %s3503_s28 }
 0x2f7   :  { %2882 = vmatmul.msk.f32.gmra.mxu3 %vm1889_vm2, %v4695_v12  ;;  %6591 = vst [vmem:[#allocation11_spill] sm:$0xff] %v4750_v33  ;;  %v3280_v11 = vpack.i.bf16 %v4361_v6, %v4750_v33  ;;  %v3175_v16 = vpack.i.bf16 %v6594_v4, %v4540_v40  ;;  %v2097_v4 = vld [vmem:[%s6405_s3 + $0xf8] sm:$0xff]  ;;  %v6597_v40 = vld [vmem:[#allocation19_spill] sm:$0xff]  ;;  %v2088_v6 = vld [vmem:[%s6405_s3 + $0xb0] sm:$0xff] }
 0x2f8   :  { %2285 = vmatpush.msrb.mxu2 %v2097_v4  ;;  %v2078_v4 = vld [vmem:[%s6405_s3 + $0x60] sm:$0xff]  ;;  %v2069_v33 = vld [vmem:[%s6405_s3 + $0x18] sm:$0xff] }
 0x2fd   :  { %v4744_v41 = vpop.permute.xlu2 %3141 }
 0x2fe   :  { %3241 = vrot.lane.b32.xlu0 %v3240_v3, %s3503_s28  ;;  %1097 = vrot.lane.b32.xlu1 %v4716_v15, %s3504_s20  ;;  %v3155_v3 = vpack.i.bf16 %v4724_v54, %v4406_v27  ;;  %6590 = vst [vmem:[#allocation4_spill] sm:$0xff] %v4744_v41 }
 0x305   :  { %v4965_v12 = vpop.permute.xlu2 %3166 }
 0x306   :  { %1109 = vrot.lane.b32.xlu0 %v4727_v24, %s3504_s20  ;;  %3151 = vrot.lane.b32.xlu1 %v3150_v25, %s3503_s28  ;;  %v3144_v25 = vunpack.i.h.bf16 %v4744_v41  ;;  %v4902_v41 = vmax.f32 %v4510_v47, %v4730_v19  ;;  %v2084_v47 = vld [vmem:[%s6405_s3 + $0x90] sm:$0xff] }
 0x308   :  { %v1272_v8 = vmax.f32 %v4523_v43, %v3144_v25  ;;  %6599 = vst [vmem:[#allocation19_spill] sm:$0xff] %v4902_v41 }
 0x30e   :  { %3256 = vrot.lane.b32.xlu0 %v3255_v28, %s3505_s22  ;;  %3156 = vrot.lane.b32.xlu1 %v3155_v3, %s3504_s20  ;;  %v4761_v28 = vpop.permute.xlu0 %3146  ;;  %v4763_v3 = vmax.f32 %v1272_v8, 0.0  ;;  %v4784_v8 = vadd.f32 %v4656_v23, %v6595_v49  ;;  %v2080_v49 = vld [vmem:[%s6405_s3 + $0x70] sm:$0xff] }
 0x310   :  { %6593 = vst [vmem:[#allocation2_spill] sm:$0xff] %v4763_v3  ;;  %v3290_v43 = vpack.i.bf16 %v4448_v45, %v4763_v3  ;;  %v3295_v13 = vpack.i.bf16 %v4400_v53, %v4763_v3  ;;  %v2094_v45 = vld [vmem:[%s6405_s3 + $0xe0] sm:$0xff]  ;;  %v2092_v3 = vld [vmem:[%s6405_s3 + $0xd0] sm:$0xff] }
 0x316   :  { %3281 = vrot.lane.b32.xlu0 %v3280_v11, %s3503_s28  ;;  %3171 = vrot.lane.b32.xlu1 %v3170_v44, %s3503_s28  ;;  %v4772_v32 = vpop.permute.xlu0 %1099  ;;  %v3210_v11 = vpack.i.bf16 %v4784_v8, %v4590_v31 }
 0x31e   :  { %3176 = vrot.lane.b32.xlu1 %v3175_v16, %s3504_s20  ;;  %3291 = vrot.lane.b32.xlu0 %v3290_v43, %s3503_s28  ;;  %v4778_v25 = vpop.permute.xlu0 %3161  ;;  %v4801_v43 = vpop.permute.xlu1 %3106 }
 0x326   :  { %3181 = vrot.lane.b32.xlu1 %v3170_v44, %s3505_s22  ;;  %3296 = vrot.lane.b32.xlu0 %v3295_v13, %s3504_s20  ;;  %v4786_v16 = vpop.permute.xlu0 %1101  ;;  %v2081_v44 = vld [vmem:[%s6405_s3 + $0x78] sm:$0xff] }
 0x327   :  { %2172 = vmatpush.msrb.mxu1 %v2081_v44  ;;  %v2095_v44 = vld [vmem:[%s6405_s3 + $0xe8] sm:$0xff] }
 0x329   :  { %2173 = vmatpush.msrb.mxu1 %v2080_v49  ;;  %v2077_v49 = vld [vmem:[%s6405_s3 + $0x58] sm:$0xff] }
 0x32e   :  { %3196 = vrot.lane.b32.xlu1 %v4588_v60, %s3505_s22  ;;  %v4799_v60 = vadd.f32 %v4656_v23, %v4614_v48  ;;  %v4803_v13 = vpop.permute.xlu0 %1103  ;;  %v2079_v48 = vld [vmem:[%s6405_s3 + $0x68] sm:$0xff] }
 0x32f   :  { %2174 = vmatpush.msrb.mxu1 %v2079_v48  ;;  %v2093_v48 = vld [vmem:[%s6405_s3 + $0xd8] sm:$0xff] }
 0x330   :  { %6596 = vst [vmem:[#allocation17_spill] sm:$0xff] %v4799_v60 }
 0x331   :  { %2175 = vmatpush.msrb.mxu1 %v2078_v4  ;;  %v4842_v4 = vadd.f32 %v4656_v23, %v6597_v40  ;;  %v2074_v40 = vld [vmem:[%s6405_s3 + $0x40] sm:$0xff] }
 0x333   :  { %2176 = vmatpush.msrb.mxu1 %v2077_v49  ;;  %v2075_v49 = vld [vmem:[%s6405_s3 + $0x48] sm:$0xff] }
 0x336   :  { %3211 = vrot.lane.b32.xlu1 %v3210_v11, %s3503_s28  ;;  %v2096_v11 = vld [vmem:[%s6405_s3 + $0xf0] sm:$0xff] }
 0x337   :  { %2286 = vmatpush.msrb.mxu2 %v2096_v11  ;;  %v3225_v11 = vpack.i.bf16 %v4590_v31, %v4571_v51  ;;  %v4846_v31 = vpop.permute.xlu0 %3186  ;;  %v3119_v51 = vunpack.i.h.bf16 %v4666_v61 }
 0x339   :  { %2287 = vmatpush.msrb.mxu2 %v2095_v44  ;;  %v2076_v44 = vld [vmem:[%s6405_s3 + $0x50] sm:$0xff] }
 0x33a   :  { %2177 = vmatpush.msrb.mxu1 %v2076_v44  ;;  %v3230_v44 = vpack.i.bf16 %v4842_v4, %v4642_v1 }
 0x33b   :  { %2288 = vmatpush.msrb.mxu2 %v2094_v45  ;;  %v4844_v45 = vpop.permute.xlu1 %3121 }
 0x33c   :  { %2178 = vmatpush.msrb.mxu1 %v2075_v49  ;;  %v2089_v49 = vld [vmem:[%s6405_s3 + $0xb8] sm:$0xff] }
 0x33d   :  { %2289 = vmatpush.msrb.mxu2 %v2093_v48  ;;  %v2090_v48 = vld [vmem:[%s6405_s3 + $0xc0] sm:$0xff] }
 0x33e   :  { %769 = vrot.lane.b32.xlu1 %v4799_v60, %s3503_s28  ;;  %2179 = vmatpush.msrb.mxu1 %v2074_v40  ;;  %v3094_v60 = vunpack.i.h.bf16 %v4612_v57 }
 0x33f   :  { %2290 = vmatpush.msrb.mxu2 %v2092_v3  ;;  %v2073_v3 = vld [vmem:[%s6405_s3 + $0x38] sm:$0xff] }
 0x340   :  { %2180 = vmatpush.msrb.mxu1 %v2073_v3  ;;  %v2071_v3 = vld [vmem:[%s6405_s3 + $0x28] sm:$0xff] }
 0x346   :  { %3226 = vrot.lane.b32.xlu1 %v3225_v11, %s3505_s22  ;;  %v2091_v11 = vld [vmem:[%s6405_s3 + $0xc8] sm:$0xff] }
 0x347   :  { %2291 = vmatpush.msrb.mxu2 %v2091_v11  ;;  %v2072_v11 = vld [vmem:[%s6405_s3 + $0x30] sm:$0xff] }
 0x348   :  { %2181 = vmatpush.msrb.mxu1 %v2072_v11  ;;  %v2086_v11 = vld [vmem:[%s6405_s3 + $0xa0] sm:$0xff] }
 0x349   :  { %2292 = vmatpush.msrb.mxu2 %v2090_v48 }
 0x34a   :  { %2182 = vmatpush.msrb.mxu1 %v2071_v3 }
 0x34b   :  { %2293 = vmatpush.msrb.mxu2 %v2089_v49  ;;  %v1895_v49 = vsel %vm1889_vm2, %v4406_v27, %v3119_v51  ;;  %v2085_v27 = vld [vmem:[%s6405_s3 + $0x98] sm:$0xff] }
 0x34d   :  { %2294 = vmatpush.msrb.mxu2 %v2088_v6  ;;  %v2070_v6 = vld [vmem:[%s6405_s3 + $0x20] sm:$0xff] }
 0x34e   :  { %3231 = vrot.lane.b32.xlu1 %v3230_v44, %s3503_s28  ;;  %v2087_v44 = vld [vmem:[%s6405_s3 + $0xa8] sm:$0xff]  ;;  %2183 = vmatpush.msrb.mxu1 %v2070_v6  ;;  %v2082_v6 = vld [vmem:[%s6405_s3 + $0x80] sm:$0xff] }
 0x34f   :  { %2295 = vmatpush.msrb.mxu2 %v2087_v44  ;;  %v2068_v44 = vld [vmem:[%s6405_s3 + $0x10] sm:$0xff] }
 0x350   :  { %v4876_v40 = vpop.permute.xlu0 %3191  ;;  %v4878_v1 = vpop.permute.xlu1 %3136  ;;  %2184 = vmatpush.msrb.mxu1 %v2069_v33  ;;  %v2066_v33 = vld [vmem:[%s6405_s3] sm:$0xff] }
 0x351   :  { %6598 = vst [vmem:[#allocation15_spill] sm:$0xff] %v4876_v40  ;;  %v3194_v48 = vunpack.i.h.bf16 %v4876_v40  ;;  %2296 = vmatpush.msrb.mxu2 %v2086_v11 }
 0x352   :  { %2185 = vmatpush.msrb.mxu1 %v2068_v44 }
 0x353   :  { %v1928_v3 = vsel %vm1922_vm3, %v1895_v49, %v3194_v48  ;;  %2297 = vmatpush.msrb.mxu2 %v2085_v27  ;;  %v2083_v49 = vld [vmem:[%s6405_s3 + $0x88] sm:$0xff] }
 0x354   :  { %v4908_v51 = vsel %vm1955_vm4, %v1928_v3, %v3094_v60  ;;  %v2067_v60 = vld [vmem:[%s6405_s3 + $0x8] sm:$0xff]  ;;  %v3139_v3 = vunpack.i.h.bf16 %v4878_v1 }
 0x355   :  { %2298 = vmatpush.msrb.mxu2 %v2084_v47  ;;  %2186 = vmatpush.msrb.mxu1 %v2067_v60 }
 0x356   :  { %1121 = vrot.lane.b32.xlu1 %v4902_v41, %s3504_s20  ;;  %v1897_v60 = vsel %vm1889_vm2, %v4493_v56, %v3139_v3  ;;  %v6603_v3 = vld [vmem:[#allocation3_spill] sm:$0xff]  ;;  %v3084_v41 = vunpack.i.h.bf16 %v4592_v50  ;;  %v1274_v50 = vmax.f32 %v4515_v36, %v4772_v32 }
 0x357   :  { %2299 = vmatpush.msrb.mxu2 %v2083_v49  ;;  %2187 = vmatpush.msrb.mxu1 %v2066_v33 }
 0x358   :  { %v4918_v19 = vpop.permute.xlu0 %3206  ;;  %v764_v48 = vpop.permute.xlu1 %763  ;;  %v4990_v36 = vmax.f32 %v1274_v50, 0.0 }
 0x359   :  { %6600 = vst [vmem:[#allocation37_spill] sm:$0xff] %v4918_v19  ;;  %v4933_v11 = vmax.f32 %v4660_v38, %v764_v48  ;;  %2300 = vmatpush.msrb.mxu2 %v2082_v6  ;;  %v3245_v38 = vpack.i.bf16 %v4400_v53, %v4664_v37  ;;  %v4949_v48 = vpop.f32.mrf.mxu3 }
 0x35b   :  { %6601 = vst [vmem:[#allocation38_spill] sm:$0xff] %v4933_v11 }
 0x35e   :  { %1123 = vrot.lane.b32.xlu1 %v4933_v11, %s3504_s20  ;;  %v3039_v11 = vunpack.i.h.bf16 %v4254_v35 }
 0x360   :  { %v4938_v27 = vpop.permute.xlu0 %3221  ;;  %v766_v44 = vpop.permute.xlu1 %765 }
 0x361   :  { %6602 = vst [vmem:[#allocation39_spill] sm:$0xff] %v4938_v27  ;;  %v3224_v47 = vunpack.i.h.bf16 %v4938_v27  ;;  %v4954_v6 = vmax.f32 %v4678_v10, %v766_v44 }
 0x363   :  { %v4944_v49 = vsel %vm1922_vm3, %v1897_v60, %v3224_v47  ;;  %v1233_v47 = vmax.f32 %v6603_v3, %v3039_v11  ;;  %v561_v60 = vpop.f32.mrf.mxu3  ;;  %v3133_v11 = vunpack.i.l.bf16 %v4626_v55 }
 0x365   :  { %v1305_v44 = vmax.f32 %v1233_v47, 0.0 }
 0x366   :  { %3246 = vrot.lane.b32.xlu1 %v3245_v38, %s3503_s28  ;;  %v4962_v38 = vadd.f32 %v4656_v23, %v561_v60 }
 0x368   :  { %v4951_v33 = vpop.permute.xlu1 %767  ;;  %6604 = vst [vmem:[#allocation3_spill] sm:$0xff] %v4962_v38 }
 0x36e   :  { %1125 = vrot.lane.b32.xlu1 %v4954_v6, %s3504_s20 }
 0x370   :  { %v1098_v56 = vpop.permute.xlu1 %1097 }
 0x371   :  { %v1273_v37 = vmax.f32 %v4716_v15, %v1098_v56  ;;  %v3148_v15 = vunpack.i.l.bf16 %v4761_v28  ;;  %v3044_v56 = vunpack.i.h.bf16 %v4275_v14 }
 0x373   :  { %v4967_v10 = vmax.f32 %v1273_v37, 0.0  ;;  %v1890_v37 = vsel %vm1889_vm2, %v1305_v44, %v3084_v41  ;;  %v1234_v60 = vmax.f32 %v4455_v21, %v3148_v15  ;;  %v1106_v41 = vpop.permute.xlu2 %1105  ;;  %v3149_v44 = vunpack.i.h.bf16 %v4761_v28 }
 0x375   :  { %2883 = vmatmul.msk.f32.gmra.mxu3 %vm1889_vm2, %v4967_v10  ;;  %v3305_v35 = vpack.i.bf16 %v4724_v54, %v4967_v10  ;;  %v1923_v54 = vsel %vm1922_vm3, %v1890_v37, %v3044_v56  ;;  %v3310_v21 = vpack.i.bf16 %v4990_v36, %v4967_v10  ;;  %v3099_v37 = vunpack.i.h.bf16 %v4618_v7  ;;  %v564_v56 = vpop.f32.mrf.mxu3 }
 0x376   :  { %785 = vrot.lane.b32.xlu1 %v4962_v38, %s3503_s28  ;;  %v2002_v38 = vsel %vm1922_vm3, %v4603_v29, %v3133_v11  ;;  %v6486_v11 = vunpack.i.l.bf16 %v4778_v25  ;;  %v2003_v28 = vsel %vm1922_vm3, %v4629_v5, %v3149_v44 }
 0x377   :  { %3306 = vrot.lane.b32.xlu0 %v3305_v35, %s3505_s22  ;;  %v1306_v35 = vmax.f32 %v1234_v60, 0.0 }
 0x378   :  { %v4982_v3 = vpop.permute.xlu1 %3151 }
 0x379   :  { %v3154_v47 = vunpack.i.h.bf16 %v4982_v3  ;;  %v6487_v55 = vunpack.i.l.bf16 %v4982_v3 }
 0x37b   :  { %v1956_v32 = vsel %vm1955_vm4, %v1923_v54, %v3154_v47  ;;  %v2034_v14 = vsel %vm1955_vm4, %v2002_v38, %v6487_v55  ;;  %v1275_v54 = vmax.f32 %v4548_v46, %v4786_v16  ;;  %v3089_v38 = vunpack.i.h.bf16 %v4621_v22 }
 0x37c   :  { %2188 = vmatmul.f32.vlgmr.msrb.gmra.mxu1 %v1956_v32  ;;  %2301 = vmatmul.f32.vlgmr.msrb.gmra.mxu2 %v2034_v14  ;;  %v3164_v47 = vunpack.i.h.bf16 %v4778_v25  ;;  %v5012_v32 = vadd.f32 %v4656_v23, %v564_v56  ;;  %v2035_v22 = vsel %vm1955_vm4, %v2003_v28, %v6486_v11  ;;  %v3034_v56 = vunpack.i.h.bf16 %v4497_v63 }
 0x37d   :  { %2884 = vmatmul.msk.f32.gmra.mxu3 %vm1889_vm2, %v4990_v36  ;;  %v1891_v60 = vsel %vm1889_vm2, %v1306_v35, %v3089_v38  ;;  %v5014_v46 = vmax.f32 %v1275_v54, 0.0  ;;  %v5024_v35 = vpop.permute.xlu2 %3201  ;;  %v1276_v54 = vmax.f32 %v4566_v52, %v4803_v13  ;;  %v6606_v38 = vmax.f32 %v4345_v58, 0.0 }
 0x37f   :  { %3311 = vrot.lane.b32.xlu0 %v3310_v21, %s3503_s28  ;;  %6605 = vst [vmem:[#allocation40_spill] sm:$0xff] %v5014_v46  ;;  %v3098_v21 = vunpack.i.l.bf16 %v4618_v7  ;;  %v772_v7 = vpop.permute.xlu0 %771  ;;  %v5045_v13 = vmax.f32 %v1276_v54, 0.0  ;;  %v1277_v54 = vmax.f32 %v4562_v39, %v1106_v41  ;;  %v6608_v39 = vmax.f32 %v4341_v18, 0.0 }
 0x380   :  { %v3157_v15 = vpop.permute.xlu1 %3156 }
 0x381   :  { %v3158_v50 = vunpack.i.l.bf16 %v3157_v15  ;;  %v3159_v44 = vunpack.i.h.bf16 %v3157_v15  ;;  %6607 = vst [vmem:[#allocation41_spill] sm:$0xff] %v5045_v13 }
 0x383   :  { %v1924_v16 = vsel %vm1922_vm3, %v1891_v60, %v3158_v50  ;;  %v1892_v50 = vsel %vm1889_vm2, %v6606_v38, %v3099_v37  ;;  %v5040_v60 = vsel %vm1889_vm2, %v4363_v59, %v3098_v21  ;;  %v3168_v21 = vunpack.i.l.bf16 %v4965_v12 }
 0x384   :  { %2304 = vmatmul.f32.gmra.mxu2 %v2035_v22  ;;  %v1957_v14 = vsel %vm1955_vm4, %v1924_v16, %v3164_v47  ;;  %v2004_v52 = vsel %vm1922_vm3, %v5040_v60, %v3159_v44  ;;  %v1925_v58 = vsel %vm1922_vm3, %v1892_v50, %v3034_v56  ;;  %v3108_v22 = vunpack.i.l.bf16 %v4801_v43 }
 0x385   :  { %2191 = vmatmul.f32.gmra.mxu1 %v1957_v14  ;;  %2885 = vmatmul.msk.f32.gmra.mxu3 %vm1889_vm2, %v5014_v46  ;;  %v3325_v16 = vpack.i.bf16 %v4530_v34, %v4990_v36  ;;  %v3109_v14 = vunpack.i.h.bf16 %v4801_v43  ;;  %v3169_v44 = vunpack.i.h.bf16 %v4965_v12  ;;  %v6483_v38 = vunpack.i.l.bf16 %v4846_v31 }
 0x386   :  { %v3189_v50 = vunpack.i.h.bf16 %v4846_v31 }
 0x387   :  { %787 = vrot.lane.b32.xlu0 %v5012_v32, %s3503_s28  ;;  %v5069_v43 = vpop.permute.xlu0 %3241  ;;  %v1893_v41 = vsel %vm1889_vm2, %v6608_v39, %v3109_v14 }
 0x388   :  { %v5034_v47 = vpop.permute.xlu1 %3171 }
 0x389   :  { %v3174_v28 = vunpack.i.h.bf16 %v5034_v47  ;;  %v6481_v15 = vunpack.i.l.bf16 %v5034_v47 }
 0x38b   :  { %v2036_v63 = vsel %vm1955_vm4, %v2004_v52, %v6481_v15  ;;  %v1958_v37 = vsel %vm1955_vm4, %v1925_v58, %v3174_v28  ;;  %v5067_v28 = vsel %vm1889_vm2, %v4347_v20, %v3108_v22  ;;  %v1108_v52 = vpop.permute.xlu2 %1107  ;;  %v3113_v58 = vunpack.i.l.bf16 %v4608_v42 }
 0x38c   :  { %2307 = vmatmul.f32.gmra.mxu2 %v2036_v63  ;;  %v2005_v12 = vsel %vm1922_vm3, %v5067_v28, %v3168_v21  ;;  %v5077_v63 = vmax.f32 %v1277_v54, 0.0  ;;  %v1926_v22 = vsel %vm1922_vm3, %v1893_v41, %v3169_v44  ;;  %v1278_v18 = vmax.f32 %v4606_v17, %v1108_v52 }
 0x38d   :  { %2194 = vmatmul.f32.gmra.mxu1 %v1958_v37  ;;  %2886 = vmatmul.msk.f32.gmra.mxu3 %vm1889_vm2, %v5045_v13  ;;  %v2037_v37 = vsel %vm1955_vm4, %v2005_v12, %v6483_v38  ;;  %v1959_v21 = vsel %vm1955_vm4, %v1926_v22, %v3189_v50  ;;  %v6610_v54 = vmax.f32 %v4632_v26, 0.0  ;;  %v6612_v50 = vld [vmem:[#allocation6_spill] sm:$0xff]  ;;  %v5108_v26 = vadd.f32 %v4656_v23, %v4949_v48 }
 0x38e   :  { %6609 = vst [vmem:[#allocation42_spill] sm:$0xff] %v5077_v63  ;;  %v6482_v41 = vunpack.i.l.bf16 %v5024_v35  ;;  %v3204_v22 = vunpack.i.h.bf16 %v5024_v35 }
 0x38f   :  { %3326 = vrot.lane.b32.xlu0 %v3325_v16, %s3505_s22  ;;  %v3114_v16 = vunpack.i.h.bf16 %v4608_v42  ;;  %v3340_v12 = vpack.i.bf16 %v6610_v54, %v5045_v13  ;;  %v6611_v42 = vld [vmem:[#allocation22_spill] sm:$0xff]  ;;  %v1110_v54 = vpop.permute.xlu0 %1109 }
 0x390   :  { %v5063_v56 = vpop.permute.xlu1 %3176  ;;  %v5096_v44 = vsel %vm1889_vm2, %v6611_v42, %v3113_v58 }
 0x391   :  { %v6490_v15 = vunpack.i.l.bf16 %v5063_v56  ;;  %v3179_v14 = vunpack.i.h.bf16 %v5063_v56  ;;  %v1894_v52 = vsel %vm1889_vm2, %v6612_v50, %v3114_v16  ;;  %v3124_v50 = vunpack.i.h.bf16 %v4844_v45 }
 0x393   :  { %v2006_v17 = vsel %vm1922_vm3, %v5096_v44, %v6490_v15  ;;  %v1927_v58 = vsel %vm1922_vm3, %v1894_v52, %v3179_v14  ;;  %v3118_v52 = vunpack.i.l.bf16 %v4666_v61 }
 0x394   :  { %2310 = vmatmul.f32.gmra.mxu2 %v2037_v37  ;;  %v5111_v37 = vmax.f32 %v1278_v18, 0.0  ;;  %v1960_v16 = vsel %vm1955_vm4, %v1927_v58, %v3204_v22  ;;  %v1279_v18 = vmax.f32 %v4727_v24, %v1110_v54  ;;  %v3209_v58 = vunpack.i.h.bf16 %v4918_v19 }
 0x395   :  { %2197 = vmatmul.f32.gmra.mxu1 %v1959_v21  ;;  %2887 = vmatmul.msk.f32.gmra.mxu3 %vm1889_vm2, %v5077_v63  ;;  %v2038_v21 = vsel %vm1955_vm4, %v2006_v17, %v6482_v41  ;;  %v6484_v24 = vunpack.i.l.bf16 %v4876_v40  ;;  %v3093_v22 = vunpack.i.l.bf16 %v4612_v57  ;;  %v6617_v41 = vld [vmem:[#allocation21_spill] sm:$0xff] }
 0x396   :  { %6613 = vst [vmem:[#allocation22_spill] sm:$0xff] %v5111_v37  ;;  %v3350_v48 = vpack.i.bf16 %v5111_v37, %v5108_v26  ;;  %v5130_v17 = vmax.f32 %v1279_v18, 0.0 }
 0x397   :  { %3341 = vrot.lane.b32.xlu0 %v3340_v12, %s3504_s20  ;;  %v5128_v12 = vmax.f32 %v4693_v0, %v772_v7  ;;  %v6615_v7 = vld [vmem:[#allocation10_spill] sm:$0xff]  ;;  %v923_v38 = vmax.f32 %v6617_v41, %v3093_v22  ;;  %v3123_v41 = vunpack.i.l.bf16 %v4844_v45 }
 0x398   :  { %v5098_v39 = vpop.permute.xlu1 %3181  ;;  %6614 = vst [vmem:[#allocation6_spill] sm:$0xff] %v5130_v17 }
 0x39c   :  { %2313 = vmatmul.f32.gmra.mxu2 %v2038_v21  ;;  %v1896_v21 = vsel %vm1889_vm2, %v6615_v7, %v3124_v50 }
 0x39d   :  { %2200 = vmatmul.f32.gmra.mxu1 %v1960_v16  ;;  %2888 = vmatmul.msk.f32.gmra.mxu3 %vm1889_vm2, %v5111_v37  ;;  %v1929_v16 = vsel %vm1922_vm3, %v1896_v21, %v3209_v58 }
 0x39f   :  { %3351 = vrot.lane.b32.xlu0 %v3350_v48, %s3503_s28  ;;  %v6616_v48 = vld [vmem:[#allocation13_spill] sm:$0xff] }
 0x3a0   :  { %v5125_v14 = vpop.permute.xlu1 %3196  ;;  %v3104_v57 = vunpack.i.h.bf16 %v6616_v48  ;;  %v3103_v22 = vunpack.i.l.bf16 %v6616_v48 }
 0x3a5   :  { %2203 = vmatmul.f32.gmra.mxu1 %v4908_v51  ;;  %2889 = vmatmul.msk.f32.gmra.mxu3 %vm1889_vm2, %v5130_v17  ;;  %v5150_v51 = vsel %vm1889_vm2, %v4400_v53, %v3118_v52  ;;  %v1962_v53 = vsel %vm1955_vm4, %v1929_v16, %v3104_v57 }
 0x3a6   :  { %v2007_v18 = vsel %vm1922_vm3, %v5150_v51, %v6484_v24  ;;  %v6618_v24 = vld [vmem:[#allocation14_spill] sm:$0xff] }
 0x3a7   :  { %1131 = vrot.lane.b32.xlu0 %v5128_v12, %s3504_s20  ;;  %v1988_v16 = vsel %vm1889_vm2, %v6618_v24, %v3123_v41 }
 0x3a8   :  { %v5142_v0 = vpop.permute.xlu1 %3211 }
 0x3a9   :  { %v3214_v61 = vunpack.i.h.bf16 %v5142_v0  ;;  %v6485_v54 = vunpack.i.l.bf16 %v5142_v0 }
 0x3ab   :  { %v5160_v50 = vmax.f32 %v4784_v8, %v3214_v61  ;;  %v2039_v7 = vsel %vm1955_vm4, %v2007_v18, %v6485_v54  ;;  %v6488_v8 = vunpack.i.l.bf16 %v4918_v19 }
 0x3ac   :  { %2316 = vmatmul.f32.gmra.mxu2 %v2039_v7 }
 0x3ad   :  { %2206 = vmatmul.f32.gmra.mxu1 %v1962_v53  ;;  %v3215_v52 = vpack.i.bf16 %v923_v38, %v5160_v50  ;;  %v2008_v57 = vsel %vm1922_vm3, %v1988_v16, %v6488_v8  ;;  %v6619_v53 = vld [vmem:[#allocation25_spill] sm:$0xff] }
 0x3af   :  { %3216 = vrot.lane.b32.xlu2 %v3215_v52, %s3504_s20  ;;  %v924_v52 = vmax.f32 %v6619_v53, %v3103_v22  ;;  %v3138_v22 = vunpack.i.l.bf16 %v4878_v1 }
 0x3b0   :  { %v5168_v58 = vpop.permute.xlu1 %769 }
 0x3b8   :  { %v5170_v21 = vpop.permute.xlu1 %3226 }
 0x3c0   :  { %v3232_v61 = vpop.permute.xlu1 %3231 }
 0x3c1   :  { %v3234_v18 = vunpack.i.h.bf16 %v3232_v61  ;;  %v3233_v7 = vunpack.i.l.bf16 %v3232_v61  ;;  %v6620_v61 = vld [vmem:[#allocation24_spill] sm:$0xff] }
 0x3c2   :  { %v5188_v55 = vmax.f32 %v6620_v61, %v4746_v9  ;;  %v3128_v9 = vunpack.i.l.bf16 %v4616_v62  ;;  %v6623_v62 = vld [vmem:[#allocation34_spill] sm:$0xff] }
 0x3c3   :  { %v922_v54 = vmax.f32 %v4842_v4, %v3234_v18  ;;  %v2040_v45 = vsel %vm1955_vm4, %v2008_v57, %v3233_v7  ;;  %v5197_v4 = vmax.f32 %v4690_v30, %v4951_v33  ;;  %v6489_v18 = vunpack.i.l.bf16 %v4938_v27  ;;  %v6621_v57 = vld [vmem:[#allocation27_spill] sm:$0xff] }
 0x3c4   :  { %2319 = vmatmul.f32.gmra.mxu2 %v2040_v45  ;;  %v1989_v53 = vsel %vm1889_vm2, %v6621_v57, %v3138_v22  ;;  %v6622_v45 = vld [vmem:[#allocation18_spill] sm:$0xff]  ;;  %v3260_v8 = vpack.i.bf16 %v6623_v62, %v4681_v2 }
 0x3c5   :  { %v3235_v11 = vpack.i.bf16 %v924_v52, %v922_v54  ;;  %v2009_v1 = vsel %vm1922_vm3, %v1989_v53, %v6489_v18  ;;  %v1269_v61 = vmax.f32 %v6622_v45, %v3128_v9  ;;  %v5220_v53 = vpop.permute.xlu0 %3256  ;;  %v6626_v45 = vld [vmem:[#allocation36_spill] sm:$0xff]  ;;  %v567_v18 = vpop.f32.mrf.mxu3 }
 0x3c7   :  { %3236 = vrot.lane.b32.xlu2 %v3235_v11, %s3504_s20 }
 0x3c8   :  { %v5184_v48 = vpop.permute.xlu1 %1121 }
 0x3cf   :  { %1111 = vrot.lane.b32.xlu2 %v5188_v55, %s3504_s20 }
 0x3d0   :  { %v5192_v41 = vpop.permute.xlu1 %1123 }
 0x3d7   :  { %1127 = vrot.lane.b32.xlu2 %v5197_v4, %s3504_s20 }
 0x3d8   :  { %v3247_v11 = vpop.permute.xlu1 %3246 }
 0x3d9   :  { %v3249_v7 = vunpack.i.h.bf16 %v3247_v11  ;;  %v3248_v16 = vunpack.i.l.bf16 %v3247_v11  ;;  %v5215_v11 = vmax.f32 %v1269_v61, 0.0 }
 0x3db   :  { %v1963_v30 = vsel %vm1955_vm4, %v4944_v49, %v3249_v7  ;;  %v2041_v33 = vsel %vm1955_vm4, %v2009_v1, %v3248_v16  ;;  %6624 = vst [vmem:[#allocation10_spill] sm:$0xff] %v5215_v11  ;;  %v3265_v22 = vpack.i.bf16 %v4363_v59, %v5215_v11  ;;  %v5222_v49 = vpop.permute.xlu0 %3281  ;;  %v3243_v16 = vunpack.i.l.bf16 %v5069_v43  ;;  %v6625_v1 = vld [vmem:[#allocation4_spill] sm:$0xff]  ;;  %v6629_v59 = vld [vmem:[#allocation29_spill] sm:$0xff] }
 0x3dc   :  { %2209 = vmatmul.f32.gmra.mxu1 %v1963_v30  ;;  %2322 = vmatmul.f32.gmra.mxu2 %v2041_v33  ;;  %v3143_v30 = vunpack.i.l.bf16 %v6625_v1 }
 0x3de   :  { %v1270_v15 = vmax.f32 %v6629_v59, %v3143_v30 }
 0x3df   :  { %3261 = vrot.lane.b32.xlu2 %v3260_v8, %s3505_s22  ;;  %v5227_v8 = vmax.f32 %v6626_v45, %v3243_v16 }
 0x3e1   :  { %6627 = vst [vmem:[#allocation13_spill] sm:$0xff] %v5227_v8 }
 0x3e3   :  { %v5236_v19 = vpop.permute.xlu0 %3291 }
 0x3e7   :  { %3266 = vrot.lane.b32.xlu2 %v3265_v22, %s3504_s20 }
 0x3eb   :  { %v5247_v1 = vpop.permute.xlu0 %3296 }
 0x409   :  { %v3217_v7 = vpop.permute.xlu2 %3216 }
 0x40a   :  { %v3219_v9 = vunpack.i.h.bf16 %v3217_v7  ;;  %v3218_v30 = vunpack.i.l.bf16 %v3217_v7  ;;  %v6633_v7 = vld [vmem:[#allocation35_spill] sm:$0xff] }
 0x40c   :  { %v1283_v33 = vmax.f32 %v923_v38, %v3219_v9  ;;  %v5240_v38 = vmax.f32 %v1270_v15, 0.0  ;;  %v5244_v9 = vpop.f32.mrf.mxu3 }
 0x40e   :  { %v5229_v61 = vmax.f32 %v1283_v33, 0.0  ;;  %6630 = vst [vmem:[#allocation14_spill] sm:$0xff] %v5240_v38  ;;  %v3275_v16 = vpack.i.bf16 %v4347_v20, %v5240_v38  ;;  %v6631_v33 = vld [vmem:[#allocation11_spill] sm:$0xff] }
 0x40f   :  { %v3285_v45 = vpack.i.bf16 %v6611_v42, %v6631_v33 }
 0x410   :  { %6628 = vst [vmem:[#allocation21_spill] sm:$0xff] %v5229_v61  ;;  %v3270_v22 = vpack.i.bf16 %v5215_v11, %v5229_v61  ;;  %v3360_v27 = vpack.i.bf16 %v5227_v8, %v5229_v61  ;;  %v5258_v11 = vpop.permute.xlu0 %3306 }
 0x412   :  { %3271 = vrot.lane.b32.xlu2 %v3270_v22, %s3503_s28  ;;  %3361 = vrot.lane.b32.xlu0 %v3360_v27, %s3504_s20  ;;  %v3244_v22 = vunpack.i.h.bf16 %v5069_v43  ;;  %v5253_v27 = vmax.f32 %v5160_v50, %v3218_v30 }
 0x414   :  { %v5256_v20 = vpop.f32.mrf.mxu3  ;;  %v5263_v40 = vmax.f32 %v6633_v7, %v3244_v22  ;;  %v6498_v42 = vmax.f32 %v5253_v27, 0.0 }
 0x41a   :  { %3276 = vrot.lane.b32.xlu2 %v3275_v16, %s3504_s20 }
 0x421   :  { %v3237_v59 = vpop.permute.xlu2 %3236 }
 0x422   :  { %v3239_v15 = vunpack.i.h.bf16 %v3237_v59  ;;  %v3238_v61 = vunpack.i.l.bf16 %v3237_v59  ;;  %3286 = vrot.lane.b32.xlu2 %v3285_v45, %s3504_s20 }
 0x424   :  { %v1284_v16 = vmax.f32 %v924_v52, %v3239_v15  ;;  %v5260_v8 = vmax.f32 %v922_v54, %v3238_v61  ;;  %v6635_v52 = vld [vmem:[#allocation8_spill] sm:$0xff]  ;;  %v576_v15 = vpop.f32.mrf.mxu3 }
 0x425   :  { %v5277_v54 = vadd.f32 %v4656_v23, %v6635_v52  ;;  %v5289_v7 = vadd.f32 %v4656_v23, %v576_v15  ;;  %v6640_v15 = vld [vmem:[#allocation17_spill] sm:$0xff] }
 0x426   :  { %6632 = vst [vmem:[#allocation25_spill] sm:$0xff] %v5260_v8  ;;  %v5266_v43 = vmax.f32 %v1284_v16, 0.0  ;;  %v6497_v50 = vmax.f32 %v5260_v8, 0.0  ;;  %v5286_v16 = vpop.permute.xlu0 %3311 }
 0x427   :  { %6637 = vst [vmem:[#allocation18_spill] sm:$0xff] %v5286_v16 }
 0x428   :  { %6634 = vst [vmem:[#allocation24_spill] sm:$0xff] %v5266_v43  ;;  %v3250_v30 = vpack.i.bf16 %v6497_v50, %v6498_v42  ;;  %v3370_v45 = vpack.i.bf16 %v5266_v43, %v5263_v40 }
 0x429   :  { %v1112_v61 = vpop.permute.xlu2 %1111  ;;  %6638 = vst [vmem:[#allocation34_spill] sm:$0xff] %v5289_v7 }
 0x42a   :  { %v1280_v59 = vmax.f32 %v5188_v55, %v1112_v61  ;;  %3251 = vrot.lane.b32.xlu1 %v3250_v30, %s3504_s20  ;;  %3371 = vrot.lane.b32.xlu0 %v3370_v45, %s3504_s20  ;;  %v6639_v55 = vld [vmem:[#allocation19_spill] sm:$0xff]  ;;  %v3300_v30 = vpack.i.bf16 %v6618_v24, %v4967_v10  ;;  %v3320_v61 = vpack.i.bf16 %v6621_v57, %v4990_v36 }
 0x42b   :  { %773 = vrot.lane.b32.xlu2 %v5277_v54, %s3503_s28  ;;  %v1285_v52 = vmax.f32 %v6639_v55, %v5184_v48  ;;  %v5309_v24 = vmax.f32 %v6640_v15, %v5168_v58  ;;  %v6641_v55 = vld [vmem:[#allocation38_spill] sm:$0xff] }
 0x42c   :  { %v5284_v22 = vmax.f32 %v1280_v59, 0.0  ;;  %v1286_v57 = vmax.f32 %v6641_v55, %v5192_v41  ;;  %v3184_v41 = vunpack.i.h.bf16 %v5098_v39  ;;  %v3400_v55 = vpack.i.bf16 %v5111_v37, %v5077_v63 }
 0x42d   :  { %v5303_v59 = vmax.f32 %v1285_v52, 0.0  ;;  %v3335_v52 = vpack.i.bf16 %v5045_v13, %v5014_v46 }
 0x42e   :  { %6636 = vst [vmem:[#allocation27_spill] sm:$0xff] %v5284_v22  ;;  %2890 = vmatmul.msk.f32.gmra.mxu3 %vm1889_vm2, %v5284_v22  ;;  %v788_v48 = vpop.permute.xlu0 %787  ;;  %v5325_v58 = vmax.f32 %v1286_v57, 0.0  ;;  %v3315_v57 = vpack.i.bf16 %v5240_v38, %v5266_v43  ;;  %v6645_v43 = vld [vmem:[#allocation5_spill] sm:$0xff] }
 0x431   :  { %v1128_v45 = vpop.permute.xlu2 %1127 }
 0x432   :  { %3301 = vrot.lane.b32.xlu1 %v3300_v30, %s3504_s20  ;;  %795 = vrot.lane.b32.xlu0 %v5289_v7, %s3503_s28  ;;  %v5314_v30 = vmax.f32 %v5012_v32, %v788_v48  ;;  %v5330_v32 = vadd.f32 %v4656_v23, %v567_v18  ;;  %v3183_v48 = vunpack.i.l.bf16 %v5098_v39  ;;  %v552_v7 = vpop.f32.mrf.mxu2  ;;  %v3284_v18 = vunpack.i.h.bf16 %v5222_v49 }
 0x433   :  { %3321 = vrot.lane.b32.xlu2 %v3320_v61, %s3504_s20  ;;  %v1126_v61 = vpop.permute.xlu1 %1125  ;;  %v5358_v39 = vadd.f32 %v4656_v23, %v552_v7 }
 0x434   :  { %6642 = vst [vmem:[#allocation4_spill] sm:$0xff] %v5314_v30  ;;  %v1287_v15 = vmax.f32 %v4954_v6, %v1126_v61  ;;  %v6643_v6 = vld [vmem:[#allocation16_spill] sm:$0xff]  ;;  %v5350_v38 = vsel %vm1889_vm2, %v6645_v43, %v3183_v48  ;;  %v1288_v48 = vmax.f32 %v5197_v4, %v1128_v45  ;;  %v5390_v4 = vadd.f32 %v4656_v23, %v5244_v9  ;;  %v6652_v9 = vld [vmem:[#allocation7_spill] sm:$0xff] }
 0x435   :  { %v6644_v61 = vmax.f32 %v6643_v6, 0.0  ;;  %v6647_v6 = vunpack.i.l.bf16 %v5222_v49  ;;  %v3345_v7 = vpack.i.bf16 %v5358_v39, %v5077_v63  ;;  %v3365_v45 = vpack.i.bf16 %v5325_v58, %v5303_v59 }
 0x436   :  { %2891 = vmatmul.msk.f32.gmra.mxu3 %vm1889_vm2, %v5303_v59 }
 0x437   :  { %v1898_v37 = vsel %vm1889_vm2, %v6644_v61, %v3184_v41  ;;  %v3380_v61 = vpack.i.bf16 %v6652_v9, %v5303_v59 }
 0x439   :  { %v5316_v50 = vpop.permute.xlu2 %3261 }
 0x43a   :  { %1129 = vrot.lane.b32.xlu1 %v5309_v24, %s3504_s20  ;;  %1147 = vrot.lane.b32.xlu0 %v5314_v30, %s3504_s20 }
 0x43b   :  { %3336 = vrot.lane.b32.xlu2 %v3335_v52, %s3503_s28 }
 0x43e   :  { %2892 = vmatmul.msk.f32.gmra.mxu3 %vm1889_vm2, %v5325_v58 }
 0x441   :  { %v3267_v42 = vpop.permute.xlu2 %3266 }
 0x442   :  { %v3269_v13 = vunpack.i.h.bf16 %v3267_v42  ;;  %v3268_v8 = vunpack.i.l.bf16 %v3267_v42  ;;  %3401 = vrot.lane.b32.xlu0 %v3400_v55, %s3505_s22  ;;  %3316 = vrot.lane.b32.xlu1 %v3315_v57, %s3503_s28  ;;  %v5352_v42 = vmax.f32 %v1287_v15, 0.0 }
 0x443   :  { %789 = vrot.lane.b32.xlu2 %v5330_v32, %s3503_s28 }
 0x444   :  { %6646 = vst [vmem:[#allocation36_spill] sm:$0xff] %v5352_v42  ;;  %v1931_v55 = vsel %vm1922_vm3, %v1898_v37, %v3269_v13  ;;  %v2010_v57 = vsel %vm1922_vm3, %v5350_v38, %v3268_v8  ;;  %v3405_v13 = vpack.i.bf16 %v4681_v2, %v5352_v42  ;;  %v6648_v37 = vld [vmem:[#allocation23_spill] sm:$0xff]  ;;  %v6651_v2 = vld [vmem:[#allocation9_spill] sm:$0xff] }
 0x445   :  { %v1964_v30 = vsel %vm1955_vm4, %v1931_v55, %v3284_v18  ;;  %v2042_v41 = vsel %vm1955_vm4, %v2010_v57, %v6647_v6  ;;  %v6649_v8 = vmax.f32 %v6648_v37, 0.0  ;;  %v5383_v15 = vadd.f32 %v4656_v23, %v6651_v2  ;;  %v6653_v55 = vld [vmem:[#allocation20_spill] sm:$0xff] }
 0x446   :  { %2212 = vmatmul.f32.gmra.mxu1 %v1964_v30  ;;  %2325 = vmatmul.f32.gmra.mxu2 %v2042_v41  ;;  %v5377_v30 = vmax.f32 %v1288_v48, 0.0  ;;  %v5399_v18 = vadd.f32 %v4656_v23, %v5256_v20  ;;  %v786_v41 = vpop.permute.xlu1 %785  ;;  %v5412_v23 = vpop.permute.xlu0 %3326  ;;  %v6654_v20 = vunpack.i.l.bf16 %v5063_v56  ;;  %v3199_v48 = vunpack.i.h.bf16 %v5125_v14 }
 0x447   :  { %2893 = vmatmul.msk.f32.gmra.mxu3 %vm1889_vm2, %v5352_v42  ;;  %v3330_v43 = vpack.i.bf16 %v6649_v8, %v5014_v46  ;;  %v3198_v2 = vunpack.i.l.bf16 %v5125_v14  ;;  %v3294_v56 = vunpack.i.h.bf16 %v5236_v19 }
 0x448   :  { %6650 = vst [vmem:[#allocation29_spill] sm:$0xff] %v5377_v30 }
 0x44a   :  { %3406 = vrot.lane.b32.xlu0 %v3405_v13, %s3504_s20  ;;  %3331 = vrot.lane.b32.xlu1 %v3330_v43, %s3504_s20  ;;  %v6655_v43 = vld [vmem:[#allocation3_spill] sm:$0xff] }
 0x44b   :  { %3346 = vrot.lane.b32.xlu2 %v3345_v7, %s3503_s28  ;;  %v5421_v7 = vmax.f32 %v6655_v43, %v786_v41  ;;  %v5434_v41 = vsel %vm1889_vm2, %v4530_v34, %v3198_v2  ;;  %v3228_v34 = vunpack.i.l.bf16 %v5170_v21 }
 0x44d   :  { %6656 = vst [vmem:[#allocation11_spill] sm:$0xff] %v5421_v7 }
 0x44e   :  { %v5439_v43 = vpop.permute.xlu0 %3341 }
 0x44f   :  { %2894 = vmatmul.msk.f32.gmra.mxu3 %vm1889_vm2, %v5377_v30 }
 0x452   :  { %775 = vrot.lane.b32.xlu1 %v5383_v15, %s3503_s28 }
 0x453   :  { %3356 = vrot.lane.b32.xlu2 %v3335_v52, %s3505_s22  ;;  %v3309_v52 = vunpack.i.h.bf16 %v5258_v11 }
 0x455   :  { %v1906_v57 = vsel %vm1889_vm2, %v6653_v55, %v3309_v52 }
 0x456   :  { %v1939_v37 = vsel %vm1922_vm3, %v1906_v57, %v6654_v20  ;;  %v6657_v57 = vld [vmem:[#allocation28_spill] sm:$0xff] }
 0x45a   :  { %3366 = vrot.lane.b32.xlu1 %v3365_v45, %s3503_s28 }
 0x45b   :  { %791 = vrot.lane.b32.xlu2 %v5390_v4, %s3503_s28 }
 0x462   :  { %793 = vrot.lane.b32.xlu1 %v5399_v18, %s3503_s28 }
 0x46a   :  { %3381 = vrot.lane.b32.xlu1 %v3380_v61, %s3504_s20 }
 0x46c   :  { %v5409_v6 = vpop.permute.xlu2 %3271 }
 0x46d   :  { %v3274_v13 = vunpack.i.h.bf16 %v5409_v6 }
 0x46f   :  { %v5418_v8 = vsel %vm1955_vm4, %v1939_v37, %v3274_v13  ;;  %v6658_v13 = vmax.f32 %v6657_v57, 0.0  ;;  %v6659_v57 = vunpack.i.l.bf16 %v5236_v19 }
 0x471   :  { %v1899_v20 = vsel %vm1889_vm2, %v6658_v13, %v3199_v48  ;;  %v6509_v13 = vunpack.i.l.bf16 %v5286_v16 }
 0x472   :  { %1145 = vrot.lane.b32.xlu1 %v5421_v7, %s3504_s20 }
 0x474   :  { %v3277_v45 = vpop.permute.xlu2 %3276 }
 0x475   :  { %v3279_v52 = vunpack.i.h.bf16 %v3277_v45  ;;  %v3278_v61 = vunpack.i.l.bf16 %v3277_v45  ;;  %v3395_v45 = vpack.i.bf16 %v5284_v22, %v5130_v17 }
 0x477   :  { %v1932_v14 = vsel %vm1922_vm3, %v1899_v20, %v3279_v52  ;;  %v2011_v37 = vsel %vm1922_vm3, %v5434_v41, %v3278_v61  ;;  %v6660_v20 = vld [vmem:[#allocation30_spill] sm:$0xff] }
 0x478   :  { %v1965_v55 = vsel %vm1955_vm4, %v1932_v14, %v3294_v56  ;;  %v2043_v48 = vsel %vm1955_vm4, %v2011_v37, %v6659_v57  ;;  %v5452_v22 = vsel %vm1889_vm2, %v6660_v20, %v3228_v34  ;;  %v3229_v14 = vunpack.i.h.bf16 %v5170_v21  ;;  %v5466_v34 = vpop.permute.xlu0 %3351 }
 0x479   :  { %2215 = vmatmul.f32.gmra.mxu1 %v1965_v55  ;;  %2328 = vmatmul.f32.gmra.mxu2 %v2043_v48  ;;  %6661 = vst [vmem:[#allocation35_spill] sm:$0xff] %v5452_v22  ;;  %v6662_v37 = vunpack.i.l.bf16 %v4982_v3  ;;  %v3299_v48 = vunpack.i.h.bf16 %v5247_v1  ;;  %v3298_v3 = vunpack.i.l.bf16 %v5247_v1 }
 0x47a   :  { %3396 = vrot.lane.b32.xlu1 %v3395_v45, %s3505_s22 }
 0x47c   :  { %v3287_v2 = vpop.permute.xlu2 %3286 }
 0x47d   :  { %v3289_v52 = vunpack.i.h.bf16 %v3287_v2  ;;  %v3288_v61 = vunpack.i.l.bf16 %v3287_v2  ;;  %v6663_v2 = vld [vmem:[#allocation31_spill] sm:$0xff] }
 0x47f   :  { %v1933_v56 = vsel %vm1922_vm3, %v4603_v29, %v3289_v52  ;;  %v2012_v55 = vsel %vm1922_vm3, %v5452_v22, %v3288_v61  ;;  %v6508_v29 = vunpack.i.h.bf16 %v5286_v16  ;;  %v5471_v52 = vsel %vm1889_vm2, %v6663_v2, %v3229_v14 }
 0x480   :  { %v1966_v45 = vsel %vm1955_vm4, %v1933_v56, %v6662_v37  ;;  %v2044_v57 = vsel %vm1955_vm4, %v2012_v55, %v6509_v13  ;;  %6664 = vst [vmem:[#allocation8_spill] sm:$0xff] %v5471_v52  ;;  %v1934_v61 = vsel %vm1922_vm3, %v4629_v5, %v3299_v48  ;;  %v2013_v20 = vsel %vm1922_vm3, %v5471_v52, %v3298_v3  ;;  %v1132_v14 = vpop.permute.xlu0 %1131 }
 0x481   :  { %2218 = vmatmul.f32.gmra.mxu1 %v1966_v45  ;;  %2331 = vmatmul.f32.gmra.mxu2 %v2044_v57  ;;  %v6665_v56 = vunpack.i.l.bf16 %v4778_v25  ;;  %v2045_v37 = vsel %vm1955_vm4, %v2013_v20, %v6508_v29  ;;  %v3308_v5 = vunpack.i.l.bf16 %v5258_v11  ;;  %v3258_v29 = vunpack.i.l.bf16 %v5220_v53 }
 0x482   :  { %v3353_v13 = vunpack.i.l.bf16 %v5466_v34 }
 0x483   :  { %v1967_v55 = vsel %vm1955_vm4, %v1934_v61, %v6665_v56  ;;  %v6514_v61 = vunpack.i.l.bf16 %v5409_v6  ;;  %v5503_v20 = vsel %vm1889_vm2, %v6631_v33, %v3308_v5 }
 0x484   :  { %v5539_v16 = vmax.f32 %v5108_v26, %v3353_v13  ;;  %v3259_v26 = vunpack.i.h.bf16 %v5220_v53  ;;  %v5556_v13 = vpop.f32.mrf.mxu2 }
 0x485   :  { %v5474_v21 = vpop.permute.xlu2 %773  ;;  %6674 = vst [vmem:[#allocation23_spill] sm:$0xff] %v5556_v13  ;;  %v6685_v13 = vld [vmem:[#allocation12_spill] sm:$0xff] }
 0x488   :  { %v5488_v45 = vpop.permute.xlu0 %3361 }
 0x489   :  { %2221 = vmatmul.f32.gmra.mxu1 %v1967_v55  ;;  %2334 = vmatmul.f32.gmra.mxu2 %v2045_v37  ;;  %v5507_v55 = vpop.f32.mrf.mxu3  ;;  %v5514_v37 = vpop.f32.mrf.mxu1 }
 0x48a   :  { %6667 = vst [vmem:[#allocation17_spill] sm:$0xff] %v5507_v55  ;;  %v6672_v55 = vunpack.i.l.bf16 %v5034_v47 }
 0x48b   :  { %6668 = vst [vmem:[#allocation38_spill] sm:$0xff] %v5514_v37 }
 0x48d   :  { %v5486_v1 = vpop.permute.xlu2 %3321 }
 0x48e   :  { %6666 = vst [vmem:[#allocation19_spill] sm:$0xff] %v5486_v1 }
 0x491   :  { %v5558_v47 = vpop.f32.mrf.mxu1 }
 0x492   :  { %6675 = vst [vmem:[#allocation9_spill] sm:$0xff] %v5558_v47 }
 0x495   :  { %v5490_v57 = vpop.permute.xlu2 %3336 }
 0x49c   :  { %v5493_v48 = vpop.permute.xlu1 %3251  ;;  %v5495_v25 = vpop.permute.xlu0 %3371 }
 0x49d   :  { %v3253_v2 = vunpack.i.l.bf16 %v5493_v48  ;;  %v5498_v3 = vpop.permute.xlu2 %789 }
 0x49f   :  { %v2018_v56 = vsel %vm1922_vm3, %v5503_v20, %v3253_v2 }
 0x4a0   :  { %v5512_v11 = vsel %vm1955_vm4, %v2018_v56, %v6514_v61  ;;  %v6671_v61 = vld [vmem:[#allocation32_spill] sm:$0xff] }
 0x4a1   :  { %v5530_v37 = vsel %vm1889_vm2, %v6671_v61, %v3258_v29  ;;  %v6673_v29 = vunpack.i.l.bf16 %v5490_v57 }
 0x4a4   :  { %v5518_v17 = vpop.permute.xlu1 %3301  ;;  %v5520_v5 = vpop.permute.xlu0 %795 }
 0x4a5   :  { %6669 = vst [vmem:[#allocation16_spill] sm:$0xff] %v5518_v17  ;;  %v3304_v63 = vunpack.i.h.bf16 %v5518_v17  ;;  %v6520_v2 = vunpack.i.l.bf16 %v5518_v17  ;;  %v5524_v52 = vpop.permute.xlu2 %3346 }
 0x4a6   :  { %6670 = vst [vmem:[#allocation5_spill] sm:$0xff] %v5520_v5  ;;  %v3349_v56 = vunpack.i.h.bf16 %v5524_v52 }
 0x4a7   :  { %v1935_v46 = vsel %vm1922_vm3, %v5040_v60, %v3304_v63  ;;  %v2014_v5 = vsel %vm1922_vm3, %v5530_v37, %v6520_v2  ;;  %v3324_v60 = vunpack.i.h.bf16 %v5486_v1  ;;  %v5551_v63 = vpop.f32.mrf.mxu3 }
 0x4a8   :  { %v5542_v22 = vmax.f32 %v5358_v39, %v3349_v56  ;;  %v1968_v7 = vsel %vm1955_vm4, %v1935_v46, %v6672_v55  ;;  %v2046_v61 = vsel %vm1955_vm4, %v2014_v5, %v6673_v29  ;;  %v1290_v46 = vmax.f32 %v5128_v12, %v1132_v14 }
 0x4a9   :  { %2224 = vmatmul.f32.gmra.mxu1 %v1968_v7  ;;  %2337 = vmatmul.f32.gmra.mxu2 %v2046_v61  ;;  %v6521_v55 = vunpack.i.l.bf16 %v5486_v1  ;;  %v6522_v5 = vunpack.i.h.bf16 %v5490_v57  ;;  %v1936_v29 = vsel %vm1922_vm3, %v5067_v28, %v3324_v60  ;;  %v6676_v61 = vld [vmem:[#allocation33_spill] sm:$0xff] }
 0x4aa   :  { %v3375_v39 = vpack.i.bf16 %v5539_v16, %v5542_v22  ;;  %v5571_v2 = vsel %vm1889_vm2, %v6676_v61, %v3259_v26  ;;  %v5573_v47 = vmax.f32 %v1290_v46, 0.0  ;;  %v3328_v26 = vunpack.i.l.bf16 %v5412_v23  ;;  %v5609_v61 = vpop.f32.mrf.mxu2 }
 0x4ab   :  { %v2015_v14 = vsel %vm1922_vm3, %v5571_v2, %v6521_v55  ;;  %v3343_v46 = vunpack.i.l.bf16 %v5439_v43  ;;  %6681 = vst [vmem:[#allocation28_spill] sm:$0xff] %v5609_v61  ;;  %v3263_v61 = vunpack.i.l.bf16 %v5316_v50 }
 0x4ac   :  { %3376 = vrot.lane.b32.xlu2 %v3375_v39, %s3504_s20  ;;  %v1130_v7 = vpop.permute.xlu1 %1129  ;;  %v5564_v56 = vpop.permute.xlu0 %1147  ;;  %6677 = vst [vmem:[#allocation7_spill] sm:$0xff] %v5573_v47  ;;  %v6679_v39 = vunpack.i.l.bf16 %v4846_v31  ;;  %v2047_v28 = vsel %vm1955_vm4, %v2015_v14, %v6522_v5  ;;  %v5596_v31 = vpack.i.bf16 %v5377_v30, %v5352_v42 }
 0x4ad   :  { %v1289_v53 = vmax.f32 %v5309_v24, %v1130_v7 }
 0x4ae   :  { %v1969_v24 = vsel %vm1955_vm4, %v1936_v29, %v6679_v39  ;;  %v5612_v39 = vpop.f32.mrf.mxu1 }
 0x4af   :  { %v5575_v12 = vmax.f32 %v1289_v53, 0.0  ;;  %v5607_v29 = vpop.f32.mrf.mxu3  ;;  %6682 = vst [vmem:[#allocation30_spill] sm:$0xff] %v5612_v39 }
 0x4b0   :  { %6680 = vst [vmem:[#allocation3_spill] sm:$0xff] %v5607_v29  ;;  %v3415_v29 = vpack.i.bf16 %v6623_v62, %v5377_v30  ;;  %v3264_v62 = vunpack.i.h.bf16 %v5316_v50  ;;  %v3348_v30 = vunpack.i.l.bf16 %v5524_v52  ;;  %v6688_v52 = vunpack.i.l.bf16 %v5024_v35 }
 0x4b1   :  { %6678 = vst [vmem:[#allocation20_spill] sm:$0xff] %v5575_v12  ;;  %2227 = vmatmul.f32.gmra.mxu1 %v1969_v24  ;;  %2340 = vmatmul.f32.gmra.mxu2 %v2047_v28  ;;  %v5589_v60 = vpack.i.bf16 %v5573_v47, %v5575_v12  ;;  %v6683_v24 = vld [vmem:[#allocation2_spill] sm:$0xff]  ;;  %v5671_v35 = vmax.f32 %v5277_v54, %v5474_v21  ;;  %v3354_v54 = vunpack.i.h.bf16 %v5466_v34  ;;  %v6691_v21 = vunpack.i.l.bf16 %v5142_v0 }
 0x4b2   :  { %2895 = vmatmul.msk.f32.gmra.mxu3 %vm1889_vm2, %v5575_v12  ;;  %v5616_v28 = vsel %vm1889_vm2, %v6683_v24, %v3328_v26  ;;  %v3390_v26 = vpack.i.bf16 %v6685_v13, %v5325_v58  ;;  %v5643_v1 = vpop.f32.mrf.mxu2  ;;  %v5700_v34 = vmax.f32 %v5330_v32, %v5498_v3 }
 0x4b3   :  { %3411 = vrot.lane.b32.xlu1 %v5589_v60, %s3503_s28  ;;  %v1950_v55 = vsel %vm1922_vm3, %v5616_v28, %v3343_v46 }
 0x4b4   :  { %3386 = vrot.lane.b32.xlu2 %v5596_v31, %s3503_s28  ;;  %v5603_v7 = vpop.permute.xlu0 %3401  ;;  %v5605_v53 = vpop.permute.xlu1 %3316 }
 0x4b5   :  { %v6524_v14 = vunpack.i.l.bf16 %v5605_v53 }
 0x4b7   :  { %v5623_v5 = vsel %vm1955_vm4, %v1950_v55, %v6524_v14 }
 0x4b8   :  { %6684 = vst [vmem:[#allocation31_spill] sm:$0xff] %v5623_v5  ;;  %v5641_v5 = vpop.f32.mrf.mxu3 }
 0x4b9   :  { %6686 = vst [vmem:[#allocation32_spill] sm:$0xff] %v5641_v5  ;;  %v6689_v5 = vunpack.i.l.bf16 %v5490_v57 }
 0x4ba   :  { %2896 = vmatmul.msk.f32.gmra.mxu3 %vm1889_vm2, %v5573_v47  ;;  %v1990_v47 = vsel %vm1889_vm2, %v6652_v9, %v3263_v61 }
 0x4bb   :  { %3416 = vrot.lane.b32.xlu1 %v3415_v29, %s3504_s20 }
 0x4bc   :  { %3391 = vrot.lane.b32.xlu2 %v3390_v26, %s3504_s20  ;;  %v5634_v39 = vpop.permute.xlu0 %3406  ;;  %v3332_v12 = vpop.permute.xlu1 %3331 }
 0x4bd   :  { %v3409_v55 = vunpack.i.h.bf16 %v5634_v39  ;;  %v3334_v14 = vunpack.i.h.bf16 %v3332_v12  ;;  %v3333_v42 = vunpack.i.l.bf16 %v3332_v12  ;;  %v5652_v12 = vpop.f32.mrf.mxu1 }
 0x4be   :  { %6687 = vst [vmem:[#allocation33_spill] sm:$0xff] %v5652_v12 }
 0x4bf   :  { %v1937_v29 = vsel %vm1922_vm3, %v5096_v44, %v3334_v14  ;;  %v2016_v26 = vsel %vm1922_vm3, %v1990_v47, %v3333_v42  ;;  %v1945_v17 = vsel %vm1922_vm3, %v5530_v37, %v3409_v55  ;;  %v1949_v50 = vsel %vm1922_vm3, %v5503_v20, %v3333_v42  ;;  %v5677_v20 = vpop.permute.xlu2 %3356 }
 0x4c0   :  { %v1970_v9 = vsel %vm1955_vm4, %v1937_v29, %v6688_v52  ;;  %v2048_v61 = vsel %vm1955_vm4, %v2016_v26, %v3348_v30  ;;  %v5661_v44 = vsel %vm1955_vm4, %v1945_v17, %v6689_v5  ;;  %v6690_v47 = vunpack.i.l.bf16 %v5409_v6  ;;  %v5692_v55 = vpop.f32.mrf.mxu3 }
 0x4c1   :  { %v3344_v42 = vunpack.i.h.bf16 %v5439_v43  ;;  %2230 = vmatmul.f32.gmra.mxu1 %v1970_v9  ;;  %2343 = vmatmul.f32.gmra.mxu2 %v2048_v61  ;;  %v1991_v30 = vsel %vm1889_vm2, %v6685_v13, %v3264_v62  ;;  %v3373_v62 = vunpack.i.l.bf16 %v5495_v25  ;;  %v3329_v26 = vunpack.i.h.bf16 %v5412_v23 }
 0x4c2   :  { %v5666_v37 = vsel %vm1955_vm4, %v1949_v50, %v6690_v47  ;;  %v2017_v5 = vsel %vm1922_vm3, %v1991_v30, %v3343_v46  ;;  %v3420_v46 = vpack.i.bf16 %v6631_v33, %v5303_v59  ;;  %v3254_v52 = vunpack.i.h.bf16 %v5493_v48  ;;  %v6695_v48 = vld [vmem:[#allocation15_spill] sm:$0xff] }
 0x4c3   :  { %v1938_v43 = vsel %vm1922_vm3, %v5150_v51, %v3344_v42  ;;  %v2049_v14 = vsel %vm1955_vm4, %v2017_v5, %v3354_v54  ;;  %v5714_v32 = vmax.f32 %v5263_v40, %v3373_v62  ;;  %v3319_v23 = vunpack.i.h.bf16 %v5605_v53 }
 0x4c4   :  { %1133 = vrot.lane.b32.xlu2 %v5671_v35, %s3504_s20  ;;  %v776_v17 = vpop.permute.xlu1 %775  ;;  %v1971_v13 = vsel %vm1955_vm4, %v1938_v43, %v6691_v21  ;;  %v6696_v47 = vunpack.i.l.bf16 %v6695_v48  ;;  %v2019_v30 = vsel %vm1922_vm3, %v5616_v28, %v3254_v52  ;;  %v6697_v5 = vunpack.i.l.bf16 %v5605_v53 }
 0x4c5   :  { %v5680_v6 = vmax.f32 %v5383_v15, %v776_v17  ;;  %v5694_v15 = vpop.f32.mrf.mxu2  ;;  %v5696_v51 = vpop.f32.mrf.mxu1  ;;  %v6532_v61 = vmax.f32 %v5714_v32, 0.0  ;;  %v3358_v17 = vunpack.i.l.bf16 %v5677_v20  ;;  %v6698_v54 = vmax.f32 %v5253_v27, 0.0 }
 0x4c6   :  { %6692 = vst [vmem:[#allocation2_spill] sm:$0xff] %v5694_v15  ;;  %v6716_v15 = vld [vmem:[#allocation25_spill] sm:$0xff] }
 0x4c7   :  { %1135 = vrot.lane.b32.xlu0 %v5680_v6, %s3504_s20  ;;  %v792_v29 = vpop.permute.xlu2 %791  ;;  %v3430_v21 = vpack.i.bf16 %v6698_v54, %v6532_v61  ;;  %v5759_v53 = vsel %vm1889_vm2, %v4967_v10, %v3358_v17 }
 0x4c8   :  { %v5717_v3 = vmax.f32 %v5390_v4, %v792_v29  ;;  %v5719_v50 = vpop.f32.mrf.mxu3  ;;  %v6699_v29 = vld [vmem:[#allocation37_spill] sm:$0xff] }
 0x4c9   :  { %2233 = vmatmul.f32.gmra.mxu1 %v1971_v13  ;;  %2346 = vmatmul.f32.gmra.mxu2 %v2049_v14  ;;  %6693 = vst [vmem:[#allocation12_spill] sm:$0xff] %v5719_v50 }
 0x4cc   :  { %1149 = vrot.lane.b32.xlu2 %v5700_v34, %s3504_s20  ;;  %v5704_v0 = vpop.permute.xlu1 %3366 }
 0x4cd   :  { %v5721_v33 = vpop.f32.mrf.mxu2  ;;  %v5724_v9 = vpop.f32.mrf.mxu1  ;;  %v6531_v28 = vunpack.i.l.bf16 %v5704_v0 }
 0x4cf   :  { %3421 = vrot.lane.b32.xlu0 %v3420_v46, %s3505_s22  ;;  %v3363_v46 = vunpack.i.l.bf16 %v5488_v45 }
 0x4d0   :  { %v5751_v13 = vpop.f32.mrf.mxu3 }
 0x4d1   :  { %2236 = vmatmul.f32.gmra.mxu1 %v5418_v8  ;;  %2349 = vmatmul.f32.gmra.mxu2 %v5512_v11  ;;  %v6694_v11 = vld [vmem:[#allocation26_spill] sm:$0xff] }
 0x4d2   :  { %v1907_v40 = vsel %vm1889_vm2, %v6694_v11, %v3329_v26  ;;  %v6700_v26 = vunpack.i.l.bf16 %v6699_v29  ;;  %v6701_v11 = vunpack.i.l.bf16 %v5222_v49  ;;  %v6706_v29 = vld [vmem:[#allocation11_spill] sm:$0xff] }
 0x4d3   :  { %v1940_v42 = vsel %vm1922_vm3, %v1907_v40, %v6696_v47  ;;  %v6530_v47 = vunpack.i.h.bf16 %v5704_v0 }
 0x4d4   :  { %1151 = vrot.lane.b32.xlu2 %v5717_v3, %s3504_s20  ;;  %v794_v8 = vpop.permute.xlu1 %793  ;;  %v1973_v43 = vsel %vm1955_vm4, %v1940_v42, %v3319_v23  ;;  %v1941_v27 = vsel %vm1922_vm3, %v5350_v38, %v6700_v26  ;;  %v2020_v23 = vsel %vm1922_vm3, %v5759_v53, %v3363_v46  ;;  %v3435_v38 = vpack.i.bf16 %v6683_v24, %v5325_v58  ;;  %v6702_v42 = vld [vmem:[#allocation39_spill] sm:$0xff] }
 0x4d5   :  { %v5732_v4 = vmax.f32 %v5399_v18, %v794_v8  ;;  %v2051_v18 = vsel %vm1955_vm4, %v2019_v30, %v6697_v5  ;;  %v5753_v14 = vpop.f32.mrf.mxu2  ;;  %v5768_v52 = vpop.f32.mrf.mxu1  ;;  %v3359_v8 = vunpack.i.h.bf16 %v5677_v20  ;;  %v1974_v10 = vsel %vm1955_vm4, %v1941_v27, %v6701_v11 }
 0x4d6   :  { %v2052_v40 = vsel %vm1955_vm4, %v2020_v23, %v6531_v28  ;;  %v3374_v20 = vunpack.i.h.bf16 %v5495_v25  ;;  %v6703_v30 = vunpack.i.l.bf16 %v6702_v42  ;;  %v6705_v25 = vunpack.i.l.bf16 %v5236_v19  ;;  %v6707_v23 = vld [vmem:[#allocation4_spill] sm:$0xff]  ;;  %v6708_v19 = vld [vmem:[#allocation35_spill] sm:$0xff] }
 0x4d7   :  { %1153 = vrot.lane.b32.xlu0 %v5732_v4, %s3504_s20  ;;  %v5787_v49 = vsel %vm1889_vm2, %v4990_v36, %v3359_v8  ;;  %v3502_v36 = vld [vmem:[%s6403_s2] ss:$0 sm:$0xff] }
 0x4d8   :  { %v1942_v17 = vsel %vm1922_vm3, %v5434_v41, %v6703_v30  ;;  %v5804_v54 = vadd.f32 %v3502_v36, %v5551_v63  ;;  %v1298_v63 = vmax.f32 %v6707_v23, %v5564_v56 }
 0x4d9   :  { %2239 = vmatmul.f32.gmra.mxu1 %v1973_v43  ;;  %2352 = vmatmul.f32.gmra.mxu2 %v2051_v18  ;;  %v5794_v43 = vpop.f32.mrf.mxu3  ;;  %v2021_v18 = vsel %vm1922_vm3, %v5787_v49, %v3374_v20  ;;  %v6709_v20 = vld [vmem:[#allocation18_spill] sm:$0xff] }
 0x4da   :  { %6704 = vst [vmem:[#allocation26_spill] sm:$0xff] %v5794_v43  ;;  %v2053_v41 = vsel %vm1955_vm4, %v2021_v18, %v6530_v47  ;;  %v6710_v42 = vunpack.i.l.bf16 %v6709_v20 }
 0x4dc   :  { %3431 = vrot.lane.b32.xlu2 %v3430_v21, %s3503_s28  ;;  %v5762_v62 = vpop.permute.xlu1 %3381  ;;  %v1975_v21 = vsel %vm1955_vm4, %v1942_v17, %v6705_v25 }
 0x4dd   :  { %v5781_v48 = vpop.f32.mrf.mxu2  ;;  %v5796_v24 = vpop.f32.mrf.mxu1  ;;  %v3384_v46 = vunpack.i.h.bf16 %v5762_v62 }
 0x4df   :  { %v1943_v8 = vsel %vm1922_vm3, %v6708_v19, %v3384_v46  ;;  %v3364_v46 = vunpack.i.h.bf16 %v5488_v45  ;;  %v3403_v45 = vunpack.i.l.bf16 %v5603_v7 }
 0x4e0   :  { %v1976_v30 = vsel %vm1955_vm4, %v1943_v8, %v6710_v42 }
 0x4e1   :  { %2242 = vmatmul.f32.gmra.mxu1 %v1974_v10  ;;  %2355 = vmatmul.f32.gmra.mxu2 %v2052_v40  ;;  %v5826_v40 = vpop.f32.mrf.mxu3 }
 0x4e4   :  { %3436 = vrot.lane.b32.xlu2 %v3435_v38, %s3505_s22  ;;  %v1146_v5 = vpop.permute.xlu1 %1145  ;;  %v5828_v38 = vmax.f32 %v1298_v63, 0.0 }
 0x4e5   :  { %v1297_v26 = vmax.f32 %v6706_v29, %v1146_v5  ;;  %v5814_v27 = vpop.f32.mrf.mxu2  ;;  %v5822_v11 = vpop.f32.mrf.mxu1 }
 0x4e7   :  { %v5824_v10 = vmax.f32 %v1297_v26, 0.0  ;;  %v6714_v26 = vld [vmem:[#allocation13_spill] sm:$0xff] }
 0x4e8   :  { %v1293_v23 = vmax.f32 %v6714_v26, %v3364_v46 }
 0x4e9   :  { %2245 = vmatmul.f32.gmra.mxu1 %v1975_v21  ;;  %2358 = vmatmul.f32.gmra.mxu2 %v2053_v41  ;;  %v3455_v56 = vpack.i.bf16 %v5828_v38, %v5824_v10  ;;  %v5840_v18 = vpop.f32.mrf.mxu3 }
 0x4ea   :  { %6712 = vst [vmem:[#allocation37_spill] sm:$0xff] %v5840_v18  ;;  %v1365_v28 = vmax.f32 %v1293_v23, 0.0 }
 0x4ec   :  { %799 = vrot.lane.b32.xlu2 %v5804_v54, %s3503_s28 }
 0x4ed   :  { %v5835_v17 = vpop.f32.mrf.mxu2 }
 0x4f1   :  { %2248 = vmatmul.f32.gmra.mxu1 %v1976_v30  ;;  %v5846_v41 = vpop.f32.mrf.mxu3  ;;  %v5855_v30 = vld [vmem:[%s6406_s4] ss:$0 sm:$0xff] }
 0x4f4   :  { %3456 = vrot.lane.b32.xlu2 %v3455_v56, %s3503_s28 }
 0x4f6   :  { %v5838_v5 = vpop.f32.mrf.mxu1 }
 0x4f7   :  { %6711 = vst [vmem:[#allocation15_spill] sm:$0xff] %v5838_v5  ;;  %v6717_v5 = vmax.f32 %v6716_v15, 0.0 }
 0x4f9   :  { %v5861_v26 = vpop.f32.mrf.mxu3 }
 0x4fa   :  { %6715 = vst [vmem:[#allocation11_spill] sm:$0xff] %v5861_v26 }
 0x4fc   :  { %v5842_v25 = vpop.f32.mrf.mxu2 }
 0x4fd   :  { %6713 = vst [vmem:[#allocation39_spill] sm:$0xff] %v5842_v25 }
 0x4fe   :  { %v5844_v21 = vpop.f32.mrf.mxu1 }
 0x504   :  { %v5849_v29 = vpop.f32.mrf.mxu2 }
 0x506   :  { %v3377_v63 = vpop.permute.xlu2 %3376  ;;  %v2222_v42 = vpop.f32.mrf.mxu1 }
 0x507   :  { %v3379_v19 = vunpack.i.h.bf16 %v3377_v63  ;;  %v3378_v8 = vunpack.i.l.bf16 %v3377_v63  ;;  %v2223_v46 = vadd.f32 %v5855_v30, %v2222_v42  ;;  %v3383_v63 = vunpack.i.l.bf16 %v5762_v62  ;;  %v6720_v42 = vld [vmem:[#allocation41_spill] sm:$0xff] }
 0x509   :  { %v1296_v56 = vmax.f32 %v5539_v16, %v3379_v19  ;;  %v1294_v47 = vmax.f32 %v5542_v22, %v3378_v8 }
 0x50b   :  { %v1368_v61 = vmax.f32 %v1296_v56, 0.0  ;;  %v1366_v50 = vmax.f32 %v1294_v47, 0.0  ;;  %v6718_v47 = vld [vmem:[#allocation40_spill] sm:$0xff] }
 0x50c   :  { %v2335_v25 = vpop.f32.mrf.mxu2  ;;  %v5875_v23 = vsel %vm1889_vm2, %v6718_v47, %v3403_v45  ;;  %v6723_v47 = vld [vmem:[#allocation5_spill] sm:$0xff] }
 0x50d   :  { %v3440_v12 = vpack.i.bf16 %v6717_v5, %v1368_v61  ;;  %v3425_v43 = vpack.i.bf16 %v1366_v50, %v1365_v28  ;;  %v5866_v18 = vadd.f32 %v2335_v25, %v2223_v46  ;;  %v2022_v62 = vsel %vm1922_vm3, %v5875_v23, %v3383_v63  ;;  %v6719_v50 = vld [vmem:[#allocation17_spill] sm:$0xff] }
 0x50e   :  { %v5868_v16 = vpop.permute.xlu2 %3386  ;;  %v5883_v28 = vadd.f32 %v3502_v36, %v6719_v50  ;;  %v3404_v5 = vunpack.i.h.bf16 %v5603_v7  ;;  %v6721_v36 = vld [vmem:[#allocation8_spill] sm:$0xff]  ;;  %v6722_v46 = vunpack.i.h.bf16 %v6709_v20  ;;  %v3397_v50 = vpop.permute.xlu1 %3396 }
 0x50f   :  { %v6534_v22 = vunpack.i.l.bf16 %v5868_v16  ;;  %3441 = vrot.lane.b32.xlu0 %v3440_v12, %s3503_s28  ;;  %3426 = vrot.lane.b32.xlu1 %v3425_v43, %s3504_s20  ;;  %v5886_v12 = vpop.f32.mrf.mxu3  ;;  %v6533_v8 = vunpack.i.h.bf16 %v5868_v16 }
 0x510   :  { %v5895_v56 = vsel %vm1889_vm2, %v6720_v42, %v3404_v5  ;;  %v6725_v42 = vld [vmem:[#allocation42_spill] sm:$0xff] }
 0x511   :  { %v2054_v15 = vsel %vm1955_vm4, %v2022_v62, %v6534_v22  ;;  %v6724_v62 = vld [vmem:[#allocation34_spill] sm:$0xff] }
 0x512   :  { %2361 = vmatmul.f32.gmra.mxu2 %v2054_v15  ;;  %v5909_v15 = vmax.f32 %v6724_v62, %v6723_v47 }
 0x516   :  { %v3392_v43 = vpop.permute.xlu2 %3391 }
 0x517   :  { %v3394_v25 = vunpack.i.h.bf16 %v3392_v43  ;;  %v3393_v19 = vunpack.i.l.bf16 %v3392_v43  ;;  %3446 = vrot.lane.b32.xlu0 %v5596_v31, %s3505_s22  ;;  %797 = vrot.lane.b32.xlu1 %v5883_v28, %s3503_s28  ;;  %v5916_v20 = vpop.f32.mrf.mxu3 }
 0x519   :  { %v1944_v7 = vsel %vm1922_vm3, %v6721_v36, %v3394_v25  ;;  %v2023_v45 = vsel %vm1922_vm3, %v5895_v56, %v3393_v19  ;;  %v3398_v25 = vunpack.i.l.bf16 %v3397_v50 }
 0x51a   :  { %v1977_v63 = vsel %vm1955_vm4, %v1944_v7, %v6722_v46  ;;  %v2055_v31 = vsel %vm1955_vm4, %v2023_v45, %v6533_v8  ;;  %v6726_v7 = vld [vmem:[#allocation22_spill] sm:$0xff]  ;;  %v3408_v45 = vunpack.i.l.bf16 %v5634_v39 }
 0x51b   :  { %2251 = vmatmul.f32.gmra.mxu1 %v1977_v63  ;;  %2364 = vmatmul.f32.gmra.mxu2 %v2055_v31  ;;  %v1992_v36 = vsel %vm1889_vm2, %v6725_v42, %v3398_v25  ;;  %v6728_v8 = vld [vmem:[#allocation6_spill] sm:$0xff] }
 0x51e   :  { %v1134_v5 = vpop.permute.xlu2 %1133 }
 0x51f   :  { %v1291_v43 = vmax.f32 %v5671_v35, %v1134_v5  ;;  %3461 = vrot.lane.b32.xlu0 %v5589_v60, %s3505_s22  ;;  %1155 = vrot.lane.b32.xlu1 %v5909_v15, %s3504_s20  ;;  %v3480_v35 = vpack.i.bf16 %v6726_v7, %v5828_v38  ;;  %v6727_v60 = vmax.f32 %v5714_v32, 0.0  ;;  %v2451_v39 = vpop.f32.mrf.mxu3  ;;  %v3399_v32 = vunpack.i.h.bf16 %v3397_v50 }
 0x521   :  { %v1363_v19 = vmax.f32 %v1291_v43, 0.0  ;;  %v3450_v46 = vpack.i.bf16 %v1368_v61, %v6727_v60  ;;  %v3465_v60 = vpack.i.bf16 %v6725_v42, %v5824_v10  ;;  %v1993_v50 = vsel %vm1889_vm2, %v6726_v7, %v3399_v32 }
 0x523   :  { %2254 = vmatmul.f32.gmra.mxu1 %v5661_v44  ;;  %2897 = vmatmul.msk.f32.gmra.mxu3 %vm1889_vm2, %v1363_v19  ;;  %v2024_v44 = vsel %vm1922_vm3, %v1992_v36, %v3408_v45 }
 0x525   :  { %v3412_v63 = vpop.permute.xlu1 %3411 }
 0x526   :  { %v3413_v31 = vunpack.i.l.bf16 %v3412_v63  ;;  %v1150_v47 = vpop.permute.xlu2 %1149  ;;  %v2225_v62 = vpop.f32.mrf.mxu1  ;;  %v3414_v26 = vunpack.i.h.bf16 %v3412_v63 }
 0x527   :  { %v1299_v5 = vmax.f32 %v5700_v34, %v1150_v47  ;;  %3481 = vrot.lane.b32.xlu0 %v3480_v35, %s3504_s20  ;;  %3451 = vrot.lane.b32.xlu1 %v3450_v46, %s3504_s20 }
 0x528   :  { %v2056_v43 = vsel %vm1955_vm4, %v2024_v44, %v3413_v31 }
 0x529   :  { %v5932_v25 = vmax.f32 %v1299_v5, 0.0  ;;  %2367 = vmatmul.f32.gmra.mxu2 %v2056_v43  ;;  %v6729_v5 = vunpack.i.h.bf16 %v5490_v57  ;;  %v2454_v43 = vpop.f32.mrf.mxu3 }
 0x52b   :  { %v3485_v34 = vpack.i.bf16 %v6728_v8, %v5932_v25 }
 0x52c   :  { %v2338_v61 = vpop.f32.mrf.mxu2 }
 0x52d   :  { %v3417_v47 = vpop.permute.xlu1 %3416 }
 0x52e   :  { %v3419_v35 = vunpack.i.h.bf16 %v3417_v47  ;;  %v3418_v22 = vunpack.i.l.bf16 %v3417_v47  ;;  %v1152_v46 = vpop.permute.xlu2 %1151  ;;  %v2228_v45 = vpop.f32.mrf.mxu1 }
 0x52f   :  { %v1300_v36 = vmax.f32 %v5717_v3, %v1152_v46  ;;  %3486 = vrot.lane.b32.xlu0 %v3485_v34, %s3504_s20  ;;  %3466 = vrot.lane.b32.xlu1 %v3465_v60, %s3504_s20  ;;  %v2229_v7 = vadd.f32 %v5855_v30, %v2228_v45  ;;  %v2202_v46 = vadd.f32 %v5855_v30, %v5696_v51 }
 0x530   :  { %v1946_v42 = vsel %vm1922_vm3, %v5571_v2, %v3419_v35  ;;  %v2025_v8 = vsel %vm1922_vm3, %v1993_v50, %v3418_v22  ;;  %v2208_v35 = vadd.f32 %v5855_v30, %v5768_v52  ;;  %v2226_v50 = vadd.f32 %v5855_v30, %v2225_v62 }
 0x531   :  { %v5946_v31 = vmax.f32 %v1300_v36, 0.0  ;;  %v1979_v63 = vsel %vm1955_vm4, %v1946_v42, %v6729_v5  ;;  %v2057_v3 = vsel %vm1955_vm4, %v2025_v8, %v3414_v26  ;;  %v2457_v26 = vpop.f32.mrf.mxu3  ;;  %v2315_v42 = vadd.f32 %v5721_v33, %v2202_v46 }
 0x532   :  { %2257 = vmatmul.f32.gmra.mxu1 %v1979_v63  ;;  %2370 = vmatmul.f32.gmra.mxu2 %v2057_v3  ;;  %v2321_v36 = vadd.f32 %v5781_v48, %v2208_v35  ;;  %v2339_v8 = vadd.f32 %v2338_v61, %v2226_v50  ;;  %v6730_v3 = vld [vmem:[#allocation10_spill] sm:$0xff] }
 0x533   :  { %v3470_v44 = vpack.i.bf16 %v5946_v31, %v5932_v25  ;;  %v2428_v61 = vadd.f32 %v5751_v13, %v2315_v42 }
 0x534   :  { %v2341_v32 = vpop.f32.mrf.mxu2  ;;  %v2434_v48 = vadd.f32 %v5826_v40, %v2321_v36 }
 0x535   :  { %3471 = vrot.lane.b32.xlu2 %v3470_v44, %s3503_s28  ;;  %v2342_v2 = vadd.f32 %v2341_v32, %v2229_v7  ;;  %v6731_v44 = vld [vmem:[#allocation16_spill] sm:$0xff] }
 0x536   :  { %v5967_v45 = vpop.permute.xlu2 %3431  ;;  %v6732_v7 = vunpack.i.l.bf16 %v6731_v44 }
 0x537   :  { %1819 = vrot.lane.b32.xlu0 %v5946_v31, %s3504_s20  ;;  %v3434_v5 = vunpack.i.h.bf16 %v5967_v45 }
 0x539   :  { %v1136_v57 = vpop.permute.xlu0 %1135 }
 0x53a   :  { %v1292_v22 = vmax.f32 %v5680_v6, %v1136_v57  ;;  %v2460_v57 = vpop.f32.mrf.mxu3 }
 0x53c   :  { %v1364_v60 = vmax.f32 %v1292_v22, 0.0 }
 0x53e   :  { %v3475_v34 = vpack.i.bf16 %v1364_v60, %v1363_v19  ;;  %v2231_v47 = vpop.f32.mrf.mxu1  ;;  %2898 = vmatmul.msk.f32.gmra.mxu3 %vm1889_vm2, %v1364_v60  ;;  %v2452_v60 = vadd.f32 %v2451_v39, %v2339_v8 }
 0x53f   :  { %v2232_v52 = vadd.f32 %v5855_v30, %v2231_v47  ;;  %v2517_v47 = vmax.f32 %v2428_v61, %v2434_v48 }
 0x540   :  { %3476 = vrot.lane.b32.xlu1 %v3475_v34, %s3505_s22 }
 0x541   :  { %v5969_v6 = vpop.permute.xlu0 %3421 }
 0x542   :  { %v3424_v19 = vunpack.i.h.bf16 %v5969_v6 }
 0x544   :  { %v2344_v63 = vpop.f32.mrf.mxu2  ;;  %v1914_v51 = vsel %vm1889_vm2, %v6730_v3, %v3424_v19 }
 0x545   :  { %v2345_v62 = vadd.f32 %v2344_v63, %v2232_v52  ;;  %v1947_v32 = vsel %vm1922_vm3, %v1914_v51, %v6732_v7 }
 0x546   :  { %v2234_v22 = vpop.f32.mrf.mxu1  ;;  %2899 = vmatmul.msk.f32.gmra.mxu3 %vm1889_vm2, %v5824_v10  ;;  %v1980_v33 = vsel %vm1955_vm4, %v1947_v32, %v3434_v5  ;;  %v5991_v10 = vadd.f32 %v2454_v43, %v2342_v2 }
 0x547   :  { %v2458_v34 = vadd.f32 %v2457_v26, %v2345_v62  ;;  %2260 = vmatmul.f32.gmra.mxu1 %v1980_v33  ;;  %v2235_v50 = vadd.f32 %v5855_v30, %v2234_v22  ;;  %v2463_v26 = vpop.f32.mrf.mxu3 }
 0x549   :  { %v2519_v35 = vmax.f32 %v2452_v60, %v2458_v34  ;;  %v1154_v40 = vpop.permute.xlu0 %1153 }
 0x54a   :  { %v1301_v46 = vmax.f32 %v5732_v4, %v1154_v40 }
 0x54b   :  { %v2521_v36 = vmax.f32 %v2517_v47, %v2519_v35 }
 0x54c   :  { %v1373_v19 = vmax.f32 %v1301_v46, 0.0  ;;  %v2347_v52 = vpop.f32.mrf.mxu2  ;;  %v3437_v46 = vpop.permute.xlu2 %3436 }
 0x54d   :  { %v2348_v63 = vadd.f32 %v2347_v52, %v2235_v50  ;;  %2537 = vrot.lane.b32.xlu0 %v2521_v36, %s3504_s20  ;;  %v3439_v36 = vunpack.i.h.bf16 %v3437_v46  ;;  %v3423_v50 = vunpack.i.l.bf16 %v5969_v6 }
 0x54e   :  { %2900 = vmatmul.msk.f32.gmra.mxu3 %vm1889_vm2, %v5828_v38  ;;  %1871 = vrot.lane.b32.xlu1 %v1373_v19, %s3503_s28  ;;  %v2237_v13 = vpop.f32.mrf.mxu1 }
 0x54f   :  { %v5993_v39 = vadd.f32 %v2460_v57, %v2348_v63  ;;  %v2238_v42 = vadd.f32 %v5855_v30, %v2237_v13  ;;  %v2466_v38 = vpop.f32.mrf.mxu3 }
 0x551   :  { %v2520_v4 = vmax.f32 %v5991_v10, %v5993_v39  ;;  %v2652_v10 = vld [vmem:[%s6409_s7 + $0x48] sm:$0xff]  ;;  %v2578_v39 = vld [vmem:[%s6407_s5 + $0x98] sm:$0xff] }
 0x554   :  { %v2350_v8 = vpop.f32.mrf.mxu2 }
 0x555   :  { %v2351_v5 = vadd.f32 %v2350_v8, %v2238_v42  ;;  %v3433_v8 = vunpack.i.l.bf16 %v5967_v45  ;;  %v6737_v45 = vld [vmem:[#allocation24_spill] sm:$0xff] }
 0x556   :  { %v2240_v3 = vpop.f32.mrf.mxu1  ;;  %2901 = vmatmul.msk.f32.gmra.mxu3 %vm1889_vm2, %v5932_v25 }
 0x557   :  { %v2241_v51 = vadd.f32 %v5855_v30, %v2240_v3  ;;  %v2469_v44 = vpop.f32.mrf.mxu3  ;;  %v6005_v57 = vadd.f32 %v2463_v26, %v2351_v5  ;;  %v6734_v5 = vld [vmem:[#allocation19_spill] sm:$0xff] }
 0x558   :  { %v6735_v3 = vunpack.i.l.bf16 %v6734_v5 }
 0x55c   :  { %v2353_v48 = vpop.f32.mrf.mxu2 }
 0x55d   :  { %v2354_v43 = vadd.f32 %v2353_v48, %v2241_v51  ;;  %v6736_v51 = vld [vmem:[#allocation21_spill] sm:$0xff] }
 0x55e   :  { %v2243_v2 = vpop.f32.mrf.mxu1  ;;  %2902 = vmatmul.msk.f32.gmra.mxu3 %vm1889_vm2, %v5946_v31  ;;  %v1994_v48 = vsel %vm1889_vm2, %v6736_v51, %v3423_v50 }
 0x55f   :  { %v2244_v62 = vadd.f32 %v5855_v30, %v2243_v2  ;;  %v2472_v31 = vpop.f32.mrf.mxu3  ;;  %v6012_v47 = vadd.f32 %v2466_v38, %v2354_v43  ;;  %v3438_v2 = vunpack.i.l.bf16 %v3437_v46  ;;  %v800_v46 = vpop.permute.xlu2 %799 }
 0x564   :  { %v2356_v7 = vpop.f32.mrf.mxu2 }
 0x565   :  { %v2357_v32 = vadd.f32 %v2356_v7, %v2244_v62 }
 0x566   :  { %2903 = vmatmul.msk.f32.gmra.mxu3 %vm1889_vm2, %v1373_v19  ;;  %v2246_v25 = vpop.f32.mrf.mxu1  ;;  %v6733_v19 = vld [vmem:[#allocation14_spill] sm:$0xff] }
 0x567   :  { %v6007_v22 = vadd.f32 %v2469_v44, %v2357_v32  ;;  %v2247_v61 = vadd.f32 %v5855_v30, %v2246_v25  ;;  %v1915_v52 = vsel %vm1889_vm2, %v6733_v19, %v3439_v36  ;;  %v1995_v25 = vsel %vm1889_vm2, %v6737_v45, %v3438_v2  ;;  %v3457_v5 = vpop.permute.xlu2 %3456 }
 0x568   :  { %v1948_v38 = vsel %vm1922_vm3, %v1915_v52, %v6735_v3  ;;  %v6041_v19 = vmax.f32 %v5804_v54, %v800_v46  ;;  %v3458_v51 = vunpack.i.l.bf16 %v3457_v5 }
 0x569   :  { %v2523_v33 = vmax.f32 %v6005_v57, %v6007_v22  ;;  %v2655_v57 = vld [vmem:[%s6409_s7 + $0x60] sm:$0xff] }
 0x56a   :  { %2670 = vmatpush.msra.mxu2 %v2655_v57  ;;  %v6755_v57 = vld [vmem:[#allocation15_spill] sm:$0xff] }
 0x56c   :  { %v2359_v60 = vpop.f32.mrf.mxu2 }
 0x56d   :  { %v2360_v34 = vadd.f32 %v2359_v60, %v2247_v61 }
 0x56e   :  { %v2249_v36 = vpop.f32.mrf.mxu1 }
 0x56f   :  { %v6014_v35 = vadd.f32 %v2472_v31, %v2360_v34  ;;  %v2250_v52 = vadd.f32 %v5855_v30, %v2249_v36 }
 0x571   :  { %v2524_v40 = vmax.f32 %v6012_v47, %v6014_v35  ;;  %v2581_v47 = vld [vmem:[%s6407_s5 + $0xb0] sm:$0xff]  ;;  %v2654_v35 = vld [vmem:[%s6409_s7 + $0x58] sm:$0xff] }
 0x572   :  { %2671 = vmatpush.msra.mxu2 %v2654_v35  ;;  %v6757_v35 = vld [vmem:[#allocation2_spill] sm:$0xff] }
 0x581   :  { %v3442_v63 = vpop.permute.xlu0 %3441  ;;  %v3427_v13 = vpop.permute.xlu1 %3426 }
 0x582   :  { %v3444_v26 = vunpack.i.h.bf16 %v3442_v63  ;;  %v3428_v42 = vunpack.i.l.bf16 %v3427_v13  ;;  %v3429_v44 = vunpack.i.h.bf16 %v3427_v13  ;;  %v3443_v7 = vunpack.i.l.bf16 %v3442_v63  ;;  %v6738_v13 = vld [vmem:[#allocation31_spill] sm:$0xff] }
 0x584   :  { %v1981_v43 = vsel %vm1955_vm4, %v1948_v38, %v3444_v26  ;;  %v2026_v6 = vsel %vm1922_vm3, %v1994_v48, %v3428_v42  ;;  %v2027_v60 = vsel %vm1922_vm3, %v1995_v25, %v3429_v44  ;;  %v2475_v26 = vpop.f32.mrf.mxu3 }
 0x585   :  { %2263 = vmatmul.f32.gmra.mxu1 %v1981_v43  ;;  %v2058_v62 = vsel %vm1955_vm4, %v2026_v6, %v3433_v8  ;;  %v2059_v31 = vsel %vm1955_vm4, %v2027_v60, %v3443_v7  ;;  %v6739_v43 = vld [vmem:[#allocation27_spill] sm:$0xff] }
 0x586   :  { %2373 = vmatmul.f32.gmra.mxu2 %v2058_v62 }
 0x589   :  { %v798_v32 = vpop.permute.xlu1 %797  ;;  %v3447_v34 = vpop.permute.xlu0 %3446 }
 0x58a   :  { %v6033_v61 = vmax.f32 %v5883_v28, %v798_v32  ;;  %v3448_v8 = vunpack.i.l.bf16 %v3447_v34  ;;  %v3449_v2 = vunpack.i.h.bf16 %v3447_v34  ;;  %v3459_v34 = vunpack.i.h.bf16 %v3457_v5 }
 0x58c   :  { %1157 = vrot.lane.b32.xlu2 %v6033_v61, %s3504_s20  ;;  %v1996_v48 = vsel %vm1889_vm2, %v5303_v59, %v3448_v8  ;;  %v2478_v25 = vpop.f32.mrf.mxu3  ;;  %v1997_v59 = vsel %vm1889_vm2, %v5325_v58, %v3449_v2 }
 0x58d   :  { %2266 = vmatmul.f32.gmra.mxu1 %v5666_v37 }
 0x58e   :  { %2376 = vmatmul.f32.gmra.mxu2 %v2059_v31 }
 0x591   :  { %v1156_v50 = vpop.permute.xlu1 %1155  ;;  %v3462_v54 = vpop.permute.xlu0 %3461 }
 0x592   :  { %v1302_v28 = vmax.f32 %v5909_v15, %v1156_v50 }
 0x594   :  { %v1374_v63 = vmax.f32 %v1302_v28, 0.0  ;;  %1159 = vrot.lane.b32.xlu2 %v6041_v19, %s3504_s20 }
 0x595   :  { %2269 = vmatmul.f32.gmra.mxu1 %v6738_v13  ;;  %v2362_v37 = vpop.f32.mrf.mxu2 }
 0x596   :  { %v2363_v42 = vadd.f32 %v2362_v37, %v2250_v52  ;;  %1873 = vrot.lane.b32.xlu1 %v1374_v63, %s3503_s28  ;;  %2904 = vmatmul.msk.f32.gmra.mxu3 %vm1889_vm2, %v1374_v63  ;;  %v3463_v52 = vunpack.i.l.bf16 %v3462_v54  ;;  %v6740_v63 = vunpack.i.l.bf16 %v5704_v0 }
 0x598   :  { %v2252_v15 = vpop.f32.mrf.mxu1 }
 0x599   :  { %v3452_v3 = vpop.permute.xlu1 %3451  ;;  %v2253_v62 = vadd.f32 %v5855_v30, %v2252_v15  ;;  %v3482_v60 = vpop.permute.xlu0 %3481 }
 0x59a   :  { %v3453_v38 = vunpack.i.l.bf16 %v3452_v3  ;;  %v3454_v7 = vunpack.i.h.bf16 %v3452_v3  ;;  %v3484_v8 = vunpack.i.h.bf16 %v3482_v60  ;;  %v3472_v15 = vpop.permute.xlu2 %3471 }
 0x59c   :  { %1575 = vrot.lane.b32.xlu2 %v6739_v43, %s3504_s20  ;;  %v2028_v6 = vsel %vm1922_vm3, %v1996_v48, %v3453_v38  ;;  %v2029_v50 = vsel %vm1922_vm3, %v1997_v59, %v3454_v7  ;;  %v6741_v38 = vld [vmem:[#allocation36_spill] sm:$0xff]  ;;  %v1952_v5 = vsel %vm1922_vm3, %v5787_v49, %v3484_v8  ;;  %v3473_v48 = vunpack.i.l.bf16 %v3472_v15 }
 0x59d   :  { %v2060_v44 = vsel %vm1955_vm4, %v2028_v6, %v3458_v51  ;;  %v2061_v37 = vsel %vm1955_vm4, %v2029_v50, %v3459_v34  ;;  %v1998_v51 = vsel %vm1889_vm2, %v6741_v38, %v3463_v52  ;;  %v6742_v7 = vunpack.i.h.bf16 %v5704_v0 }
 0x59e   :  { %v2365_v32 = vpop.f32.mrf.mxu2  ;;  %2379 = vmatmul.f32.gmra.mxu2 %v2060_v44  ;;  %v6078_v49 = vadd.f32 %v2475_v26, %v2363_v42  ;;  %v6744_v52 = vunpack.i.l.bf16 %v5868_v16 }
 0x59f   :  { %v2366_v45 = vadd.f32 %v2365_v32, %v2253_v62  ;;  %v3464_v62 = vunpack.i.h.bf16 %v3462_v54  ;;  %v1985_v32 = vsel %vm1955_vm4, %v1952_v5, %v6742_v7  ;;  %v6743_v54 = vld [vmem:[#allocation29_spill] sm:$0xff] }
 0x5a0   :  { %v2255_v58 = vpop.f32.mrf.mxu1  ;;  %v2570_v7 = vld [vmem:[%s6407_s5 + $0x58] sm:$0xff] }
 0x5a1   :  { %v6057_v31 = vadd.f32 %v2478_v25, %v2366_v45  ;;  %v3467_v46 = vpop.permute.xlu1 %3466  ;;  %v2256_v43 = vadd.f32 %v5855_v30, %v2255_v58  ;;  %v3487_v6 = vpop.permute.xlu0 %3486  ;;  %v3483_v25 = vunpack.i.l.bf16 %v3482_v60  ;;  %v1999_v34 = vsel %vm1889_vm2, %v6743_v54, %v3464_v62  ;;  %v6745_v58 = vld [vmem:[#allocation20_spill] sm:$0xff] }
 0x5a2   :  { %v3469_v36 = vunpack.i.h.bf16 %v3467_v46  ;;  %v3468_v3 = vunpack.i.l.bf16 %v3467_v46  ;;  %v3489_v46 = vunpack.i.h.bf16 %v3487_v6  ;;  %v3474_v60 = vunpack.i.h.bf16 %v3472_v15  ;;  %v2565_v54 = vld [vmem:[%s6407_s5 + $0x30] sm:$0xff] }
 0x5a4   :  { %v1951_v28 = vsel %vm1922_vm3, %v5759_v53, %v3469_v36  ;;  %v2030_v53 = vsel %vm1922_vm3, %v1998_v51, %v3468_v3  ;;  %v1953_v0 = vsel %vm1922_vm3, %v5875_v23, %v3489_v46  ;;  %v2573_v23 = vld [vmem:[%s6407_s5 + $0x70] sm:$0xff]  ;;  %v2572_v3 = vld [vmem:[%s6407_s5 + $0x68] sm:$0xff]  ;;  %v3488_v51 = vunpack.i.l.bf16 %v3487_v6  ;;  %v2567_v46 = vld [vmem:[%s6407_s5 + $0x40] sm:$0xff] }
 0x5a5   :  { %v1984_v13 = vsel %vm1955_vm4, %v1951_v28, %v6740_v63  ;;  %v2062_v45 = vsel %vm1955_vm4, %v2030_v53, %v3473_v48  ;;  %v2031_v28 = vsel %vm1922_vm3, %v1999_v34, %v3483_v25  ;;  %v1986_v63 = vsel %vm1955_vm4, %v1953_v0, %v6744_v52  ;;  %v2569_v6 = vld [vmem:[%s6407_s5 + $0x50] sm:$0xff]  ;;  %v2568_v25 = vld [vmem:[%s6407_s5 + $0x48] sm:$0xff]  ;;  %v2590_v0 = vld [vmem:[%s6407_s5 + $0xf8] sm:$0xff] }
 0x5a6   :  { %2272 = vmatmul.f32.gmra.mxu1 %v1984_v13  ;;  %2382 = vmatmul.f32.gmra.mxu2 %v2061_v37  ;;  %v2481_v59 = vpop.f32.mrf.mxu3  ;;  %v2063_v26 = vsel %vm1955_vm4, %v2031_v28, %v3474_v60  ;;  %v2574_v37 = vld [vmem:[%s6407_s5 + $0x78] sm:$0xff]  ;;  %v2564_v34 = vld [vmem:[%s6407_s5 + $0x28] sm:$0xff]  ;;  %v2563_v28 = vld [vmem:[%s6407_s5 + $0x20] sm:$0xff] }
 0x5a7   :  { %2595 = vmatpush.msra.mxu3 %v2574_v37  ;;  %2618 = vmatpush.msra.mxu1 %v2590_v0  ;;  %v2562_v60 = vld [vmem:[%s6407_s5 + $0x18] sm:$0xff]  ;;  %v2561_v52 = vld [vmem:[%s6407_s5 + $0x10] sm:$0xff]  ;;  %v2220_v37 = vadd.f32 %v5855_v30, %v5844_v21 }
 0x5a9   :  { %2596 = vmatpush.msra.mxu3 %v2573_v23  ;;  %v1820_v21 = vpop.permute.xlu0 %1819 }
 0x5ab   :  { %2597 = vmatpush.msra.mxu3 %v2572_v3  ;;  %v6746_v3 = vld [vmem:[#allocation30_spill] sm:$0xff] }
 0x5ac   :  { %v2368_v2 = vpop.f32.mrf.mxu2 }
 0x5ad   :  { %v2369_v44 = vadd.f32 %v2368_v2, %v2256_v43 }
 0x5ae   :  { %2275 = vmatmul.f32.gmra.mxu1 %v1985_v32  ;;  %2385 = vmatmul.f32.gmra.mxu2 %v2062_v45 }
 0x5af   :  { %v6080_v36 = vadd.f32 %v2481_v59, %v2369_v44  ;;  %v2258_v8 = vpop.f32.mrf.mxu1  ;;  %v2571_v44 = vld [vmem:[%s6407_s5 + $0x60] sm:$0xff]  ;;  %v2566_v59 = vld [vmem:[%s6407_s5 + $0x38] sm:$0xff] }
 0x5b0   :  { %v2259_v5 = vadd.f32 %v5855_v30, %v2258_v8  ;;  %2598 = vmatpush.msra.mxu3 %v2571_v44 }
 0x5b1   :  { %v2529_v50 = vmax.f32 %v6078_v49, %v6080_v36  ;;  %v2577_v49 = vld [vmem:[%s6407_s5 + $0x90] sm:$0xff]  ;;  %v2650_v36 = vld [vmem:[%s6409_s7 + $0x38] sm:$0xff] }
 0x5b2   :  { %v6093_v42 = vpop.permute.xlu1 %3476  ;;  %2599 = vmatpush.msra.mxu3 %v2570_v7 }
 0x5b3   :  { %v3478_v13 = vunpack.i.l.bf16 %v6093_v42 }
 0x5b4   :  { %2600 = vmatpush.msra.mxu3 %v2569_v6 }
 0x5b5   :  { %v2371_v15 = vpop.f32.mrf.mxu2  ;;  %v2000_v38 = vsel %vm1889_vm2, %v6745_v58, %v3478_v13  ;;  %v2589_v13 = vld [vmem:[%s6407_s5 + $0xf0] sm:$0xff]  ;;  %v2214_v58 = vadd.f32 %v5855_v30, %v5822_v11  ;;  %v2588_v11 = vld [vmem:[%s6407_s5 + $0xe8] sm:$0xff] }
 0x5b6   :  { %2278 = vmatmul.f32.gmra.mxu1 %v1986_v63  ;;  %2388 = vmatmul.f32.gmra.mxu2 %v2063_v26  ;;  %v2372_v53 = vadd.f32 %v2371_v15, %v2259_v5  ;;  %v2032_v43 = vsel %vm1922_vm3, %v2000_v38, %v3488_v51  ;;  %v2560_v63 = vld [vmem:[%s6407_s5 + $0x8] sm:$0xff]  ;;  %v2559_v26 = vld [vmem:[%s6407_s5] sm:$0xff]  ;;  %v2196_v15 = vadd.f32 %v5855_v30, %v6746_v3 }
 0x5b7   :  { %2601 = vmatpush.msra.mxu3 %v2568_v25  ;;  %2619 = vmatpush.msra.mxu1 %v2589_v13  ;;  %v2333_v38 = vadd.f32 %v5849_v29, %v2220_v37  ;;  %v6747_v5 = vld [vmem:[#allocation38_spill] sm:$0xff] }
 0x5b9   :  { %2602 = vmatpush.msra.mxu3 %v2567_v46  ;;  %2620 = vmatpush.msra.mxu1 %v2588_v11 }
 0x5bb   :  { %2603 = vmatpush.msra.mxu3 %v2566_v59 }
 0x5bd   :  { %2604 = vmatpush.msra.mxu3 %v2565_v54 }
 0x5bf   :  { %2605 = vmatpush.msra.mxu3 %v2564_v34  ;;  %v2538_v54 = vpop.permute.xlu0 %2537 }
 0x5c0   :  { %v1872_v48 = vpop.permute.xlu1 %1871 }
 0x5c1   :  { %v2484_v2 = vpop.f32.mrf.mxu3  ;;  %v2064_v62 = vsel %vm1955_vm4, %v2032_v43, %v1872_v48  ;;  %2606 = vmatpush.msra.mxu3 %v2563_v28  ;;  %v2309_v48 = vadd.f32 %v5643_v1, %v2196_v15  ;;  %v2327_v43 = vadd.f32 %v5835_v17, %v2214_v58  ;;  %v6749_v17 = vld [vmem:[#allocation3_spill] sm:$0xff] }
 0x5c2   :  { %v6116_v32 = vadd.f32 %v2484_v2, %v2372_v53  ;;  %2391 = vmatmul.f32.gmra.mxu2 %v2064_v62  ;;  %v2190_v53 = vadd.f32 %v5855_v30, %v6747_v5  ;;  %v2446_v62 = vadd.f32 %v5886_v12, %v2333_v38 }
 0x5c3   :  { %2607 = vmatpush.msra.mxu3 %v2562_v60  ;;  %v2422_v29 = vadd.f32 %v5692_v55, %v2309_v48  ;;  %v2440_v44 = vadd.f32 %v5846_v41, %v2327_v43  ;;  %v6750_v41 = vunpack.i.h.bf16 %v5868_v16  ;;  %v2587_v60 = vld [vmem:[%s6407_s5 + $0xe0] sm:$0xff] }
 0x5c4   :  { %v2530_v45 = vmax.f32 %v6057_v31, %v6116_v32  ;;  %2621 = vmatpush.msra.mxu1 %v2587_v60  ;;  %v2645_v31 = vld [vmem:[%s6409_s7 + $0x10] sm:$0xff]  ;;  %v2644_v32 = vld [vmem:[%s6409_s7 + $0x8] sm:$0xff] }
 0x5c5   :  { %2608 = vmatpush.msra.mxu3 %v2561_v52  ;;  %v2513_v25 = vmax.f32 %v2440_v44, %v2446_v62  ;;  %v3479_v52 = vunpack.i.h.bf16 %v6093_v42  ;;  %v2586_v42 = vld [vmem:[%s6407_s5 + $0xd8] sm:$0xff] }
 0x5c6   :  { %2622 = vmatpush.msra.mxu1 %v2586_v42  ;;  %v6753_v42 = vld [vmem:[#allocation26_spill] sm:$0xff] }
 0x5c7   :  { %2609 = vmatpush.msra.mxu3 %v2560_v63  ;;  %v2261_v63 = vpop.f32.mrf.mxu1 }
 0x5c9   :  { %2610 = vmatpush.msra.mxu3 %v2559_v26  ;;  %v6751_v26 = vld [vmem:[#allocation7_spill] sm:$0xff] }
 0x5ca   :  { %v2001_v13 = vsel %vm1889_vm2, %v6751_v26, %v3479_v52  ;;  %v2211_v52 = vadd.f32 %v5855_v30, %v5796_v24  ;;  %v2205_v26 = vadd.f32 %v5855_v30, %v5724_v9 }
 0x5cb   :  { %v2033_v16 = vsel %vm1922_vm3, %v2001_v13, %v1820_v21 }
 0x5cc   :  { %v2324_v13 = vadd.f32 %v5814_v27, %v2211_v52 }
 0x5e6   :  { %v1158_v23 = vpop.permute.xlu2 %1157 }
 0x5e7   :  { %v1303_v8 = vmax.f32 %v6033_v61, %v1158_v23  ;;  %v6748_v61 = vld [vmem:[#allocation23_spill] sm:$0xff]  ;;  %v2487_v23 = vpop.f32.mrf.mxu3 }
 0x5e8   :  { %v2303_v2 = vadd.f32 %v6748_v61, %v2190_v53  ;;  %v2585_v61 = vld [vmem:[%s6407_s5 + $0xd0] sm:$0xff] }
 0x5e9   :  { %v1375_v51 = vmax.f32 %v1303_v8, 0.0  ;;  %2623 = vmatpush.msra.mxu1 %v2585_v61  ;;  %v2579_v61 = vld [vmem:[%s6407_s5 + $0xa0] sm:$0xff] }
 0x5ea   :  { %v2416_v6 = vadd.f32 %v6749_v17, %v2303_v2  ;;  %v2584_v17 = vld [vmem:[%s6407_s5 + $0xc8] sm:$0xff] }
 0x5eb   :  { %2905 = vmatmul.msk.f32.gmra.mxu3 %vm1889_vm2, %v1375_v51  ;;  %2624 = vmatpush.msra.mxu1 %v2584_v17 }
 0x5ec   :  { %v2511_v59 = vmax.f32 %v2416_v6, %v2422_v29  ;;  %v2583_v6 = vld [vmem:[%s6407_s5 + $0xc0] sm:$0xff] }
 0x5ed   :  { %2625 = vmatpush.msra.mxu1 %v2583_v6 }
 0x5ee   :  { %v1160_v7 = vpop.permute.xlu2 %1159  ;;  %v2515_v12 = vmax.f32 %v2511_v59, %v2513_v25 }
 0x5ef   :  { %v1304_v1 = vmax.f32 %v6041_v19, %v1160_v7  ;;  %v2490_v48 = vpop.f32.mrf.mxu3 }
 0x5f0   :  { %v2551_v34 = vsel %vm1922_vm3, %v2515_v12, %v2538_v54 }
 0x5f1   :  { %v1376_v46 = vmax.f32 %v1304_v1, 0.0  ;;  %v2555_v19 = vmax.f32 %v2551_v34, 0.0 }
 0x5f3   :  { %2906 = vmatmul.msk.f32.gmra.mxu3 %vm1889_vm2, %v1376_v46 }
 0x5f6   :  { %v1576_v0 = vpop.permute.xlu2 %1575 }
 0x5f7   :  { %v1954_v55 = vsel %vm1922_vm3, %v5895_v56, %v1576_v0  ;;  %v2262_v56 = vadd.f32 %v5855_v30, %v2261_v63  ;;  %v2493_v62 = vpop.f32.mrf.mxu3 }
 0x5f8   :  { %v1987_v28 = vsel %vm1955_vm4, %v1954_v55, %v6750_v41 }
 0x5f9   :  { %2281 = vmatmul.f32.gmra.mxu1 %v1987_v28  ;;  %v2582_v28 = vld [vmem:[%s6407_s5 + $0xb8] sm:$0xff] }
 0x5fa   :  { %2626 = vmatpush.msra.mxu1 %v2582_v28 }
 0x5fb   :  { %2611 = vmatmul.f32.vlgmr.msra.gmra.mxu3 %v2555_v19 }
 0x5fc   :  { %2627 = vmatpush.msra.mxu1 %v2581_v47 }
 0x5ff   :  { %v2496_v12 = vpop.f32.mrf.mxu3 }
 0x602   :  { %v2264_v38 = vpop.f32.mrf.mxu1 }
 0x603   :  { %v2265_v51 = vadd.f32 %v5855_v30, %v2264_v38 }
 0x608   :  { %v1874_v37 = vpop.permute.xlu1 %1873 }
 0x609   :  { %v2374_v8 = vpop.f32.mrf.mxu2  ;;  %v2065_v3 = vsel %vm1955_vm4, %v2033_v16, %v1874_v37  ;;  %v2318_v16 = vadd.f32 %v5753_v14, %v2205_v26 }
 0x60a   :  { %v2375_v15 = vadd.f32 %v2374_v8, %v2262_v56  ;;  %2394 = vmatmul.f32.gmra.mxu2 %v2065_v3  ;;  %v2267_v21 = vpop.f32.mrf.mxu1  ;;  %v6752_v3 = vld [vmem:[#allocation37_spill] sm:$0xff] }
 0x60b   :  { %v2268_v2 = vadd.f32 %v5855_v30, %v2267_v21  ;;  %v2431_v24 = vadd.f32 %v6753_v42, %v2318_v16  ;;  %v2653_v21 = vld [vmem:[%s6409_s7 + $0x50] sm:$0xff]  ;;  %v6761_v16 = vld [vmem:[#allocation11_spill] sm:$0xff] }
 0x60c   :  { %v2488_v58 = vadd.f32 %v2487_v23, %v2375_v15  ;;  %v2437_v15 = vadd.f32 %v6752_v3, %v2324_v13  ;;  %2672 = vmatpush.msra.mxu2 %v2653_v21  ;;  %v2449_v13 = vadd.f32 %v5916_v20, %v5866_v18 }
 0x60e   :  { %2673 = vmatpush.msra.mxu2 %v2652_v10 }
 0x611   :  { %v2377_v5 = vpop.f32.mrf.mxu2 }
 0x612   :  { %v2378_v53 = vadd.f32 %v2377_v5, %v2265_v51  ;;  %v2270_v7 = vpop.f32.mrf.mxu1 }
 0x613   :  { %v2271_v25 = vadd.f32 %v5855_v30, %v2270_v7 }
 0x614   :  { %v2491_v43 = vadd.f32 %v2490_v48, %v2378_v53  ;;  %v2518_v53 = vmax.f32 %v2431_v24, %v2437_v15  ;;  %v2580_v48 = vld [vmem:[%s6407_s5 + $0xa8] sm:$0xff] }
 0x615   :  { %2628 = vmatpush.msra.mxu1 %v2580_v48 }
 0x616   :  { %v2522_v27 = vmax.f32 %v2518_v53, %v2520_v4  ;;  %v2651_v4 = vld [vmem:[%s6409_s7 + $0x40] sm:$0xff] }
 0x617   :  { %2629 = vmatpush.msra.mxu1 %v2579_v61  ;;  %2674 = vmatpush.msra.mxu2 %v2651_v4 }
 0x619   :  { %2630 = vmatpush.msra.mxu1 %v2578_v39  ;;  %2675 = vmatpush.msra.mxu2 %v2650_v36 }
 0x61b   :  { %2631 = vmatpush.msra.mxu1 %v2577_v49 }
 0x621   :  { %v2380_v11 = vpop.f32.mrf.mxu2 }
 0x622   :  { %v2381_v29 = vadd.f32 %v2380_v11, %v2268_v2  ;;  %v2649_v2 = vld [vmem:[%s6409_s7 + $0x30] sm:$0xff] }
 0x623   :  { %v2273_v41 = vpop.f32.mrf.mxu1  ;;  %2676 = vmatpush.msra.mxu2 %v2649_v2  ;;  %v2693_v2 = vld [vmem:[%s6412_s9 + $0x8] sm:$0xff] }
 0x624   :  { %v2494_v44 = vadd.f32 %v2493_v62, %v2381_v29  ;;  %v2274_v56 = vadd.f32 %v5855_v30, %v2273_v41  ;;  %v2575_v62 = vld [vmem:[%s6407_s5 + $0x80] sm:$0xff]  ;;  %v2646_v41 = vld [vmem:[%s6409_s7 + $0x18] sm:$0xff] }
 0x626   :  { %v2525_v1 = vmax.f32 %v2488_v58, %v2494_v44 }
 0x628   :  { %v6215_v46 = vmax.f32 %v2523_v33, %v2525_v1  ;;  %v2499_v33 = vpop.f32.mrf.mxu3 }
 0x629   :  { %v2383_v59 = vpop.f32.mrf.mxu2 }
 0x62a   :  { %v2384_v54 = vadd.f32 %v2383_v59, %v2271_v25 }
 0x62b   :  { %v2276_v19 = vpop.f32.mrf.mxu1 }
 0x62c   :  { %v2497_v34 = vadd.f32 %v2496_v12, %v2384_v54  ;;  %v2277_v29 = vadd.f32 %v5855_v30, %v2276_v19  ;;  %v6756_v19 = vld [vmem:[#allocation9_spill] sm:$0xff] }
 0x62d   :  { %v2193_v47 = vadd.f32 %v5855_v30, %v6756_v19 }
 0x62e   :  { %v2526_v0 = vmax.f32 %v2491_v43, %v2497_v34  ;;  %v2648_v34 = vld [vmem:[%s6409_s7 + $0x28] sm:$0xff] }
 0x62f   :  { %2677 = vmatpush.msra.mxu2 %v2648_v34  ;;  %v2755_v34 = vld [vmem:[%s6413_s12 + $0x30] sm:$0xff] }
 0x630   :  { %v6220_v55 = vmax.f32 %v2524_v40, %v2526_v0  ;;  %v2502_v60 = vpop.f32.mrf.mxu3  ;;  %v2647_v0 = vld [vmem:[%s6409_s7 + $0x20] sm:$0xff] }
 0x631   :  { %v2386_v22 = vpop.f32.mrf.mxu2  ;;  %2678 = vmatpush.msra.mxu2 %v2647_v0  ;;  %v2754_v0 = vld [vmem:[%s6413_s12 + $0x28] sm:$0xff] }
 0x632   :  { %v2387_v23 = vadd.f32 %v2386_v22, %v2274_v56  ;;  %v2217_v22 = vadd.f32 %v5855_v30, %v6755_v57  ;;  %v6760_v56 = vld [vmem:[#allocation12_spill] sm:$0xff] }
 0x633   :  { %v2279_v63 = vpop.f32.mrf.mxu1  ;;  %2679 = vmatpush.msra.mxu2 %v2646_v41  ;;  %v2753_v41 = vld [vmem:[%s6413_s12 + $0x20] sm:$0xff] }
 0x634   :  { %v2280_v8 = vadd.f32 %v5855_v30, %v2279_v63  ;;  %v2500_v51 = vadd.f32 %v2499_v33, %v2387_v23  ;;  %v2643_v33 = vld [vmem:[%s6409_s7] sm:$0xff]  ;;  %v6759_v63 = vld [vmem:[#allocation28_spill] sm:$0xff] }
 0x635   :  { %2680 = vmatpush.msra.mxu2 %v2645_v31  ;;  %v2306_v26 = vadd.f32 %v6759_v63, %v2193_v47  ;;  %v2752_v31 = vld [vmem:[%s6413_s12 + $0x18] sm:$0xff] }
 0x637   :  { %2681 = vmatpush.msra.mxu2 %v2644_v32  ;;  %v2751_v32 = vld [vmem:[%s6413_s12 + $0x10] sm:$0xff] }
 0x639   :  { %v2389_v40 = vpop.f32.mrf.mxu2  ;;  %2682 = vmatpush.msra.mxu2 %v2643_v33 }
 0x63a   :  { %v2390_v44 = vadd.f32 %v2389_v40, %v2277_v29  ;;  %v2760_v29 = vld [vmem:[%s6413_s12 + $0x58] sm:$0xff] }
 0x63c   :  { %v2503_v25 = vadd.f32 %v2502_v60, %v2390_v44  ;;  %v6758_v60 = vld [vmem:[#allocation39_spill] sm:$0xff]  ;;  %v2759_v44 = vld [vmem:[%s6413_s12 + $0x50] sm:$0xff] }
 0x63d   :  { %v2330_v52 = vadd.f32 %v6758_v60, %v2217_v22  ;;  %v3499_v22 = vld [vmem:[%s6416_s11] ss:$0 sm:$0xff] }
 0x63f   :  { %v2443_v23 = vadd.f32 %v6761_v16, %v2330_v52 }
 0x641   :  { %v2514_v15 = vmax.f32 %v2443_v23, %v2449_v13 }
 0x645   :  { %v2392_v37 = vpop.f32.mrf.mxu2 }
 0x646   :  { %v2393_v58 = vadd.f32 %v2392_v37, %v2280_v8  ;;  %v6762_v8 = vld [vmem:[#allocation32_spill] sm:$0xff] }
 0x647   :  { %v2419_v3 = vadd.f32 %v6762_v8, %v2306_v26 }
 0x66e   :  { %v2505_v38 = vpop.f32.mrf.mxu3 }
 0x66f   :  { %v2506_v5 = vadd.f32 %v2505_v38, %v2393_v58 }
 0x671   :  { %v2531_v9 = vmax.f32 %v2500_v51, %v2506_v5 }
 0x673   :  { %v2533_v14 = vmax.f32 %v2529_v50, %v2531_v9  ;;  %v2576_v50 = vld [vmem:[%s6407_s5 + $0x88] sm:$0xff] }
 0x674   :  { %2632 = vmatpush.msra.mxu1 %v2576_v50  ;;  %v2694_v50 = vld [vmem:[%s6411_s10] sm:$0xff] }
 0x675   :  { %v3490_v43 = vpack.i.bf16 %v2533_v14, %v2522_v27  ;;  %v2695_v14 = vld [vmem:[%s6411_s10 + $0x8] sm:$0xff] }
 0x676   :  { %2633 = vmatpush.msra.mxu1 %v2575_v62  ;;  %v2282_v11 = vpop.f32.mrf.mxu1  ;;  %v2508_v6 = vpop.f32.mrf.mxu3  ;;  %2714 = vmatpush.msrb.mxu3 %v2695_v14  ;;  %v2692_v62 = vld [vmem:[%s6412_s9] sm:$0xff] }
 0x677   :  { %3491 = vrot.lane.b32.xlu1 %v3490_v43, %s3504_s20  ;;  %v2283_v7 = vadd.f32 %v5855_v30, %v2282_v11  ;;  %v2761_v11 = vld [vmem:[%s6413_s12 + $0x60] sm:$0xff] }
 0x678   :  { %2715 = vmatpush.msrb.mxu3 %v2694_v50  ;;  %2772 = vmatpush.msrb.mxu1 %v2761_v11 }
 0x67a   :  { %2737 = vmatpush.msra.mxu3 %v2693_v2  ;;  %2773 = vmatpush.msrb.mxu1 %v2760_v29 }
 0x67c   :  { %2738 = vmatpush.msra.mxu3 %v2692_v62  ;;  %2774 = vmatpush.msrb.mxu1 %v2759_v44 }
 0x67e   :  { %v2612_v48 = vpop.f32.mrf.mxu3 }
 0x68d   :  { %v2395_v1 = vpop.f32.mrf.mxu2 }
 0x68e   :  { %v2396_v17 = vadd.f32 %v2395_v1, %v2283_v7  ;;  %v2758_v7 = vld [vmem:[%s6413_s12 + $0x48] sm:$0xff]  ;;  %v2757_v1 = vld [vmem:[%s6413_s12 + $0x40] sm:$0xff] }
 0x68f   :  { %2775 = vmatpush.msrb.mxu1 %v2758_v7 }
 0x690   :  { %v2509_v59 = vadd.f32 %v2508_v6, %v2396_v17  ;;  %v3498_v17 = vld [vmem:[%s6410_s8] ss:$0 sm:$0xff] }
 0x691   :  { %2776 = vmatpush.msrb.mxu1 %v2757_v1 }
 0x692   :  { %v2532_v54 = vmax.f32 %v2503_v25, %v2509_v59 }
 0x694   :  { %v2534_v12 = vmax.f32 %v2530_v45, %v2532_v54  ;;  %v6754_v45 = vld [vmem:[#allocation33_spill] sm:$0xff] }
 0x695   :  { %v2199_v28 = vadd.f32 %v5855_v30, %v6754_v45  ;;  %v2750_v45 = vld [vmem:[%s6413_s12 + $0x8] sm:$0xff] }
 0x696   :  { %2547 = vrot.lane.b32.xlu2 %v2534_v12, %s3504_s20  ;;  %v2756_v12 = vld [vmem:[%s6413_s12 + $0x38] sm:$0xff] }
 0x697   :  { %v2312_v40 = vadd.f32 %v6757_v35, %v2199_v28  ;;  %2777 = vmatpush.msrb.mxu1 %v2756_v12  ;;  %v2749_v28 = vld [vmem:[%s6413_s12] sm:$0xff] }
 0x699   :  { %v2425_v37 = vadd.f32 %v6760_v56, %v2312_v40  ;;  %2778 = vmatpush.msrb.mxu1 %v2755_v34  ;;  %v3500_v40 = vld [vmem:[%s6417_s13] ss:$0 sm:$0xff] }
 0x69b   :  { %v2512_v58 = vmax.f32 %v2419_v3, %v2425_v37  ;;  %2779 = vmatpush.msrb.mxu1 %v2754_v0 }
 0x69d   :  { %v2516_v38 = vmax.f32 %v2512_v58, %v2514_v15  ;;  %2780 = vmatpush.msrb.mxu1 %v2753_v41 }
 0x69f   :  { %2781 = vmatpush.msrb.mxu1 %v2752_v31 }
 0x6a1   :  { %2782 = vmatpush.msrb.mxu1 %v2751_v32 }
 0x6a3   :  { %2783 = vmatpush.msrb.mxu1 %v2750_v45 }
 0x6a5   :  { %2784 = vmatpush.msrb.mxu1 %v2749_v28 }
 0x6e9   :  { %v3492_v30 = vpop.permute.xlu1 %3491 }
 0x6ea   :  { %v3494_v42 = vunpack.i.h.bf16 %v3492_v30  ;;  %v3493_v24 = vunpack.i.l.bf16 %v3492_v30 }
 0x6ec   :  { %v2553_v51 = vsel %vm1922_vm3, %v6215_v46, %v3494_v42  ;;  %v2552_v5 = vsel %vm1922_vm3, %v2516_v38, %v3493_v24  ;;  %v3497_v46 = vld [vmem:[%s6408_s6] ss:$0 sm:$0xff] }
 0x6ed   :  { %v2556_v53 = vmax.f32 %v2553_v51, 0.0  ;;  %v2557_v18 = vmax.f32 %v2552_v5, 0.0  ;;  %v2613_v43 = vadd.f32 %v3497_v46, %v2612_v48 }
 0x6ef   :  { %2614 = vmatmul.f32.gmra.mxu3 %v2557_v18  ;;  %2634 = vmatmul.f32.vlgmr.msra.gmra.mxu1 %v2556_v53 }
 0x6f0   :  { %v2548_v20 = vpop.permute.xlu2 %2547 }
 0x6f1   :  { %v2554_v9 = vsel %vm1922_vm3, %v6220_v55, %v2548_v20 }
 0x6f2   :  { %v2558_v27 = vmax.f32 %v2554_v9, 0.0 }
 0x6f7   :  { %2637 = vmatmul.f32.gmra.mxu1 %v2558_v27 }
 0x76c   :  { %v2635_v21 = vpop.f32.mrf.mxu1 }
 0x76d   :  { %v2636_v61 = vadd.f32 %v2635_v21, %v2613_v43 }
 0x76f   :  { %v2641_v10 = vmax.f32 %v2636_v61, 0.0 }
 0x771   :  { %2907 = vmatmul.msk.f32.vlgmr.msra.gmra.mxu2 %vm2660_vm5, %v2641_v10 }
 0x772   :  { %v2615_v55 = vpop.f32.mrf.mxu3 }
 0x773   :  { %v2616_v39 = vadd.f32 %v3497_v46, %v2615_v55 }
 0x774   :  { %v2638_v4 = vpop.f32.mrf.mxu1 }
 0x775   :  { %v2639_v49 = vadd.f32 %v2638_v4, %v2616_v39 }
 0x777   :  { %v2642_v36 = vmax.f32 %v2639_v49, 0.0 }
 0x779   :  { %2908 = vmatmul.msk.f32.gmra.mxu2 %vm2660_vm5, %v2642_v36 }
 0x7f4   :  { %v2684_v6 = vpop.f32.mrf.mxu2 }
 0x7f5   :  { %v2685_v25 = vadd.f32 %v3498_v17, %v2684_v6 }
 0x7f7   :  { %2690 = vst [vmem:[%s6414_s14] sm:$0xff] %v2685_v25 }
 0x7fc   :  { %v2687_v59 = vpop.f32.mrf.mxu2 }
 0x7fd   :  { %v2688_v54 = vadd.f32 %v3498_v17, %v2687_v59 }
 0x7ff   :  { %2691 = vst [vmem:[%s6415_s15] sm:$0xff] %v2688_v54  ;;  %2909 = vmatmul.msk.f32.vlgmr.msrb.gmra.mxu3 %vm2696_vm6, %v2688_v54 }
 0x807   :  { %2910 = vmatmul.msk.f32.vlgmr.msra.gmra.mxu3 %vm2696_vm6, %v2685_v25 }
 0x882   :  { %v2717_v57 = vpop.f32.mrf.mxu3 }
 0x88a   :  { %v2740_v33 = vpop.f32.mrf.mxu3 }
 0x88b   :  { %v2741_v19 = vadd.f32 %v2740_v33, %v2717_v57 }
 0x88d   :  { %v2747_v47 = vadd.f32 %v3499_v22, %v2741_v19 }
 0x88f   :  { %v2748_v35 = vmax.f32 %v2747_v47, 0.0 }
 0x891   :  { %2911 = vmatmul.msk.f32.vlgmr.msrb.gmra.mxu1 %vm2660_vm5, %v2748_v35 }
 0x90e   :  { %v2786_v60 = vpop.f32.mrf.mxu1 }
 0x90f   :  { %v2787_v52 = vadd.f32 %v3500_v40, %v2786_v60 }
 0x911   :  { %2789 = vst [vmem:[%s6418_s16] sm:$0xff] %v2787_v52 }

</bundles_post_ra>
